<compile_context>
chip_gen: v7x
topology: tpu7x:2x2x1
jax: 0.10.0
libtpu: 0.0.40
codegen_flags: <defaults>
</compile_context>

<pallas_src>
import math

import numpy as np
import jax
import jax.numpy as jnp
from jax import lax
from jax.experimental import pallas as pl
from jax.experimental.pallas import tpu as pltpu

# ----------------------------------------------------------------------------
# Config
# ----------------------------------------------------------------------------
CFG = dict(
    gen_upsampling_type="nearest",
    gen_downsampling_type="avgpool",
    gen_num_channels=8,
    enc_channel_mult=1,
    norm_layer_type="gn",
    num_gpus=1,
    gen_input_image_size=16,
    gen_latent_texture_size=8,
    gen_max_channels=16,
    enc_block_type="res",
    gen_activation_type="relu",
    seg_out_channels=4,
    in_channels=3,
)
GN_GROUPS = 4     # divides every channel count used here
GN_EPS = 1e-5
IN_PAD = 8        # zero-pad input channels 3 -> 8 for sublane-aligned im2col rows


# ----------------------------------------------------------------------------
# Static architecture plan
# ----------------------------------------------------------------------------
def _arch_plan(cfg=CFG):
    H = cfg["gen_input_image_size"]
    ratio = H // cfg["gen_latent_texture_size"]
    num_blocks = int(math.log(ratio, 2))
    c0 = int(cfg["gen_num_channels"] * cfg["enc_channel_mult"])
    blocks = []
    cin = c0
    for _ in range(num_blocks):
        cout = min(cin * 2, cfg["gen_max_channels"])
        blocks.append((cin, cout))
        cin = cout
    return dict(H=H, in_ch=cfg["in_channels"], c0=c0, blocks=blocks,
                c_last=cin, seg_out=cfg["seg_out_channels"])


# ----------------------------------------------------------------------------
# Learned parameters (pre-packed into GEMM-ready layouts)
# ----------------------------------------------------------------------------
def _conv_gemm_param(key, cout, cin, k, cin_pad=None):
    cin_pad = cin if cin_pad is None else cin_pad
    kw_, kb_ = jax.random.split(key)
    w = jax.random.normal(kw_, (cout, cin, k, k), jnp.float32) / math.sqrt(cin * k * k)
    b = jax.random.normal(kb_, (cout,), jnp.float32) * 0.01
    if cin_pad > cin:
        w = jnp.pad(w, ((0, 0), (0, cin_pad - cin), (0, 0), (0, 0)))
    # column index = (dy*k + dx) * cin_pad + ci  == tap-major, matches im2col patch rows
    w_gemm = jnp.transpose(w, (0, 2, 3, 1)).reshape(cout, k * k * cin_pad)
    return [w_gemm, b.reshape(cout, 1)]


def init_params(key, cfg=CFG):
    plan = _arch_plan(cfg)
    nb = len(plan["blocks"])
    keys = list(jax.random.split(key, 2 + 3 * nb))
    ki = iter(keys)
    flat = []
    flat += _conv_gemm_param(next(ki), plan["c0"], plan["in_ch"], 7, cin_pad=IN_PAD)   # from_rgb
    for cin, cout in plan["blocks"]:
        flat += [jnp.ones((cin, 1), jnp.float32), jnp.zeros((cin, 1), jnp.float32)]    # gn1
        flat += _conv_gemm_param(next(ki), cout, cin, 3)                               # conv1
        flat += [jnp.ones((cout, 1), jnp.float32), jnp.zeros((cout, 1), jnp.float32)]  # gn2
        flat += _conv_gemm_param(next(ki), cout, cout, 3)                              # conv2
        flat += _conv_gemm_param(next(ki), cout, cin, 1)                               # skip 1x1
    flat += [jnp.ones((plan["c_last"], 1), jnp.float32),                               # final gn
             jnp.zeros((plan["c_last"], 1), jnp.float32)]
    flat += _conv_gemm_param(next(ki), plan["seg_out"], plan["c_last"], 1)             # final 1x1
    return flat


# ----------------------------------------------------------------------------
# Trace-time constants (hoisted out of the kernel per the perf review)
# ----------------------------------------------------------------------------
def _np_mask(k, H, W, N, cin):
    # (k*k*cin, N*H*W) validity mask for tap (dy,dx): handles height halo, width wrap AND
    # the inter-sample boundary of the lane-batched layout in one precomputed array.
    p = (k - 1) // 2
    HW = H * W
    pos = np.arange(N * HW)
    hh = (pos % HW) // W
    ww = pos % W
    t = np.arange(k * k)
    ddy = (t // k - p)[:, None]
    ddx = (t % k - p)[:, None]
    valid = ((hh[None, :] + ddy >= 0) & (hh[None, :] + ddy < H) &
             (ww[None, :] + ddx >= 0) & (ww[None, :] + ddx < W))
    return np.repeat(valid.astype(np.float32), cin, axis=0)


def _np_pool(H, W, N):
    # (N*H*W, N*H*W/4) matrix: avgpool2x2/2 == x @ P  (block-diagonal per sample)
    HW, Ho, Wo = H * W, H // 2, W // 2
    HWo = Ho * Wo
    r = np.arange(N * HW)
    c = np.arange(N * HWo)
    rn, rr = r // HW, r % HW
    rh, rw = rr // W, rr % W
    cn, cc = c // HWo, c % HWo
    ch, cw = cc // Wo, cc % Wo
    P = ((rn[:, None] == cn[None, :]) & ((rh // 2)[:, None] == ch[None, :]) &
         ((rw // 2)[:, None] == cw[None, :]))
    return P.astype(np.float32) * 0.25


def _np_gn_A(C, HW):
    # (C, C) group-mix matrix with 1/(cg*HW) baked in: group_mean = A @ per_channel_sum
    cg = C // GN_GROUPS
    r = np.arange(C)
    return (r[:, None] // cg == r[None, :] // cg).astype(np.float32) / float(cg * HW)


def _np_rsum(HW, N):
    # (N*HW, N) per-sample lane-reduction matrix
    pos = np.arange(N * HW)
    return (pos[:, None] // HW == np.arange(N)[None, :]).astype(np.float32)


def _np_bcast(HW, N):
    # (N, N*HW) per-sample lane-broadcast matrix
    pos = np.arange(N * HW)
    return (np.arange(N)[:, None] == pos[None, :] // HW).astype(np.float32)


# ----------------------------------------------------------------------------
# Fused kernel: whole forward in one grid step, everything stays in VMEM/vregs
# ----------------------------------------------------------------------------
def _make_kernel(plan, N):
    H0 = plan["H"]
    nb = len(plan["blocks"])
    NP = 2 + 10 * nb + 4          # learned params
    NC = 1 + 9 * nb + 3           # precomputed constants

    def conv(patch_ref, x, w_ref, b_ref, m_ref, cin, k, side):
        # im2col: k*k rolled+masked copies of x -> patch scratch, then ONE MXU GEMM.
        nhw = N * side * side
        p = (k - 1) // 2
        for t in range(k * k):
            ddy, ddx = t // k - p, t % k - p
            sh = ddy * side + ddx
            rows = slice(t * cin, (t + 1) * cin)
            if ddy == 0 and ddx == 0:
                patch_ref[rows, 0:nhw] = x                              # centre tap: all valid
            else:
                patch_ref[rows, 0:nhw] = (
                    pltpu.roll(x, shift=(-sh) % nhw, axis=1) * m_ref[rows, :])
        K = k * k * cin
        return jnp.dot(w_ref[...], patch_ref[0:K, 0:nhw],
                       preferred_element_type=jnp.float32) + b_ref[...]

    def gn_relu(x, g_ref, b_ref, A_ref, R_ref, B_ref):
        # per-channel/per-sample sum & sumsq first (skinny GEMM), then tiny group-mix matmuls
        sx = jnp.dot(x, R_ref[...], preferred_element_type=jnp.float32)        # (C, N)
        sxx = jnp.dot(x * x, R_ref[...], preferred_element_type=jnp.float32)   # (C, N)
        mean = jnp.dot(A_ref[...], sx, preferred_element_type=jnp.float32)     # (C, N)
        msq = jnp.dot(A_ref[...], sxx, preferred_element_type=jnp.float32)     # (C, N)
        var = jnp.maximum(msq - mean * mean, 0.0)
        scale = lax.rsqrt(var + GN_EPS) * g_ref[...]                           # (C, N)
        shift = b_ref[...] - mean * scale                                      # (C, N)
        sf = jnp.dot(scale, B_ref[...], preferred_element_type=jnp.float32)    # (C, NHW)
        bf = jnp.dot(shift, B_ref[...], preferred_element_type=jnp.float32)
        return jnp.maximum(x * sf + bf, 0.0)

    def kernel(x_ref, *rest):
        pit = iter(rest[:NP])
        cit = iter(rest[NP:NP + NC])
        o_ref = rest[NP + NC]
        patch_ref = rest[NP + NC + 1]

        hc = H0
        x = x_ref[...]                                           # (IN_PAD, N*H*W)

        w0, b0 = next(pit), next(pit)
        m0 = next(cit)
        x = conv(patch_ref, x, w0, b0, m0, IN_PAD, 7, hc)        # seg_from_rgb 7x7, pad 3

        for cin, cout in plan["blocks"]:                         # res block(s) (assumed struct)
            g1, be1 = next(pit), next(pit)
            w1, b1 = next(pit), next(pit)
            g2, be2 = next(pit), next(pit)
            w2, b2 = next(pit), next(pit)
            ws, bs = next(pit), next(pit)
            A1, R1, B1 = next(cit), next(cit), next(cit)
            m1 = next(cit)
            P = next(cit)
            A2, R2, B2 = next(cit), next(cit), next(cit)
            m2 = next(cit)

            x_in = x
            h = gn_relu(x_in, g1, be1, A1, R1, B1)
            h = conv(patch_ref, h, w1, b1, m1, cin, 3, hc)
            h = jnp.dot(h, P[...], preferred_element_type=jnp.float32)      # avgpool 2x2 / 2
            h = gn_relu(h, g2, be2, A2, R2, B2)
            h = conv(patch_ref, h, w2, b2, m2, cout, 3, hc // 2)
            s = jnp.dot(x_in, P[...], preferred_element_type=jnp.float32)   # pool-then-1x1 ==
            s = jnp.dot(ws[...], s, preferred_element_type=jnp.float32) + bs[...]  # 1x1-then-pool
            x = h + s                                                        # fused residual add
            hc //= 2

        gf, bef = next(pit), next(pit)                            # finale: GN -> ReLU -> 1x1
        wf, bf = next(pit), next(pit)
        Af, Rf, Bf = next(cit), next(cit), next(cit)
        x = gn_relu(x, gf, bef, Af, Rf, Bf)
        o_ref[...] = jnp.dot(wf[...], x, preferred_element_type=jnp.float32) + bf[...]

    return kernel


# ----------------------------------------------------------------------------
# Forward wrapper (single pallas_call, single grid step, lane-batched samples)
# ----------------------------------------------------------------------------
def local_encoder_back_forward(params_flat, source_img_nchw):
    plan = _arch_plan(CFG)
    n, c, h, w = source_img_nchw.shape
    assert c == plan["in_ch"] and h == w == plan["H"]

    x = source_img_nchw.astype(jnp.float32)
    # NCHW -> (C, N*H*W): samples are contiguous lane blocks; pad channels 3 -> IN_PAD
    xt = jnp.transpose(x, (1, 0, 2, 3)).reshape(c, n * h * w)
    xt = jnp.pad(xt, ((0, IN_PAD - c), (0, 0)))

    # precomputed constants, in exact kernel consumption order
    consts = [jnp.asarray(_np_mask(7, h, w, n, IN_PAD))]
    hc = h
    for cin, cout in plan["blocks"]:
        consts += [jnp.asarray(_np_gn_A(cin, hc * hc)),
                   jnp.asarray(_np_rsum(hc * hc, n)),
                   jnp.asarray(_np_bcast(hc * hc, n)),
                   jnp.asarray(_np_mask(3, hc, hc, n, cin)),
                   jnp.asarray(_np_pool(hc, hc, n))]
        h2 = hc // 2
        consts += [jnp.asarray(_np_gn_A(cout, h2 * h2)),
                   jnp.asarray(_np_rsum(h2 * h2, n)),
                   jnp.asarray(_np_bcast(h2 * h2, n)),
                   jnp.asarray(_np_mask(3, h2, h2, n, cout))]
        hc = h2
    consts += [jnp.asarray(_np_gn_A(plan["c_last"], hc * hc)),
               jnp.asarray(_np_rsum(hc * hc, n)),
               jnp.asarray(_np_bcast(hc * hc, n))]

    # single im2col patch scratch, sized for the largest conv, never zeroed
    k_rows = [49 * IN_PAD]
    cols = [n * h * w]
    hc = h
    for cin, cout in plan["blocks"]:
        k_rows += [9 * cin, 9 * cout]
        cols += [n * hc * hc, n * (hc // 2) ** 2]
        hc //= 2
    patch_rows = (max(k_rows) + 7) // 8 * 8
    patch_cols = (max(cols) + 127) // 128 * 128

    hl = h >> len(plan["blocks"])
    seg_out = plan["seg_out"]
    operands = [xt] + list(params_flat) + consts
    in_specs = [pl.BlockSpec(op.shape, lambda i: (0, 0)) for op in operands]

    out = pl.pallas_call(
        _make_kernel(plan, n),
        grid=(1,),
        in_specs=in_specs,
        out_specs=pl.BlockSpec((seg_out, n * hl * hl), lambda i: (0, 0)),
        out_shape=jax.ShapeDtypeStruct((seg_out, n * hl * hl), jnp.float32),
        scratch_shapes=[pltpu.VMEM((patch_rows, patch_cols), jnp.float32)],
        compiler_params=pltpu.CompilerParams(dimension_semantics=("arbitrary",)),
    )(*operands)

    # (C, N*hl*hl) -> (N, C, hl, hl)
    return out.reshape(seg_out, n, hl, hl).transpose(1, 0, 2, 3)


# ----------------------------------------------------------------------------
if __name__ == "__main__":
    key = jax.random.PRNGKey(0)
    k_par, k_img = jax.random.split(key)
    params = init_params(k_par)
    source_img = jax.random.normal(
        k_img,
        (2, CFG["in_channels"], CFG["gen_input_image_size"], CFG["gen_input_image_size"]),
        jnp.float32,
    )

    fwd = jax.jit(local_encoder_back_forward)
    out = jax.block_until_ready(fwd(params, source_img))

    expected = (2, CFG["seg_out_channels"],
                CFG["gen_latent_texture_size"], CFG["gen_latent_texture_size"])
    assert out.shape == expected, (out.shape, expected)
    assert bool(jnp.all(jnp.isfinite(out)))
    print("KERNEL_OK")
</pallas_src>

<mosaic_0001>
module attributes {stable_mosaic.version = 11 : i64} {
  func.func @kernel(%arg0: i32, %arg1: memref<8x512xf32, #tpu.memory_space<vmem>>, %arg2: memref<8x392xf32, #tpu.memory_space<vmem>>, %arg3: memref<8x1xf32, #tpu.memory_space<vmem>>, %arg4: memref<8x1xf32, #tpu.memory_space<vmem>>, %arg5: memref<8x1xf32, #tpu.memory_space<vmem>>, %arg6: memref<16x72xf32, #tpu.memory_space<vmem>>, %arg7: memref<16x1xf32, #tpu.memory_space<vmem>>, %arg8: memref<16x1xf32, #tpu.memory_space<vmem>>, %arg9: memref<16x1xf32, #tpu.memory_space<vmem>>, %arg10: memref<16x144xf32, #tpu.memory_space<vmem>>, %arg11: memref<16x1xf32, #tpu.memory_space<vmem>>, %arg12: memref<16x8xf32, #tpu.memory_space<vmem>>, %arg13: memref<16x1xf32, #tpu.memory_space<vmem>>, %arg14: memref<16x1xf32, #tpu.memory_space<vmem>>, %arg15: memref<16x1xf32, #tpu.memory_space<vmem>>, %arg16: memref<4x16xf32, #tpu.memory_space<vmem>>, %arg17: memref<4x1xf32, #tpu.memory_space<vmem>>, %arg18: memref<392x512xf32, #tpu.memory_space<vmem>>, %arg19: memref<8x8xf32, #tpu.memory_space<vmem>>, %arg20: memref<512x2xf32, #tpu.memory_space<vmem>>, %arg21: memref<2x512xf32, #tpu.memory_space<vmem>>, %arg22: memref<72x512xf32, #tpu.memory_space<vmem>>, %arg23: memref<512x128xf32, #tpu.memory_space<vmem>>, %arg24: memref<16x16xf32, #tpu.memory_space<vmem>>, %arg25: memref<128x2xf32, #tpu.memory_space<vmem>>, %arg26: memref<2x128xf32, #tpu.memory_space<vmem>>, %arg27: memref<144x128xf32, #tpu.memory_space<vmem>>, %arg28: memref<16x16xf32, #tpu.memory_space<vmem>>, %arg29: memref<128x2xf32, #tpu.memory_space<vmem>>, %arg30: memref<2x128xf32, #tpu.memory_space<vmem>>, %arg31: memref<4x128xf32, #tpu.memory_space<vmem>>, %arg32: memref<392x512xf32, #tpu.memory_space<vmem>>) attributes {dimension_semantics = [#tpu.dimension_semantics<arbitrary>], iteration_bounds = array<i64: 1>, scalar_prefetch = 0 : i64, scratch_operands = 1 : i64, tpu.core_type = #tpu.core_type<tc>, window_params = [{pipeline_mode = #tpu.pipeline_mode<synchronous>, transform_indices = @transform_0, window_bounds = array<i64: 8, 512>}, {pipeline_mode = #tpu.pipeline_mode<synchronous>, transform_indices = @transform_1, window_bounds = array<i64: 8, 392>}, {pipeline_mode = #tpu.pipeline_mode<synchronous>, transform_indices = @transform_2, window_bounds = array<i64: 8, 1>}, {pipeline_mode = #tpu.pipeline_mode<synchronous>, transform_indices = @transform_3, window_bounds = array<i64: 8, 1>}, {pipeline_mode = #tpu.pipeline_mode<synchronous>, transform_indices = @transform_4, window_bounds = array<i64: 8, 1>}, {pipeline_mode = #tpu.pipeline_mode<synchronous>, transform_indices = @transform_5, window_bounds = array<i64: 16, 72>}, {pipeline_mode = #tpu.pipeline_mode<synchronous>, transform_indices = @transform_6, window_bounds = array<i64: 16, 1>}, {pipeline_mode = #tpu.pipeline_mode<synchronous>, transform_indices = @transform_7, window_bounds = array<i64: 16, 1>}, {pipeline_mode = #tpu.pipeline_mode<synchronous>, transform_indices = @transform_8, window_bounds = array<i64: 16, 1>}, {pipeline_mode = #tpu.pipeline_mode<synchronous>, transform_indices = @transform_9, window_bounds = array<i64: 16, 144>}, {pipeline_mode = #tpu.pipeline_mode<synchronous>, transform_indices = @transform_10, window_bounds = array<i64: 16, 1>}, {pipeline_mode = #tpu.pipeline_mode<synchronous>, transform_indices = @transform_11, window_bounds = array<i64: 16, 8>}, {pipeline_mode = #tpu.pipeline_mode<synchronous>, transform_indices = @transform_12, window_bounds = array<i64: 16, 1>}, {pipeline_mode = #tpu.pipeline_mode<synchronous>, transform_indices = @transform_13, window_bounds = array<i64: 16, 1>}, {pipeline_mode = #tpu.pipeline_mode<synchronous>, transform_indices = @transform_14, window_bounds = array<i64: 16, 1>}, {pipeline_mode = #tpu.pipeline_mode<synchronous>, transform_indices = @transform_15, window_bounds = array<i64: 4, 16>}, {pipeline_mode = #tpu.pipeline_mode<synchronous>, transform_indices = @transform_16, window_bounds = array<i64: 4, 1>}, {pipeline_mode = #tpu.pipeline_mode<synchronous>, transform_indices = @transform_17, window_bounds = array<i64: 392, 512>}, {pipeline_mode = #tpu.pipeline_mode<synchronous>, transform_indices = @transform_18, window_bounds = array<i64: 8, 8>}, {pipeline_mode = #tpu.pipeline_mode<synchronous>, transform_indices = @transform_19, window_bounds = array<i64: 512, 2>}, {pipeline_mode = #tpu.pipeline_mode<synchronous>, transform_indices = @transform_20, window_bounds = array<i64: 2, 512>}, {pipeline_mode = #tpu.pipeline_mode<synchronous>, transform_indices = @transform_21, window_bounds = array<i64: 72, 512>}, {pipeline_mode = #tpu.pipeline_mode<synchronous>, transform_indices = @transform_22, window_bounds = array<i64: 512, 128>}, {pipeline_mode = #tpu.pipeline_mode<synchronous>, transform_indices = @transform_23, window_bounds = array<i64: 16, 16>}, {pipeline_mode = #tpu.pipeline_mode<synchronous>, transform_indices = @transform_24, window_bounds = array<i64: 128, 2>}, {pipeline_mode = #tpu.pipeline_mode<synchronous>, transform_indices = @transform_25, window_bounds = array<i64: 2, 128>}, {pipeline_mode = #tpu.pipeline_mode<synchronous>, transform_indices = @transform_26, window_bounds = array<i64: 144, 128>}, {pipeline_mode = #tpu.pipeline_mode<synchronous>, transform_indices = @transform_27, window_bounds = array<i64: 16, 16>}, {pipeline_mode = #tpu.pipeline_mode<synchronous>, transform_indices = @transform_28, window_bounds = array<i64: 128, 2>}, {pipeline_mode = #tpu.pipeline_mode<synchronous>, transform_indices = @transform_29, window_bounds = array<i64: 2, 128>}, {pipeline_mode = #tpu.pipeline_mode<synchronous>, transform_indices = @transform_30, window_bounds = array<i64: 4, 128>}]} {
    %c0 = arith.constant 0 : index
    %c0_0 = arith.constant 0 : index
    %0 = vector.load %arg1[%c0, %c0_0] : memref<8x512xf32, #tpu.memory_space<vmem>>, vector<8x512xf32>
    %c51_i32 = arith.constant 51 : i32
    %1 = tpu.dynamic_rotate %0 by %c51_i32 dim 1 : vector<8x512xf32>, i32 -> vector<8x512xf32>
    %c0_1 = arith.constant 0 : index
    %c0_2 = arith.constant 0 : index
    %2 = vector.load %arg18[%c0_1, %c0_2] : memref<392x512xf32, #tpu.memory_space<vmem>>, vector<8x512xf32>
    %3 = arith.mulf %1, %2 : vector<8x512xf32>
    %c0_3 = arith.constant 0 : index
    %c0_4 = arith.constant 0 : index
    %4 = vector.load %arg32[%c0_3, %c0_4] : memref<392x512xf32, #tpu.memory_space<vmem>>, vector<8x512xf32>
    tpu.vector_store %arg32[%c0_3, %c0_4], %3 {strides = array<i32>} : memref<392x512xf32, #tpu.memory_space<vmem>>, vector<8x512xf32>,
    %c50_i32 = arith.constant 50 : i32
    %5 = tpu.dynamic_rotate %0 by %c50_i32 dim 1 : vector<8x512xf32>, i32 -> vector<8x512xf32>
    %c8 = arith.constant 8 : index
    %c0_5 = arith.constant 0 : index
    %6 = vector.load %arg18[%c8, %c0_5] : memref<392x512xf32, #tpu.memory_space<vmem>>, vector<8x512xf32>
    %7 = arith.mulf %5, %6 : vector<8x512xf32>
    %c8_6 = arith.constant 8 : index
    %c0_7 = arith.constant 0 : index
    %8 = vector.load %arg32[%c8_6, %c0_7] : memref<392x512xf32, #tpu.memory_space<vmem>>, vector<8x512xf32>
    tpu.vector_store %arg32[%c8_6, %c0_7], %7 {strides = array<i32>} : memref<392x512xf32, #tpu.memory_space<vmem>>, vector<8x512xf32>,
    %c49_i32 = arith.constant 49 : i32
    %9 = tpu.dynamic_rotate %0 by %c49_i32 dim 1 : vector<8x512xf32>, i32 -> vector<8x512xf32>
    %c16 = arith.constant 16 : index
    %c0_8 = arith.constant 0 : index
    %10 = vector.load %arg18[%c16, %c0_8] : memref<392x512xf32, #tpu.memory_space<vmem>>, vector<8x512xf32>
    %11 = arith.mulf %9, %10 : vector<8x512xf32>
    %c16_9 = arith.constant 16 : index
    %c0_10 = arith.constant 0 : index
    %12 = vector.load %arg32[%c16_9, %c0_10] : memref<392x512xf32, #tpu.memory_space<vmem>>, vector<8x512xf32>
    tpu.vector_store %arg32[%c16_9, %c0_10], %11 {strides = array<i32>} : memref<392x512xf32, #tpu.memory_space<vmem>>, vector<8x512xf32>,
    %c48_i32 = arith.constant 48 : i32
    %13 = tpu.dynamic_rotate %0 by %c48_i32 dim 1 : vector<8x512xf32>, i32 -> vector<8x512xf32>
    %c24 = arith.constant 24 : index
    %c0_11 = arith.constant 0 : index
    %14 = vector.load %arg18[%c24, %c0_11] : memref<392x512xf32, #tpu.memory_space<vmem>>, vector<8x512xf32>
    %15 = arith.mulf %13, %14 : vector<8x512xf32>
    %c24_12 = arith.constant 24 : index
    %c0_13 = arith.constant 0 : index
    %16 = vector.load %arg32[%c24_12, %c0_13] : memref<392x512xf32, #tpu.memory_space<vmem>>, vector<8x512xf32>
    tpu.vector_store %arg32[%c24_12, %c0_13], %15 {strides = array<i32>} : memref<392x512xf32, #tpu.memory_space<vmem>>, vector<8x512xf32>,
    %c47_i32 = arith.constant 47 : i32
    %17 = tpu.dynamic_rotate %0 by %c47_i32 dim 1 : vector<8x512xf32>, i32 -> vector<8x512xf32>
    %c32 = arith.constant 32 : index
    %c0_14 = arith.constant 0 : index
    %18 = vector.load %arg18[%c32, %c0_14] : memref<392x512xf32, #tpu.memory_space<vmem>>, vector<8x512xf32>
    %19 = arith.mulf %17, %18 : vector<8x512xf32>
    %c32_15 = arith.constant 32 : index
    %c0_16 = arith.constant 0 : index
    %20 = vector.load %arg32[%c32_15, %c0_16] : memref<392x512xf32, #tpu.memory_space<vmem>>, vector<8x512xf32>
    tpu.vector_store %arg32[%c32_15, %c0_16], %19 {strides = array<i32>} : memref<392x512xf32, #tpu.memory_space<vmem>>, vector<8x512xf32>,
    %c46_i32 = arith.constant 46 : i32
    %21 = tpu.dynamic_rotate %0 by %c46_i32 dim 1 : vector<8x512xf32>, i32 -> vector<8x512xf32>
    %c40 = arith.constant 40 : index
    %c0_17 = arith.constant 0 : index
    %22 = vector.load %arg18[%c40, %c0_17] : memref<392x512xf32, #tpu.memory_space<vmem>>, vector<8x512xf32>
    %23 = arith.mulf %21, %22 : vector<8x512xf32>
    %c40_18 = arith.constant 40 : index
    %c0_19 = arith.constant 0 : index
    %24 = vector.load %arg32[%c40_18, %c0_19] : memref<392x512xf32, #tpu.memory_space<vmem>>, vector<8x512xf32>
    tpu.vector_store %arg32[%c40_18, %c0_19], %23 {strides = array<i32>} : memref<392x512xf32, #tpu.memory_space<vmem>>, vector<8x512xf32>,
    %c45_i32 = arith.constant 45 : i32
    %25 = tpu.dynamic_rotate %0 by %c45_i32 dim 1 : vector<8x512xf32>, i32 -> vector<8x512xf32>
    %c48 = arith.constant 48 : index
    %c0_20 = arith.constant 0 : index
    %26 = vector.load %arg18[%c48, %c0_20] : memref<392x512xf32, #tpu.memory_space<vmem>>, vector<8x512xf32>
    %27 = arith.mulf %25, %26 : vector<8x512xf32>
    %c48_21 = arith.constant 48 : index
    %c0_22 = arith.constant 0 : index
    %28 = vector.load %arg32[%c48_21, %c0_22] : memref<392x512xf32, #tpu.memory_space<vmem>>, vector<8x512xf32>
    tpu.vector_store %arg32[%c48_21, %c0_22], %27 {strides = array<i32>} : memref<392x512xf32, #tpu.memory_space<vmem>>, vector<8x512xf32>,
    %c35_i32 = arith.constant 35 : i32
    %29 = tpu.dynamic_rotate %0 by %c35_i32 dim 1 : vector<8x512xf32>, i32 -> vector<8x512xf32>
    %c56 = arith.constant 56 : index
    %c0_23 = arith.constant 0 : index
    %30 = vector.load %arg18[%c56, %c0_23] : memref<392x512xf32, #tpu.memory_space<vmem>>, vector<8x512xf32>
    %31 = arith.mulf %29, %30 : vector<8x512xf32>
    %c56_24 = arith.constant 56 : index
    %c0_25 = arith.constant 0 : index
    %32 = vector.load %arg32[%c56_24, %c0_25] : memref<392x512xf32, #tpu.memory_space<vmem>>, vector<8x512xf32>
    tpu.vector_store %arg32[%c56_24, %c0_25], %31 {strides = array<i32>} : memref<392x512xf32, #tpu.memory_space<vmem>>, vector<8x512xf32>,
    %c34_i32 = arith.constant 34 : i32
    %33 = tpu.dynamic_rotate %0 by %c34_i32 dim 1 : vector<8x512xf32>, i32 -> vector<8x512xf32>
    %c64 = arith.constant 64 : index
    %c0_26 = arith.constant 0 : index
    %34 = vector.load %arg18[%c64, %c0_26] : memref<392x512xf32, #tpu.memory_space<vmem>>, vector<8x512xf32>
    %35 = arith.mulf %33, %34 : vector<8x512xf32>
    %c64_27 = arith.constant 64 : index
    %c0_28 = arith.constant 0 : index
    %36 = vector.load %arg32[%c64_27, %c0_28] : memref<392x512xf32, #tpu.memory_space<vmem>>, vector<8x512xf32>
    tpu.vector_store %arg32[%c64_27, %c0_28], %35 {strides = array<i32>} : memref<392x512xf32, #tpu.memory_space<vmem>>, vector<8x512xf32>,
    %c33_i32 = arith.constant 33 : i32
    %37 = tpu.dynamic_rotate %0 by %c33_i32 dim 1 : vector<8x512xf32>, i32 -> vector<8x512xf32>
    %c72 = arith.constant 72 : index
    %c0_29 = arith.constant 0 : index
    %38 = vector.load %arg18[%c72, %c0_29] : memref<392x512xf32, #tpu.memory_space<vmem>>, vector<8x512xf32>
    %39 = arith.mulf %37, %38 : vector<8x512xf32>
    %c72_30 = arith.constant 72 : index
    %c0_31 = arith.constant 0 : index
    %40 = vector.load %arg32[%c72_30, %c0_31] : memref<392x512xf32, #tpu.memory_space<vmem>>, vector<8x512xf32>
    tpu.vector_store %arg32[%c72_30, %c0_31], %39 {strides = array<i32>} : memref<392x512xf32, #tpu.memory_space<vmem>>, vector<8x512xf32>,
    %c32_i32 = arith.constant 32 : i32
    %41 = tpu.dynamic_rotate %0 by %c32_i32 dim 1 : vector<8x512xf32>, i32 -> vector<8x512xf32>
    %c80 = arith.constant 80 : index
    %c0_32 = arith.constant 0 : index
    %42 = vector.load %arg18[%c80, %c0_32] : memref<392x512xf32, #tpu.memory_space<vmem>>, vector<8x512xf32>
    %43 = arith.mulf %41, %42 : vector<8x512xf32>
    %c80_33 = arith.constant 80 : index
    %c0_34 = arith.constant 0 : index
    %44 = vector.load %arg32[%c80_33, %c0_34] : memref<392x512xf32, #tpu.memory_space<vmem>>, vector<8x512xf32>
    tpu.vector_store %arg32[%c80_33, %c0_34], %43 {strides = array<i32>} : memref<392x512xf32, #tpu.memory_space<vmem>>, vector<8x512xf32>,
    %c31_i32 = arith.constant 31 : i32
    %45 = tpu.dynamic_rotate %0 by %c31_i32 dim 1 : vector<8x512xf32>, i32 -> vector<8x512xf32>
    %c88 = arith.constant 88 : index
    %c0_35 = arith.constant 0 : index
    %46 = vector.load %arg18[%c88, %c0_35] : memref<392x512xf32, #tpu.memory_space<vmem>>, vector<8x512xf32>
    %47 = arith.mulf %45, %46 : vector<8x512xf32>
    %c88_36 = arith.constant 88 : index
    %c0_37 = arith.constant 0 : index
    %48 = vector.load %arg32[%c88_36, %c0_37] : memref<392x512xf32, #tpu.memory_space<vmem>>, vector<8x512xf32>
    tpu.vector_store %arg32[%c88_36, %c0_37], %47 {strides = array<i32>} : memref<392x512xf32, #tpu.memory_space<vmem>>, vector<8x512xf32>,
    %c30_i32 = arith.constant 30 : i32
    %49 = tpu.dynamic_rotate %0 by %c30_i32 dim 1 : vector<8x512xf32>, i32 -> vector<8x512xf32>
    %c96 = arith.constant 96 : index
    %c0_38 = arith.constant 0 : index
    %50 = vector.load %arg18[%c96, %c0_38] : memref<392x512xf32, #tpu.memory_space<vmem>>, vector<8x512xf32>
    %51 = arith.mulf %49, %50 : vector<8x512xf32>
    %c96_39 = arith.constant 96 : index
    %c0_40 = arith.constant 0 : index
    %52 = vector.load %arg32[%c96_39, %c0_40] : memref<392x512xf32, #tpu.memory_space<vmem>>, vector<8x512xf32>
    tpu.vector_store %arg32[%c96_39, %c0_40], %51 {strides = array<i32>} : memref<392x512xf32, #tpu.memory_space<vmem>>, vector<8x512xf32>,
    %c29_i32 = arith.constant 29 : i32
    %53 = tpu.dynamic_rotate %0 by %c29_i32 dim 1 : vector<8x512xf32>, i32 -> vector<8x512xf32>
    %c104 = arith.constant 104 : index
    %c0_41 = arith.constant 0 : index
    %54 = vector.load %arg18[%c104, %c0_41] : memref<392x512xf32, #tpu.memory_space<vmem>>, vector<8x512xf32>
    %55 = arith.mulf %53, %54 : vector<8x512xf32>
    %c104_42 = arith.constant 104 : index
    %c0_43 = arith.constant 0 : index
    %56 = vector.load %arg32[%c104_42, %c0_43] : memref<392x512xf32, #tpu.memory_space<vmem>>, vector<8x512xf32>
    tpu.vector_store %arg32[%c104_42, %c0_43], %55 {strides = array<i32>} : memref<392x512xf32, #tpu.memory_space<vmem>>, vector<8x512xf32>,
    %c19_i32 = arith.constant 19 : i32
    %57 = tpu.dynamic_rotate %0 by %c19_i32 dim 1 : vector<8x512xf32>, i32 -> vector<8x512xf32>
    %c112 = arith.constant 112 : index
    %c0_44 = arith.constant 0 : index
    %58 = vector.load %arg18[%c112, %c0_44] : memref<392x512xf32, #tpu.memory_space<vmem>>, vector<8x512xf32>
    %59 = arith.mulf %57, %58 : vector<8x512xf32>
    %c112_45 = arith.constant 112 : index
    %c0_46 = arith.constant 0 : index
    %60 = vector.load %arg32[%c112_45, %c0_46] : memref<392x512xf32, #tpu.memory_space<vmem>>, vector<8x512xf32>
    tpu.vector_store %arg32[%c112_45, %c0_46], %59 {strides = array<i32>} : memref<392x512xf32, #tpu.memory_space<vmem>>, vector<8x512xf32>,
    %c18_i32 = arith.constant 18 : i32
    %61 = tpu.dynamic_rotate %0 by %c18_i32 dim 1 : vector<8x512xf32>, i32 -> vector<8x512xf32>
    %c120 = arith.constant 120 : index
    %c0_47 = arith.constant 0 : index
    %62 = vector.load %arg18[%c120, %c0_47] : memref<392x512xf32, #tpu.memory_space<vmem>>, vector<8x512xf32>
    %63 = arith.mulf %61, %62 : vector<8x512xf32>
    %c120_48 = arith.constant 120 : index
    %c0_49 = arith.constant 0 : index
    %64 = vector.load %arg32[%c120_48, %c0_49] : memref<392x512xf32, #tpu.memory_space<vmem>>, vector<8x512xf32>
    tpu.vector_store %arg32[%c120_48, %c0_49], %63 {strides = array<i32>} : memref<392x512xf32, #tpu.memory_space<vmem>>, vector<8x512xf32>,
    %c17_i32 = arith.constant 17 : i32
    %65 = tpu.dynamic_rotate %0 by %c17_i32 dim 1 : vector<8x512xf32>, i32 -> vector<8x512xf32>
    %c128 = arith.constant 128 : index
    %c0_50 = arith.constant 0 : index
    %66 = vector.load %arg18[%c128, %c0_50] : memref<392x512xf32, #tpu.memory_space<vmem>>, vector<8x512xf32>
    %67 = arith.mulf %65, %66 : vector<8x512xf32>
    %c128_51 = arith.constant 128 : index
    %c0_52 = arith.constant 0 : index
    %68 = vector.load %arg32[%c128_51, %c0_52] : memref<392x512xf32, #tpu.memory_space<vmem>>, vector<8x512xf32>
    tpu.vector_store %arg32[%c128_51, %c0_52], %67 {strides = array<i32>} : memref<392x512xf32, #tpu.memory_space<vmem>>, vector<8x512xf32>,
    %c16_i32 = arith.constant 16 : i32
    %69 = tpu.dynamic_rotate %0 by %c16_i32 dim 1 : vector<8x512xf32>, i32 -> vector<8x512xf32>
    %c136 = arith.constant 136 : index
    %c0_53 = arith.constant 0 : index
    %70 = vector.load %arg18[%c136, %c0_53] : memref<392x512xf32, #tpu.memory_space<vmem>>, vector<8x512xf32>
    %71 = arith.mulf %69, %70 : vector<8x512xf32>
    %c136_54 = arith.constant 136 : index
    %c0_55 = arith.constant 0 : index
    %72 = vector.load %arg32[%c136_54, %c0_55] : memref<392x512xf32, #tpu.memory_space<vmem>>, vector<8x512xf32>
    tpu.vector_store %arg32[%c136_54, %c0_55], %71 {strides = array<i32>} : memref<392x512xf32, #tpu.memory_space<vmem>>, vector<8x512xf32>,
    %c15_i32 = arith.constant 15 : i32
    %73 = tpu.dynamic_rotate %0 by %c15_i32 dim 1 : vector<8x512xf32>, i32 -> vector<8x512xf32>
    %c144 = arith.constant 144 : index
    %c0_56 = arith.constant 0 : index
    %74 = vector.load %arg18[%c144, %c0_56] : memref<392x512xf32, #tpu.memory_space<vmem>>, vector<8x512xf32>
    %75 = arith.mulf %73, %74 : vector<8x512xf32>
    %c144_57 = arith.constant 144 : index
    %c0_58 = arith.constant 0 : index
    %76 = vector.load %arg32[%c144_57, %c0_58] : memref<392x512xf32, #tpu.memory_space<vmem>>, vector<8x512xf32>
    tpu.vector_store %arg32[%c144_57, %c0_58], %75 {strides = array<i32>} : memref<392x512xf32, #tpu.memory_space<vmem>>, vector<8x512xf32>,
    %c14_i32 = arith.constant 14 : i32
    %77 = tpu.dynamic_rotate %0 by %c14_i32 dim 1 : vector<8x512xf32>, i32 -> vector<8x512xf32>
    %c152 = arith.constant 152 : index
    %c0_59 = arith.constant 0 : index
    %78 = vector.load %arg18[%c152, %c0_59] : memref<392x512xf32, #tpu.memory_space<vmem>>, vector<8x512xf32>
    %79 = arith.mulf %77, %78 : vector<8x512xf32>
    %c152_60 = arith.constant 152 : index
    %c0_61 = arith.constant 0 : index
    %80 = vector.load %arg32[%c152_60, %c0_61] : memref<392x512xf32, #tpu.memory_space<vmem>>, vector<8x512xf32>
    tpu.vector_store %arg32[%c152_60, %c0_61], %79 {strides = array<i32>} : memref<392x512xf32, #tpu.memory_space<vmem>>, vector<8x512xf32>,
    %c13_i32 = arith.constant 13 : i32
    %81 = tpu.dynamic_rotate %0 by %c13_i32 dim 1 : vector<8x512xf32>, i32 -> vector<8x512xf32>
    %c160 = arith.constant 160 : index
    %c0_62 = arith.constant 0 : index
    %82 = vector.load %arg18[%c160, %c0_62] : memref<392x512xf32, #tpu.memory_space<vmem>>, vector<8x512xf32>
    %83 = arith.mulf %81, %82 : vector<8x512xf32>
    %c160_63 = arith.constant 160 : index
    %c0_64 = arith.constant 0 : index
    %84 = vector.load %arg32[%c160_63, %c0_64] : memref<392x512xf32, #tpu.memory_space<vmem>>, vector<8x512xf32>
    tpu.vector_store %arg32[%c160_63, %c0_64], %83 {strides = array<i32>} : memref<392x512xf32, #tpu.memory_space<vmem>>, vector<8x512xf32>,
    %c3_i32 = arith.constant 3 : i32
    %85 = tpu.dynamic_rotate %0 by %c3_i32 dim 1 : vector<8x512xf32>, i32 -> vector<8x512xf32>
    %c168 = arith.constant 168 : index
    %c0_65 = arith.constant 0 : index
    %86 = vector.load %arg18[%c168, %c0_65] : memref<392x512xf32, #tpu.memory_space<vmem>>, vector<8x512xf32>
    %87 = arith.mulf %85, %86 : vector<8x512xf32>
    %c168_66 = arith.constant 168 : index
    %c0_67 = arith.constant 0 : index
    %88 = vector.load %arg32[%c168_66, %c0_67] : memref<392x512xf32, #tpu.memory_space<vmem>>, vector<8x512xf32>
    tpu.vector_store %arg32[%c168_66, %c0_67], %87 {strides = array<i32>} : memref<392x512xf32, #tpu.memory_space<vmem>>, vector<8x512xf32>,
    %c2_i32 = arith.constant 2 : i32
    %89 = tpu.dynamic_rotate %0 by %c2_i32 dim 1 : vector<8x512xf32>, i32 -> vector<8x512xf32>
    %c176 = arith.constant 176 : index
    %c0_68 = arith.constant 0 : index
    %90 = vector.load %arg18[%c176, %c0_68] : memref<392x512xf32, #tpu.memory_space<vmem>>, vector<8x512xf32>
    %91 = arith.mulf %89, %90 : vector<8x512xf32>
    %c176_69 = arith.constant 176 : index
    %c0_70 = arith.constant 0 : index
    %92 = vector.load %arg32[%c176_69, %c0_70] : memref<392x512xf32, #tpu.memory_space<vmem>>, vector<8x512xf32>
    tpu.vector_store %arg32[%c176_69, %c0_70], %91 {strides = array<i32>} : memref<392x512xf32, #tpu.memory_space<vmem>>, vector<8x512xf32>,
    %c1_i32 = arith.constant 1 : i32
    %93 = tpu.dynamic_rotate %0 by %c1_i32 dim 1 : vector<8x512xf32>, i32 -> vector<8x512xf32>
    %c184 = arith.constant 184 : index
    %c0_71 = arith.constant 0 : index
    %94 = vector.load %arg18[%c184, %c0_71] : memref<392x512xf32, #tpu.memory_space<vmem>>, vector<8x512xf32>
    %95 = arith.mulf %93, %94 : vector<8x512xf32>
    %c184_72 = arith.constant 184 : index
    %c0_73 = arith.constant 0 : index
    %96 = vector.load %arg32[%c184_72, %c0_73] : memref<392x512xf32, #tpu.memory_space<vmem>>, vector<8x512xf32>
    tpu.vector_store %arg32[%c184_72, %c0_73], %95 {strides = array<i32>} : memref<392x512xf32, #tpu.memory_space<vmem>>, vector<8x512xf32>,
    %c192 = arith.constant 192 : index
    %c0_74 = arith.constant 0 : index
    %97 = vector.load %arg32[%c192, %c0_74] : memref<392x512xf32, #tpu.memory_space<vmem>>, vector<8x512xf32>
    tpu.vector_store %arg32[%c192, %c0_74], %0 {strides = array<i32>} : memref<392x512xf32, #tpu.memory_space<vmem>>, vector<8x512xf32>,
    %c511_i32 = arith.constant 511 : i32
    %98 = tpu.dynamic_rotate %0 by %c511_i32 dim 1 : vector<8x512xf32>, i32 -> vector<8x512xf32>
    %c200 = arith.constant 200 : index
    %c0_75 = arith.constant 0 : index
    %99 = vector.load %arg18[%c200, %c0_75] : memref<392x512xf32, #tpu.memory_space<vmem>>, vector<8x512xf32>
    %100 = arith.mulf %98, %99 : vector<8x512xf32>
    %c200_76 = arith.constant 200 : index
    %c0_77 = arith.constant 0 : index
    %101 = vector.load %arg32[%c200_76, %c0_77] : memref<392x512xf32, #tpu.memory_space<vmem>>, vector<8x512xf32>
    tpu.vector_store %arg32[%c200_76, %c0_77], %100 {strides = array<i32>} : memref<392x512xf32, #tpu.memory_space<vmem>>, vector<8x512xf32>,
    %c510_i32 = arith.constant 510 : i32
    %102 = tpu.dynamic_rotate %0 by %c510_i32 dim 1 : vector<8x512xf32>, i32 -> vector<8x512xf32>
    %c208 = arith.constant 208 : index
    %c0_78 = arith.constant 0 : index
    %103 = vector.load %arg18[%c208, %c0_78] : memref<392x512xf32, #tpu.memory_space<vmem>>, vector<8x512xf32>
    %104 = arith.mulf %102, %103 : vector<8x512xf32>
    %c208_79 = arith.constant 208 : index
    %c0_80 = arith.constant 0 : index
    %105 = vector.load %arg32[%c208_79, %c0_80] : memref<392x512xf32, #tpu.memory_space<vmem>>, vector<8x512xf32>
    tpu.vector_store %arg32[%c208_79, %c0_80], %104 {strides = array<i32>} : memref<392x512xf32, #tpu.memory_space<vmem>>, vector<8x512xf32>,
    %c509_i32 = arith.constant 509 : i32
    %106 = tpu.dynamic_rotate %0 by %c509_i32 dim 1 : vector<8x512xf32>, i32 -> vector<8x512xf32>
    %c216 = arith.constant 216 : index
    %c0_81 = arith.constant 0 : index
    %107 = vector.load %arg18[%c216, %c0_81] : memref<392x512xf32, #tpu.memory_space<vmem>>, vector<8x512xf32>
    %108 = arith.mulf %106, %107 : vector<8x512xf32>
    %c216_82 = arith.constant 216 : index
    %c0_83 = arith.constant 0 : index
    %109 = vector.load %arg32[%c216_82, %c0_83] : memref<392x512xf32, #tpu.memory_space<vmem>>, vector<8x512xf32>
    tpu.vector_store %arg32[%c216_82, %c0_83], %108 {strides = array<i32>} : memref<392x512xf32, #tpu.memory_space<vmem>>, vector<8x512xf32>,
    %c499_i32 = arith.constant 499 : i32
    %110 = tpu.dynamic_rotate %0 by %c499_i32 dim 1 : vector<8x512xf32>, i32 -> vector<8x512xf32>
    %c224 = arith.constant 224 : index
    %c0_84 = arith.constant 0 : index
    %111 = vector.load %arg18[%c224, %c0_84] : memref<392x512xf32, #tpu.memory_space<vmem>>, vector<8x512xf32>
    %112 = arith.mulf %110, %111 : vector<8x512xf32>
    %c224_85 = arith.constant 224 : index
    %c0_86 = arith.constant 0 : index
    %113 = vector.load %arg32[%c224_85, %c0_86] : memref<392x512xf32, #tpu.memory_space<vmem>>, vector<8x512xf32>
    tpu.vector_store %arg32[%c224_85, %c0_86], %112 {strides = array<i32>} : memref<392x512xf32, #tpu.memory_space<vmem>>, vector<8x512xf32>,
    %c498_i32 = arith.constant 498 : i32
    %114 = tpu.dynamic_rotate %0 by %c498_i32 dim 1 : vector<8x512xf32>, i32 -> vector<8x512xf32>
    %c232 = arith.constant 232 : index
    %c0_87 = arith.constant 0 : index
    %115 = vector.load %arg18[%c232, %c0_87] : memref<392x512xf32, #tpu.memory_space<vmem>>, vector<8x512xf32>
    %116 = arith.mulf %114, %115 : vector<8x512xf32>
    %c232_88 = arith.constant 232 : index
    %c0_89 = arith.constant 0 : index
    %117 = vector.load %arg32[%c232_88, %c0_89] : memref<392x512xf32, #tpu.memory_space<vmem>>, vector<8x512xf32>
    tpu.vector_store %arg32[%c232_88, %c0_89], %116 {strides = array<i32>} : memref<392x512xf32, #tpu.memory_space<vmem>>, vector<8x512xf32>,
    %c497_i32 = arith.constant 497 : i32
    %118 = tpu.dynamic_rotate %0 by %c497_i32 dim 1 : vector<8x512xf32>, i32 -> vector<8x512xf32>
    %c240 = arith.constant 240 : index
    %c0_90 = arith.constant 0 : index
    %119 = vector.load %arg18[%c240, %c0_90] : memref<392x512xf32, #tpu.memory_space<vmem>>, vector<8x512xf32>
    %120 = arith.mulf %118, %119 : vector<8x512xf32>
    %c240_91 = arith.constant 240 : index
    %c0_92 = arith.constant 0 : index
    %121 = vector.load %arg32[%c240_91, %c0_92] : memref<392x512xf32, #tpu.memory_space<vmem>>, vector<8x512xf32>
    tpu.vector_store %arg32[%c240_91, %c0_92], %120 {strides = array<i32>} : memref<392x512xf32, #tpu.memory_space<vmem>>, vector<8x512xf32>,
    %c496_i32 = arith.constant 496 : i32
    %122 = tpu.dynamic_rotate %0 by %c496_i32 dim 1 : vector<8x512xf32>, i32 -> vector<8x512xf32>
    %c248 = arith.constant 248 : index
    %c0_93 = arith.constant 0 : index
    %123 = vector.load %arg18[%c248, %c0_93] : memref<392x512xf32, #tpu.memory_space<vmem>>, vector<8x512xf32>
    %124 = arith.mulf %122, %123 : vector<8x512xf32>
    %c248_94 = arith.constant 248 : index
    %c0_95 = arith.constant 0 : index
    %125 = vector.load %arg32[%c248_94, %c0_95] : memref<392x512xf32, #tpu.memory_space<vmem>>, vector<8x512xf32>
    tpu.vector_store %arg32[%c248_94, %c0_95], %124 {strides = array<i32>} : memref<392x512xf32, #tpu.memory_space<vmem>>, vector<8x512xf32>,
    %c495_i32 = arith.constant 495 : i32
    %126 = tpu.dynamic_rotate %0 by %c495_i32 dim 1 : vector<8x512xf32>, i32 -> vector<8x512xf32>
    %c256 = arith.constant 256 : index
    %c0_96 = arith.constant 0 : index
    %127 = vector.load %arg18[%c256, %c0_96] : memref<392x512xf32, #tpu.memory_space<vmem>>, vector<8x512xf32>
    %128 = arith.mulf %126, %127 : vector<8x512xf32>
    %c256_97 = arith.constant 256 : index
    %c0_98 = arith.constant 0 : index
    %129 = vector.load %arg32[%c256_97, %c0_98] : memref<392x512xf32, #tpu.memory_space<vmem>>, vector<8x512xf32>
    tpu.vector_store %arg32[%c256_97, %c0_98], %128 {strides = array<i32>} : memref<392x512xf32, #tpu.memory_space<vmem>>, vector<8x512xf32>,
    %c494_i32 = arith.constant 494 : i32
    %130 = tpu.dynamic_rotate %0 by %c494_i32 dim 1 : vector<8x512xf32>, i32 -> vector<8x512xf32>
    %c264 = arith.constant 264 : index
    %c0_99 = arith.constant 0 : index
    %131 = vector.load %arg18[%c264, %c0_99] : memref<392x512xf32, #tpu.memory_space<vmem>>, vector<8x512xf32>
    %132 = arith.mulf %130, %131 : vector<8x512xf32>
    %c264_100 = arith.constant 264 : index
    %c0_101 = arith.constant 0 : index
    %133 = vector.load %arg32[%c264_100, %c0_101] : memref<392x512xf32, #tpu.memory_space<vmem>>, vector<8x512xf32>
    tpu.vector_store %arg32[%c264_100, %c0_101], %132 {strides = array<i32>} : memref<392x512xf32, #tpu.memory_space<vmem>>, vector<8x512xf32>,
    %c493_i32 = arith.constant 493 : i32
    %134 = tpu.dynamic_rotate %0 by %c493_i32 dim 1 : vector<8x512xf32>, i32 -> vector<8x512xf32>
    %c272 = arith.constant 272 : index
    %c0_102 = arith.constant 0 : index
    %135 = vector.load %arg18[%c272, %c0_102] : memref<392x512xf32, #tpu.memory_space<vmem>>, vector<8x512xf32>
    %136 = arith.mulf %134, %135 : vector<8x512xf32>
    %c272_103 = arith.constant 272 : index
    %c0_104 = arith.constant 0 : index
    %137 = vector.load %arg32[%c272_103, %c0_104] : memref<392x512xf32, #tpu.memory_space<vmem>>, vector<8x512xf32>
    tpu.vector_store %arg32[%c272_103, %c0_104], %136 {strides = array<i32>} : memref<392x512xf32, #tpu.memory_space<vmem>>, vector<8x512xf32>,
    %c483_i32 = arith.constant 483 : i32
    %138 = tpu.dynamic_rotate %0 by %c483_i32 dim 1 : vector<8x512xf32>, i32 -> vector<8x512xf32>
    %c280 = arith.constant 280 : index
    %c0_105 = arith.constant 0 : index
    %139 = vector.load %arg18[%c280, %c0_105] : memref<392x512xf32, #tpu.memory_space<vmem>>, vector<8x512xf32>
    %140 = arith.mulf %138, %139 : vector<8x512xf32>
    %c280_106 = arith.constant 280 : index
    %c0_107 = arith.constant 0 : index
    %141 = vector.load %arg32[%c280_106, %c0_107] : memref<392x512xf32, #tpu.memory_space<vmem>>, vector<8x512xf32>
    tpu.vector_store %arg32[%c280_106, %c0_107], %140 {strides = array<i32>} : memref<392x512xf32, #tpu.memory_space<vmem>>, vector<8x512xf32>,
    %c482_i32 = arith.constant 482 : i32
    %142 = tpu.dynamic_rotate %0 by %c482_i32 dim 1 : vector<8x512xf32>, i32 -> vector<8x512xf32>
    %c288 = arith.constant 288 : index
    %c0_108 = arith.constant 0 : index
    %143 = vector.load %arg18[%c288, %c0_108] : memref<392x512xf32, #tpu.memory_space<vmem>>, vector<8x512xf32>
    %144 = arith.mulf %142, %143 : vector<8x512xf32>
    %c288_109 = arith.constant 288 : index
    %c0_110 = arith.constant 0 : index
    %145 = vector.load %arg32[%c288_109, %c0_110] : memref<392x512xf32, #tpu.memory_space<vmem>>, vector<8x512xf32>
    tpu.vector_store %arg32[%c288_109, %c0_110], %144 {strides = array<i32>} : memref<392x512xf32, #tpu.memory_space<vmem>>, vector<8x512xf32>,
    %c481_i32 = arith.constant 481 : i32
    %146 = tpu.dynamic_rotate %0 by %c481_i32 dim 1 : vector<8x512xf32>, i32 -> vector<8x512xf32>
    %c296 = arith.constant 296 : index
    %c0_111 = arith.constant 0 : index
    %147 = vector.load %arg18[%c296, %c0_111] : memref<392x512xf32, #tpu.memory_space<vmem>>, vector<8x512xf32>
    %148 = arith.mulf %146, %147 : vector<8x512xf32>
    %c296_112 = arith.constant 296 : index
    %c0_113 = arith.constant 0 : index
    %149 = vector.load %arg32[%c296_112, %c0_113] : memref<392x512xf32, #tpu.memory_space<vmem>>, vector<8x512xf32>
    tpu.vector_store %arg32[%c296_112, %c0_113], %148 {strides = array<i32>} : memref<392x512xf32, #tpu.memory_space<vmem>>, vector<8x512xf32>,
    %c480_i32 = arith.constant 480 : i32
    %150 = tpu.dynamic_rotate %0 by %c480_i32 dim 1 : vector<8x512xf32>, i32 -> vector<8x512xf32>
    %c304 = arith.constant 304 : index
    %c0_114 = arith.constant 0 : index
    %151 = vector.load %arg18[%c304, %c0_114] : memref<392x512xf32, #tpu.memory_space<vmem>>, vector<8x512xf32>
    %152 = arith.mulf %150, %151 : vector<8x512xf32>
    %c304_115 = arith.constant 304 : index
    %c0_116 = arith.constant 0 : index
    %153 = vector.load %arg32[%c304_115, %c0_116] : memref<392x512xf32, #tpu.memory_space<vmem>>, vector<8x512xf32>
    tpu.vector_store %arg32[%c304_115, %c0_116], %152 {strides = array<i32>} : memref<392x512xf32, #tpu.memory_space<vmem>>, vector<8x512xf32>,
    %c479_i32 = arith.constant 479 : i32
    %154 = tpu.dynamic_rotate %0 by %c479_i32 dim 1 : vector<8x512xf32>, i32 -> vector<8x512xf32>
    %c312 = arith.constant 312 : index
    %c0_117 = arith.constant 0 : index
    %155 = vector.load %arg18[%c312, %c0_117] : memref<392x512xf32, #tpu.memory_space<vmem>>, vector<8x512xf32>
    %156 = arith.mulf %154, %155 : vector<8x512xf32>
    %c312_118 = arith.constant 312 : index
    %c0_119 = arith.constant 0 : index
    %157 = vector.load %arg32[%c312_118, %c0_119] : memref<392x512xf32, #tpu.memory_space<vmem>>, vector<8x512xf32>
    tpu.vector_store %arg32[%c312_118, %c0_119], %156 {strides = array<i32>} : memref<392x512xf32, #tpu.memory_space<vmem>>, vector<8x512xf32>,
    %c478_i32 = arith.constant 478 : i32
    %158 = tpu.dynamic_rotate %0 by %c478_i32 dim 1 : vector<8x512xf32>, i32 -> vector<8x512xf32>
    %c320 = arith.constant 320 : index
    %c0_120 = arith.constant 0 : index
    %159 = vector.load %arg18[%c320, %c0_120] : memref<392x512xf32, #tpu.memory_space<vmem>>, vector<8x512xf32>
    %160 = arith.mulf %158, %159 : vector<8x512xf32>
    %c320_121 = arith.constant 320 : index
    %c0_122 = arith.constant 0 : index
    %161 = vector.load %arg32[%c320_121, %c0_122] : memref<392x512xf32, #tpu.memory_space<vmem>>, vector<8x512xf32>
    tpu.vector_store %arg32[%c320_121, %c0_122], %160 {strides = array<i32>} : memref<392x512xf32, #tpu.memory_space<vmem>>, vector<8x512xf32>,
    %c477_i32 = arith.constant 477 : i32
    %162 = tpu.dynamic_rotate %0 by %c477_i32 dim 1 : vector<8x512xf32>, i32 -> vector<8x512xf32>
    %c328 = arith.constant 328 : index
    %c0_123 = arith.constant 0 : index
    %163 = vector.load %arg18[%c328, %c0_123] : memref<392x512xf32, #tpu.memory_space<vmem>>, vector<8x512xf32>
    %164 = arith.mulf %162, %163 : vector<8x512xf32>
    %c328_124 = arith.constant 328 : index
    %c0_125 = arith.constant 0 : index
    %165 = vector.load %arg32[%c328_124, %c0_125] : memref<392x512xf32, #tpu.memory_space<vmem>>, vector<8x512xf32>
    tpu.vector_store %arg32[%c328_124, %c0_125], %164 {strides = array<i32>} : memref<392x512xf32, #tpu.memory_space<vmem>>, vector<8x512xf32>,
    %c467_i32 = arith.constant 467 : i32
    %166 = tpu.dynamic_rotate %0 by %c467_i32 dim 1 : vector<8x512xf32>, i32 -> vector<8x512xf32>
    %c336 = arith.constant 336 : index
    %c0_126 = arith.constant 0 : index
    %167 = vector.load %arg18[%c336, %c0_126] : memref<392x512xf32, #tpu.memory_space<vmem>>, vector<8x512xf32>
    %168 = arith.mulf %166, %167 : vector<8x512xf32>
    %c336_127 = arith.constant 336 : index
    %c0_128 = arith.constant 0 : index
    %169 = vector.load %arg32[%c336_127, %c0_128] : memref<392x512xf32, #tpu.memory_space<vmem>>, vector<8x512xf32>
    tpu.vector_store %arg32[%c336_127, %c0_128], %168 {strides = array<i32>} : memref<392x512xf32, #tpu.memory_space<vmem>>, vector<8x512xf32>,
    %c466_i32 = arith.constant 466 : i32
    %170 = tpu.dynamic_rotate %0 by %c466_i32 dim 1 : vector<8x512xf32>, i32 -> vector<8x512xf32>
    %c344 = arith.constant 344 : index
    %c0_129 = arith.constant 0 : index
    %171 = vector.load %arg18[%c344, %c0_129] : memref<392x512xf32, #tpu.memory_space<vmem>>, vector<8x512xf32>
    %172 = arith.mulf %170, %171 : vector<8x512xf32>
    %c344_130 = arith.constant 344 : index
    %c0_131 = arith.constant 0 : index
    %173 = vector.load %arg32[%c344_130, %c0_131] : memref<392x512xf32, #tpu.memory_space<vmem>>, vector<8x512xf32>
    tpu.vector_store %arg32[%c344_130, %c0_131], %172 {strides = array<i32>} : memref<392x512xf32, #tpu.memory_space<vmem>>, vector<8x512xf32>,
    %c465_i32 = arith.constant 465 : i32
    %174 = tpu.dynamic_rotate %0 by %c465_i32 dim 1 : vector<8x512xf32>, i32 -> vector<8x512xf32>
    %c352 = arith.constant 352 : index
    %c0_132 = arith.constant 0 : index
    %175 = vector.load %arg18[%c352, %c0_132] : memref<392x512xf32, #tpu.memory_space<vmem>>, vector<8x512xf32>
    %176 = arith.mulf %174, %175 : vector<8x512xf32>
    %c352_133 = arith.constant 352 : index
    %c0_134 = arith.constant 0 : index
    %177 = vector.load %arg32[%c352_133, %c0_134] : memref<392x512xf32, #tpu.memory_space<vmem>>, vector<8x512xf32>
    tpu.vector_store %arg32[%c352_133, %c0_134], %176 {strides = array<i32>} : memref<392x512xf32, #tpu.memory_space<vmem>>, vector<8x512xf32>,
    %c464_i32 = arith.constant 464 : i32
    %178 = tpu.dynamic_rotate %0 by %c464_i32 dim 1 : vector<8x512xf32>, i32 -> vector<8x512xf32>
    %c360 = arith.constant 360 : index
    %c0_135 = arith.constant 0 : index
    %179 = vector.load %arg18[%c360, %c0_135] : memref<392x512xf32, #tpu.memory_space<vmem>>, vector<8x512xf32>
    %180 = arith.mulf %178, %179 : vector<8x512xf32>
    %c360_136 = arith.constant 360 : index
    %c0_137 = arith.constant 0 : index
    %181 = vector.load %arg32[%c360_136, %c0_137] : memref<392x512xf32, #tpu.memory_space<vmem>>, vector<8x512xf32>
    tpu.vector_store %arg32[%c360_136, %c0_137], %180 {strides = array<i32>} : memref<392x512xf32, #tpu.memory_space<vmem>>, vector<8x512xf32>,
    %c463_i32 = arith.constant 463 : i32
    %182 = tpu.dynamic_rotate %0 by %c463_i32 dim 1 : vector<8x512xf32>, i32 -> vector<8x512xf32>
    %c368 = arith.constant 368 : index
    %c0_138 = arith.constant 0 : index
    %183 = vector.load %arg18[%c368, %c0_138] : memref<392x512xf32, #tpu.memory_space<vmem>>, vector<8x512xf32>
    %184 = arith.mulf %182, %183 : vector<8x512xf32>
    %c368_139 = arith.constant 368 : index
    %c0_140 = arith.constant 0 : index
    %185 = vector.load %arg32[%c368_139, %c0_140] : memref<392x512xf32, #tpu.memory_space<vmem>>, vector<8x512xf32>
    tpu.vector_store %arg32[%c368_139, %c0_140], %184 {strides = array<i32>} : memref<392x512xf32, #tpu.memory_space<vmem>>, vector<8x512xf32>,
    %c462_i32 = arith.constant 462 : i32
    %186 = tpu.dynamic_rotate %0 by %c462_i32 dim 1 : vector<8x512xf32>, i32 -> vector<8x512xf32>
    %c376 = arith.constant 376 : index
    %c0_141 = arith.constant 0 : index
    %187 = vector.load %arg18[%c376, %c0_141] : memref<392x512xf32, #tpu.memory_space<vmem>>, vector<8x512xf32>
    %188 = arith.mulf %186, %187 : vector<8x512xf32>
    %c376_142 = arith.constant 376 : index
    %c0_143 = arith.constant 0 : index
    %189 = vector.load %arg32[%c376_142, %c0_143] : memref<392x512xf32, #tpu.memory_space<vmem>>, vector<8x512xf32>
    tpu.vector_store %arg32[%c376_142, %c0_143], %188 {strides = array<i32>} : memref<392x512xf32, #tpu.memory_space<vmem>>, vector<8x512xf32>,
    %c461_i32 = arith.constant 461 : i32
    %190 = tpu.dynamic_rotate %0 by %c461_i32 dim 1 : vector<8x512xf32>, i32 -> vector<8x512xf32>
    %c384 = arith.constant 384 : index
    %c0_144 = arith.constant 0 : index
    %191 = vector.load %arg18[%c384, %c0_144] : memref<392x512xf32, #tpu.memory_space<vmem>>, vector<8x512xf32>
    %192 = arith.mulf %190, %191 : vector<8x512xf32>
    %c384_145 = arith.constant 384 : index
    %c0_146 = arith.constant 0 : index
    %193 = vector.load %arg32[%c384_145, %c0_146] : memref<392x512xf32, #tpu.memory_space<vmem>>, vector<8x512xf32>
    tpu.vector_store %arg32[%c384_145, %c0_146], %192 {strides = array<i32>} : memref<392x512xf32, #tpu.memory_space<vmem>>, vector<8x512xf32>,
    %c0_147 = arith.constant 0 : index
    %c0_148 = arith.constant 0 : index
    %194 = vector.load %arg2[%c0_147, %c0_148] : memref<8x392xf32, #tpu.memory_space<vmem>>, vector<8x392xf32>
    %c0_149 = arith.constant 0 : index
    %c0_150 = arith.constant 0 : index
    %195 = vector.load %arg32[%c0_149, %c0_150] : memref<392x512xf32, #tpu.memory_space<vmem>>, vector<392x512xf32>
    %cst = arith.constant dense<0.000000e+00> : vector<8x512xf32>
    %196 = tpu.matmul %194, %195, %cst {dimension_numbers = #tpu.dot_dimension_numbers<[1], [0], [0], [1], [0, 0, 1, 1], [], []>} : vector<8x392xf32>, vector<392x512xf32>, vector<8x512xf32> -> vector<8x512xf32>
    %c0_151 = arith.constant 0 : index
    %c0_152 = arith.constant 0 : index
    %197 = vector.load %arg3[%c0_151, %c0_152] : memref<8x1xf32, #tpu.memory_space<vmem>>, vector<8x1xf32>
    %198 = vector.broadcast %197 : vector<8x1xf32> to vector<8x512xf32>
    %199 = arith.addf %196, %198 : vector<8x512xf32>
    %c0_153 = arith.constant 0 : index
    %c0_154 = arith.constant 0 : index
    %200 = vector.load %arg20[%c0_153, %c0_154] : memref<512x2xf32, #tpu.memory_space<vmem>>, vector<512x2xf32>
    %cst_155 = arith.constant dense<0.000000e+00> : vector<8x2xf32>
    %201 = tpu.matmul %199, %200, %cst_155 {dimension_numbers = #tpu.dot_dimension_numbers<[1], [0], [0], [1], [0, 0, 1, 1], [], []>} : vector<8x512xf32>, vector<512x2xf32>, vector<8x2xf32> -> vector<8x2xf32>
    %202 = arith.mulf %199, %199 : vector<8x512xf32>
    %c0_156 = arith.constant 0 : index
    %c0_157 = arith.constant 0 : index
    %203 = vector.load %arg20[%c0_156, %c0_157] : memref<512x2xf32, #tpu.memory_space<vmem>>, vector<512x2xf32>
    %cst_158 = arith.constant dense<0.000000e+00> : vector<8x2xf32>
    %204 = tpu.matmul %202, %203, %cst_158 {dimension_numbers = #tpu.dot_dimension_numbers<[1], [0], [0], [1], [0, 0, 1, 1], [], []>} : vector<8x512xf32>, vector<512x2xf32>, vector<8x2xf32> -> vector<8x2xf32>
    %c0_159 = arith.constant 0 : index
    %c0_160 = arith.constant 0 : index
    %205 = vector.load %arg19[%c0_159, %c0_160] : memref<8x8xf32, #tpu.memory_space<vmem>>, vector<8x8xf32>
    %cst_161 = arith.constant dense<0.000000e+00> : vector<8x2xf32>
    %206 = tpu.matmul %205, %201, %cst_161 {dimension_numbers = #tpu.dot_dimension_numbers<[1], [0], [0], [1], [0, 0, 1, 1], [], []>} : vector<8x8xf32>, vector<8x2xf32>, vector<8x2xf32> -> vector<8x2xf32>
    %c0_162 = arith.constant 0 : index
    %c0_163 = arith.constant 0 : index
    %207 = vector.load %arg19[%c0_162, %c0_163] : memref<8x8xf32, #tpu.memory_space<vmem>>, vector<8x8xf32>
    %cst_164 = arith.constant dense<0.000000e+00> : vector<8x2xf32>
    %208 = tpu.matmul %207, %204, %cst_164 {dimension_numbers = #tpu.dot_dimension_numbers<[1], [0], [0], [1], [0, 0, 1, 1], [], []>} : vector<8x8xf32>, vector<8x2xf32>, vector<8x2xf32> -> vector<8x2xf32>
    %209 = arith.mulf %206, %206 : vector<8x2xf32>
    %210 = arith.subf %208, %209 : vector<8x2xf32>
    %cst_165 = arith.constant 0.000000e+00 : f32
    %211 = vector.broadcast %cst_165 : f32 to vector<8x2xf32>
    %212 = arith.maximumf %210, %211 : vector<8x2xf32>
    %cst_166 = arith.constant 9.99999974E-6 : f32
    %213 = vector.broadcast %cst_166 : f32 to vector<8x2xf32>
    %214 = arith.addf %212, %213 : vector<8x2xf32>
    %215 = math.rsqrt %214 : vector<8x2xf32>
    %c0_167 = arith.constant 0 : index
    %c0_168 = arith.constant 0 : index
    %216 = vector.load %arg4[%c0_167, %c0_168] : memref<8x1xf32, #tpu.memory_space<vmem>>, vector<8x1xf32>
    %217 = vector.broadcast %216 : vector<8x1xf32> to vector<8x2xf32>
    %218 = arith.mulf %215, %217 : vector<8x2xf32>
    %c0_169 = arith.constant 0 : index
    %c0_170 = arith.constant 0 : index
    %219 = vector.load %arg5[%c0_169, %c0_170] : memref<8x1xf32, #tpu.memory_space<vmem>>, vector<8x1xf32>
    %220 = arith.mulf %206, %218 : vector<8x2xf32>
    %221 = vector.broadcast %219 : vector<8x1xf32> to vector<8x2xf32>
    %222 = arith.subf %221, %220 : vector<8x2xf32>
    %c0_171 = arith.constant 0 : index
    %c0_172 = arith.constant 0 : index
    %223 = vector.load %arg21[%c0_171, %c0_172] : memref<2x512xf32, #tpu.memory_space<vmem>>, vector<2x512xf32>
    %cst_173 = arith.constant dense<0.000000e+00> : vector<8x512xf32>
    %224 = tpu.matmul %218, %223, %cst_173 {dimension_numbers = #tpu.dot_dimension_numbers<[1], [0], [0], [1], [0, 0, 1, 1], [], []>} : vector<8x2xf32>, vector<2x512xf32>, vector<8x512xf32> -> vector<8x512xf32>
    %c0_174 = arith.constant 0 : index
    %c0_175 = arith.constant 0 : index
    %225 = vector.load %arg21[%c0_174, %c0_175] : memref<2x512xf32, #tpu.memory_space<vmem>>, vector<2x512xf32>
    %cst_176 = arith.constant dense<0.000000e+00> : vector<8x512xf32>
    %226 = tpu.matmul %222, %225, %cst_176 {dimension_numbers = #tpu.dot_dimension_numbers<[1], [0], [0], [1], [0, 0, 1, 1], [], []>} : vector<8x2xf32>, vector<2x512xf32>, vector<8x512xf32> -> vector<8x512xf32>
    %227 = arith.mulf %199, %224 : vector<8x512xf32>
    %228 = arith.addf %227, %226 : vector<8x512xf32>
    %cst_177 = arith.constant 0.000000e+00 : f32
    %229 = vector.broadcast %cst_177 : f32 to vector<8x512xf32>
    %230 = arith.maximumf %228, %229 : vector<8x512xf32>
    %c17_i32_178 = arith.constant 17 : i32
    %231 = tpu.dynamic_rotate %230 by %c17_i32_178 dim 1 : vector<8x512xf32>, i32 -> vector<8x512xf32>
    %c0_179 = arith.constant 0 : index
    %c0_180 = arith.constant 0 : index
    %232 = vector.load %arg22[%c0_179, %c0_180] : memref<72x512xf32, #tpu.memory_space<vmem>>, vector<8x512xf32>
    %233 = arith.mulf %231, %232 : vector<8x512xf32>
    %c0_181 = arith.constant 0 : index
    %c0_182 = arith.constant 0 : index
    %234 = vector.load %arg32[%c0_181, %c0_182] : memref<392x512xf32, #tpu.memory_space<vmem>>, vector<8x512xf32>
    tpu.vector_store %arg32[%c0_181, %c0_182], %233 {strides = array<i32>} : memref<392x512xf32, #tpu.memory_space<vmem>>, vector<8x512xf32>,
    %c16_i32_183 = arith.constant 16 : i32
    %235 = tpu.dynamic_rotate %230 by %c16_i32_183 dim 1 : vector<8x512xf32>, i32 -> vector<8x512xf32>
    %c8_184 = arith.constant 8 : index
    %c0_185 = arith.constant 0 : index
    %236 = vector.load %arg22[%c8_184, %c0_185] : memref<72x512xf32, #tpu.memory_space<vmem>>, vector<8x512xf32>
    %237 = arith.mulf %235, %236 : vector<8x512xf32>
    %c8_186 = arith.constant 8 : index
    %c0_187 = arith.constant 0 : index
    %238 = vector.load %arg32[%c8_186, %c0_187] : memref<392x512xf32, #tpu.memory_space<vmem>>, vector<8x512xf32>
    tpu.vector_store %arg32[%c8_186, %c0_187], %237 {strides = array<i32>} : memref<392x512xf32, #tpu.memory_space<vmem>>, vector<8x512xf32>,
    %c15_i32_188 = arith.constant 15 : i32
    %239 = tpu.dynamic_rotate %230 by %c15_i32_188 dim 1 : vector<8x512xf32>, i32 -> vector<8x512xf32>
    %c16_189 = arith.constant 16 : index
    %c0_190 = arith.constant 0 : index
    %240 = vector.load %arg22[%c16_189, %c0_190] : memref<72x512xf32, #tpu.memory_space<vmem>>, vector<8x512xf32>
    %241 = arith.mulf %239, %240 : vector<8x512xf32>
    %c16_191 = arith.constant 16 : index
    %c0_192 = arith.constant 0 : index
    %242 = vector.load %arg32[%c16_191, %c0_192] : memref<392x512xf32, #tpu.memory_space<vmem>>, vector<8x512xf32>
    tpu.vector_store %arg32[%c16_191, %c0_192], %241 {strides = array<i32>} : memref<392x512xf32, #tpu.memory_space<vmem>>, vector<8x512xf32>,
    %c1_i32_193 = arith.constant 1 : i32
    %243 = tpu.dynamic_rotate %230 by %c1_i32_193 dim 1 : vector<8x512xf32>, i32 -> vector<8x512xf32>
    %c24_194 = arith.constant 24 : index
    %c0_195 = arith.constant 0 : index
    %244 = vector.load %arg22[%c24_194, %c0_195] : memref<72x512xf32, #tpu.memory_space<vmem>>, vector<8x512xf32>
    %245 = arith.mulf %243, %244 : vector<8x512xf32>
    %c24_196 = arith.constant 24 : index
    %c0_197 = arith.constant 0 : index
    %246 = vector.load %arg32[%c24_196, %c0_197] : memref<392x512xf32, #tpu.memory_space<vmem>>, vector<8x512xf32>
    tpu.vector_store %arg32[%c24_196, %c0_197], %245 {strides = array<i32>} : memref<392x512xf32, #tpu.memory_space<vmem>>, vector<8x512xf32>,
    %c32_198 = arith.constant 32 : index
    %c0_199 = arith.constant 0 : index
    %247 = vector.load %arg32[%c32_198, %c0_199] : memref<392x512xf32, #tpu.memory_space<vmem>>, vector<8x512xf32>
    tpu.vector_store %arg32[%c32_198, %c0_199], %230 {strides = array<i32>} : memref<392x512xf32, #tpu.memory_space<vmem>>, vector<8x512xf32>,
    %c511_i32_200 = arith.constant 511 : i32
    %248 = tpu.dynamic_rotate %230 by %c511_i32_200 dim 1 : vector<8x512xf32>, i32 -> vector<8x512xf32>
    %c40_201 = arith.constant 40 : index
    %c0_202 = arith.constant 0 : index
    %249 = vector.load %arg22[%c40_201, %c0_202] : memref<72x512xf32, #tpu.memory_space<vmem>>, vector<8x512xf32>
    %250 = arith.mulf %248, %249 : vector<8x512xf32>
    %c40_203 = arith.constant 40 : index
    %c0_204 = arith.constant 0 : index
    %251 = vector.load %arg32[%c40_203, %c0_204] : memref<392x512xf32, #tpu.memory_space<vmem>>, vector<8x512xf32>
    tpu.vector_store %arg32[%c40_203, %c0_204], %250 {strides = array<i32>} : memref<392x512xf32, #tpu.memory_space<vmem>>, vector<8x512xf32>,
    %c497_i32_205 = arith.constant 497 : i32
    %252 = tpu.dynamic_rotate %230 by %c497_i32_205 dim 1 : vector<8x512xf32>, i32 -> vector<8x512xf32>
    %c48_206 = arith.constant 48 : index
    %c0_207 = arith.constant 0 : index
    %253 = vector.load %arg22[%c48_206, %c0_207] : memref<72x512xf32, #tpu.memory_space<vmem>>, vector<8x512xf32>
    %254 = arith.mulf %252, %253 : vector<8x512xf32>
    %c48_208 = arith.constant 48 : index
    %c0_209 = arith.constant 0 : index
    %255 = vector.load %arg32[%c48_208, %c0_209] : memref<392x512xf32, #tpu.memory_space<vmem>>, vector<8x512xf32>
    tpu.vector_store %arg32[%c48_208, %c0_209], %254 {strides = array<i32>} : memref<392x512xf32, #tpu.memory_space<vmem>>, vector<8x512xf32>,
    %c496_i32_210 = arith.constant 496 : i32
    %256 = tpu.dynamic_rotate %230 by %c496_i32_210 dim 1 : vector<8x512xf32>, i32 -> vector<8x512xf32>
    %c56_211 = arith.constant 56 : index
    %c0_212 = arith.constant 0 : index
    %257 = vector.load %arg22[%c56_211, %c0_212] : memref<72x512xf32, #tpu.memory_space<vmem>>, vector<8x512xf32>
    %258 = arith.mulf %256, %257 : vector<8x512xf32>
    %c56_213 = arith.constant 56 : index
    %c0_214 = arith.constant 0 : index
    %259 = vector.load %arg32[%c56_213, %c0_214] : memref<392x512xf32, #tpu.memory_space<vmem>>, vector<8x512xf32>
    tpu.vector_store %arg32[%c56_213, %c0_214], %258 {strides = array<i32>} : memref<392x512xf32, #tpu.memory_space<vmem>>, vector<8x512xf32>,
    %c495_i32_215 = arith.constant 495 : i32
    %260 = tpu.dynamic_rotate %230 by %c495_i32_215 dim 1 : vector<8x512xf32>, i32 -> vector<8x512xf32>
    %c64_216 = arith.constant 64 : index
    %c0_217 = arith.constant 0 : index
    %261 = vector.load %arg22[%c64_216, %c0_217] : memref<72x512xf32, #tpu.memory_space<vmem>>, vector<8x512xf32>
    %262 = arith.mulf %260, %261 : vector<8x512xf32>
    %c64_218 = arith.constant 64 : index
    %c0_219 = arith.constant 0 : index
    %263 = vector.load %arg32[%c64_218, %c0_219] : memref<392x512xf32, #tpu.memory_space<vmem>>, vector<8x512xf32>
    tpu.vector_store %arg32[%c64_218, %c0_219], %262 {strides = array<i32>} : memref<392x512xf32, #tpu.memory_space<vmem>>, vector<8x512xf32>,
    %c0_220 = arith.constant 0 : index
    %c0_221 = arith.constant 0 : index
    %264 = vector.load %arg6[%c0_220, %c0_221] : memref<16x72xf32, #tpu.memory_space<vmem>>, vector<16x72xf32>
    %c0_222 = arith.constant 0 : index
    %c0_223 = arith.constant 0 : index
    %265 = vector.load %arg32[%c0_222, %c0_223] : memref<392x512xf32, #tpu.memory_space<vmem>>, vector<72x512xf32>
    %cst_224 = arith.constant dense<0.000000e+00> : vector<16x512xf32>
    %266 = tpu.matmul %264, %265, %cst_224 {dimension_numbers = #tpu.dot_dimension_numbers<[1], [0], [0], [1], [0, 0, 1, 1], [], []>} : vector<16x72xf32>, vector<72x512xf32>, vector<16x512xf32> -> vector<16x512xf32>
    %c0_225 = arith.constant 0 : index
    %c0_226 = arith.constant 0 : index
    %267 = vector.load %arg7[%c0_225, %c0_226] : memref<16x1xf32, #tpu.memory_space<vmem>>, vector<16x1xf32>
    %268 = vector.broadcast %267 : vector<16x1xf32> to vector<16x512xf32>
    %269 = arith.addf %266, %268 : vector<16x512xf32>
    %c0_227 = arith.constant 0 : index
    %c0_228 = arith.constant 0 : index
    %270 = vector.load %arg23[%c0_227, %c0_228] : memref<512x128xf32, #tpu.memory_space<vmem>>, vector<512x128xf32>
    %cst_229 = arith.constant dense<0.000000e+00> : vector<16x128xf32>
    %271 = tpu.matmul %269, %270, %cst_229 {dimension_numbers = #tpu.dot_dimension_numbers<[1], [0], [0], [1], [0, 0, 1, 1], [], []>} : vector<16x512xf32>, vector<512x128xf32>, vector<16x128xf32> -> vector<16x128xf32>
    %c0_230 = arith.constant 0 : index
    %c0_231 = arith.constant 0 : index
    %272 = vector.load %arg25[%c0_230, %c0_231] : memref<128x2xf32, #tpu.memory_space<vmem>>, vector<128x2xf32>
    %cst_232 = arith.constant dense<0.000000e+00> : vector<16x2xf32>
    %273 = tpu.matmul %271, %272, %cst_232 {dimension_numbers = #tpu.dot_dimension_numbers<[1], [0], [0], [1], [0, 0, 1, 1], [], []>} : vector<16x128xf32>, vector<128x2xf32>, vector<16x2xf32> -> vector<16x2xf32>
    %274 = arith.mulf %271, %271 : vector<16x128xf32>
    %c0_233 = arith.constant 0 : index
    %c0_234 = arith.constant 0 : index
    %275 = vector.load %arg25[%c0_233, %c0_234] : memref<128x2xf32, #tpu.memory_space<vmem>>, vector<128x2xf32>
    %cst_235 = arith.constant dense<0.000000e+00> : vector<16x2xf32>
    %276 = tpu.matmul %274, %275, %cst_235 {dimension_numbers = #tpu.dot_dimension_numbers<[1], [0], [0], [1], [0, 0, 1, 1], [], []>} : vector<16x128xf32>, vector<128x2xf32>, vector<16x2xf32> -> vector<16x2xf32>
    %c0_236 = arith.constant 0 : index
    %c0_237 = arith.constant 0 : index
    %277 = vector.load %arg24[%c0_236, %c0_237] : memref<16x16xf32, #tpu.memory_space<vmem>>, vector<16x16xf32>
    %cst_238 = arith.constant dense<0.000000e+00> : vector<16x2xf32>
    %278 = tpu.matmul %277, %273, %cst_238 {dimension_numbers = #tpu.dot_dimension_numbers<[1], [0], [0], [1], [0, 0, 1, 1], [], []>} : vector<16x16xf32>, vector<16x2xf32>, vector<16x2xf32> -> vector<16x2xf32>
    %c0_239 = arith.constant 0 : index
    %c0_240 = arith.constant 0 : index
    %279 = vector.load %arg24[%c0_239, %c0_240] : memref<16x16xf32, #tpu.memory_space<vmem>>, vector<16x16xf32>
    %cst_241 = arith.constant dense<0.000000e+00> : vector<16x2xf32>
    %280 = tpu.matmul %279, %276, %cst_241 {dimension_numbers = #tpu.dot_dimension_numbers<[1], [0], [0], [1], [0, 0, 1, 1], [], []>} : vector<16x16xf32>, vector<16x2xf32>, vector<16x2xf32> -> vector<16x2xf32>
    %281 = arith.mulf %278, %278 : vector<16x2xf32>
    %282 = arith.subf %280, %281 : vector<16x2xf32>
    %cst_242 = arith.constant 0.000000e+00 : f32
    %283 = vector.broadcast %cst_242 : f32 to vector<16x2xf32>
    %284 = arith.maximumf %282, %283 : vector<16x2xf32>
    %cst_243 = arith.constant 9.99999974E-6 : f32
    %285 = vector.broadcast %cst_243 : f32 to vector<16x2xf32>
    %286 = arith.addf %284, %285 : vector<16x2xf32>
    %287 = math.rsqrt %286 : vector<16x2xf32>
    %c0_244 = arith.constant 0 : index
    %c0_245 = arith.constant 0 : index
    %288 = vector.load %arg8[%c0_244, %c0_245] : memref<16x1xf32, #tpu.memory_space<vmem>>, vector<16x1xf32>
    %289 = vector.broadcast %288 : vector<16x1xf32> to vector<16x2xf32>
    %290 = arith.mulf %287, %289 : vector<16x2xf32>
    %c0_246 = arith.constant 0 : index
    %c0_247 = arith.constant 0 : index
    %291 = vector.load %arg9[%c0_246, %c0_247] : memref<16x1xf32, #tpu.memory_space<vmem>>, vector<16x1xf32>
    %292 = arith.mulf %278, %290 : vector<16x2xf32>
    %293 = vector.broadcast %291 : vector<16x1xf32> to vector<16x2xf32>
    %294 = arith.subf %293, %292 : vector<16x2xf32>
    %c0_248 = arith.constant 0 : index
    %c0_249 = arith.constant 0 : index
    %295 = vector.load %arg26[%c0_248, %c0_249] : memref<2x128xf32, #tpu.memory_space<vmem>>, vector<2x128xf32>
    %cst_250 = arith.constant dense<0.000000e+00> : vector<16x128xf32>
    %296 = tpu.matmul %290, %295, %cst_250 {dimension_numbers = #tpu.dot_dimension_numbers<[1], [0], [0], [1], [0, 0, 1, 1], [], []>} : vector<16x2xf32>, vector<2x128xf32>, vector<16x128xf32> -> vector<16x128xf32>
    %c0_251 = arith.constant 0 : index
    %c0_252 = arith.constant 0 : index
    %297 = vector.load %arg26[%c0_251, %c0_252] : memref<2x128xf32, #tpu.memory_space<vmem>>, vector<2x128xf32>
    %cst_253 = arith.constant dense<0.000000e+00> : vector<16x128xf32>
    %298 = tpu.matmul %294, %297, %cst_253 {dimension_numbers = #tpu.dot_dimension_numbers<[1], [0], [0], [1], [0, 0, 1, 1], [], []>} : vector<16x2xf32>, vector<2x128xf32>, vector<16x128xf32> -> vector<16x128xf32>
    %299 = arith.mulf %271, %296 : vector<16x128xf32>
    %300 = arith.addf %299, %298 : vector<16x128xf32>
    %cst_254 = arith.constant 0.000000e+00 : f32
    %301 = vector.broadcast %cst_254 : f32 to vector<16x128xf32>
    %302 = arith.maximumf %300, %301 : vector<16x128xf32>
    %c9_i32 = arith.constant 9 : i32
    %303 = tpu.dynamic_rotate %302 by %c9_i32 dim 1 : vector<16x128xf32>, i32 -> vector<16x128xf32>
    %c0_255 = arith.constant 0 : index
    %c0_256 = arith.constant 0 : index
    %304 = vector.load %arg27[%c0_255, %c0_256] : memref<144x128xf32, #tpu.memory_space<vmem>>, vector<16x128xf32>
    %305 = arith.mulf %303, %304 : vector<16x128xf32>
    %c0_257 = arith.constant 0 : index
    %c0_258 = arith.constant 0 : index
    %306 = vector.load %arg32[%c0_257, %c0_258] : memref<392x512xf32, #tpu.memory_space<vmem>>, vector<16x128xf32>
    tpu.vector_store %arg32[%c0_257, %c0_258], %305 {strides = array<i32>} : memref<392x512xf32, #tpu.memory_space<vmem>>, vector<16x128xf32>,
    %c8_i32 = arith.constant 8 : i32
    %307 = tpu.dynamic_rotate %302 by %c8_i32 dim 1 : vector<16x128xf32>, i32 -> vector<16x128xf32>
    %c16_259 = arith.constant 16 : index
    %c0_260 = arith.constant 0 : index
    %308 = vector.load %arg27[%c16_259, %c0_260] : memref<144x128xf32, #tpu.memory_space<vmem>>, vector<16x128xf32>
    %309 = arith.mulf %307, %308 : vector<16x128xf32>
    %c16_261 = arith.constant 16 : index
    %c0_262 = arith.constant 0 : index
    %310 = vector.load %arg32[%c16_261, %c0_262] : memref<392x512xf32, #tpu.memory_space<vmem>>, vector<16x128xf32>
    tpu.vector_store %arg32[%c16_261, %c0_262], %309 {strides = array<i32>} : memref<392x512xf32, #tpu.memory_space<vmem>>, vector<16x128xf32>,
    %c7_i32 = arith.constant 7 : i32
    %311 = tpu.dynamic_rotate %302 by %c7_i32 dim 1 : vector<16x128xf32>, i32 -> vector<16x128xf32>
    %c32_263 = arith.constant 32 : index
    %c0_264 = arith.constant 0 : index
    %312 = vector.load %arg27[%c32_263, %c0_264] : memref<144x128xf32, #tpu.memory_space<vmem>>, vector<16x128xf32>
    %313 = arith.mulf %311, %312 : vector<16x128xf32>
    %c32_265 = arith.constant 32 : index
    %c0_266 = arith.constant 0 : index
    %314 = vector.load %arg32[%c32_265, %c0_266] : memref<392x512xf32, #tpu.memory_space<vmem>>, vector<16x128xf32>
    tpu.vector_store %arg32[%c32_265, %c0_266], %313 {strides = array<i32>} : memref<392x512xf32, #tpu.memory_space<vmem>>, vector<16x128xf32>,
    %c1_i32_267 = arith.constant 1 : i32
    %315 = tpu.dynamic_rotate %302 by %c1_i32_267 dim 1 : vector<16x128xf32>, i32 -> vector<16x128xf32>
    %c48_268 = arith.constant 48 : index
    %c0_269 = arith.constant 0 : index
    %316 = vector.load %arg27[%c48_268, %c0_269] : memref<144x128xf32, #tpu.memory_space<vmem>>, vector<16x128xf32>
    %317 = arith.mulf %315, %316 : vector<16x128xf32>
    %c48_270 = arith.constant 48 : index
    %c0_271 = arith.constant 0 : index
    %318 = vector.load %arg32[%c48_270, %c0_271] : memref<392x512xf32, #tpu.memory_space<vmem>>, vector<16x128xf32>
    tpu.vector_store %arg32[%c48_270, %c0_271], %317 {strides = array<i32>} : memref<392x512xf32, #tpu.memory_space<vmem>>, vector<16x128xf32>,
    %c64_272 = arith.constant 64 : index
    %c0_273 = arith.constant 0 : index
    %319 = vector.load %arg32[%c64_272, %c0_273] : memref<392x512xf32, #tpu.memory_space<vmem>>, vector<16x128xf32>
    tpu.vector_store %arg32[%c64_272, %c0_273], %302 {strides = array<i32>} : memref<392x512xf32, #tpu.memory_space<vmem>>, vector<16x128xf32>,
    %c127_i32 = arith.constant 127 : i32
    %320 = tpu.dynamic_rotate %302 by %c127_i32 dim 1 : vector<16x128xf32>, i32 -> vector<16x128xf32>
    %c80_274 = arith.constant 80 : index
    %c0_275 = arith.constant 0 : index
    %321 = vector.load %arg27[%c80_274, %c0_275] : memref<144x128xf32, #tpu.memory_space<vmem>>, vector<16x128xf32>
    %322 = arith.mulf %320, %321 : vector<16x128xf32>
    %c80_276 = arith.constant 80 : index
    %c0_277 = arith.constant 0 : index
    %323 = vector.load %arg32[%c80_276, %c0_277] : memref<392x512xf32, #tpu.memory_space<vmem>>, vector<16x128xf32>
    tpu.vector_store %arg32[%c80_276, %c0_277], %322 {strides = array<i32>} : memref<392x512xf32, #tpu.memory_space<vmem>>, vector<16x128xf32>,
    %c121_i32 = arith.constant 121 : i32
    %324 = tpu.dynamic_rotate %302 by %c121_i32 dim 1 : vector<16x128xf32>, i32 -> vector<16x128xf32>
    %c96_278 = arith.constant 96 : index
    %c0_279 = arith.constant 0 : index
    %325 = vector.load %arg27[%c96_278, %c0_279] : memref<144x128xf32, #tpu.memory_space<vmem>>, vector<16x128xf32>
    %326 = arith.mulf %324, %325 : vector<16x128xf32>
    %c96_280 = arith.constant 96 : index
    %c0_281 = arith.constant 0 : index
    %327 = vector.load %arg32[%c96_280, %c0_281] : memref<392x512xf32, #tpu.memory_space<vmem>>, vector<16x128xf32>
    tpu.vector_store %arg32[%c96_280, %c0_281], %326 {strides = array<i32>} : memref<392x512xf32, #tpu.memory_space<vmem>>, vector<16x128xf32>,
    %c120_i32 = arith.constant 120 : i32
    %328 = tpu.dynamic_rotate %302 by %c120_i32 dim 1 : vector<16x128xf32>, i32 -> vector<16x128xf32>
    %c112_282 = arith.constant 112 : index
    %c0_283 = arith.constant 0 : index
    %329 = vector.load %arg27[%c112_282, %c0_283] : memref<144x128xf32, #tpu.memory_space<vmem>>, vector<16x128xf32>
    %330 = arith.mulf %328, %329 : vector<16x128xf32>
    %c112_284 = arith.constant 112 : index
    %c0_285 = arith.constant 0 : index
    %331 = vector.load %arg32[%c112_284, %c0_285] : memref<392x512xf32, #tpu.memory_space<vmem>>, vector<16x128xf32>
    tpu.vector_store %arg32[%c112_284, %c0_285], %330 {strides = array<i32>} : memref<392x512xf32, #tpu.memory_space<vmem>>, vector<16x128xf32>,
    %c119_i32 = arith.constant 119 : i32
    %332 = tpu.dynamic_rotate %302 by %c119_i32 dim 1 : vector<16x128xf32>, i32 -> vector<16x128xf32>
    %c128_286 = arith.constant 128 : index
    %c0_287 = arith.constant 0 : index
    %333 = vector.load %arg27[%c128_286, %c0_287] : memref<144x128xf32, #tpu.memory_space<vmem>>, vector<16x128xf32>
    %334 = arith.mulf %332, %333 : vector<16x128xf32>
    %c128_288 = arith.constant 128 : index
    %c0_289 = arith.constant 0 : index
    %335 = vector.load %arg32[%c128_288, %c0_289] : memref<392x512xf32, #tpu.memory_space<vmem>>, vector<16x128xf32>
    tpu.vector_store %arg32[%c128_288, %c0_289], %334 {strides = array<i32>} : memref<392x512xf32, #tpu.memory_space<vmem>>, vector<16x128xf32>,
    %c0_290 = arith.constant 0 : index
    %c0_291 = arith.constant 0 : index
    %336 = vector.load %arg10[%c0_290, %c0_291] : memref<16x144xf32, #tpu.memory_space<vmem>>, vector<16x144xf32>
    %c0_292 = arith.constant 0 : index
    %c0_293 = arith.constant 0 : index
    %337 = vector.load %arg32[%c0_292, %c0_293] : memref<392x512xf32, #tpu.memory_space<vmem>>, vector<144x128xf32>
    %cst_294 = arith.constant dense<0.000000e+00> : vector<16x128xf32>
    %338 = tpu.matmul %336, %337, %cst_294 {dimension_numbers = #tpu.dot_dimension_numbers<[1], [0], [0], [1], [0, 0, 1, 1], [], []>} : vector<16x144xf32>, vector<144x128xf32>, vector<16x128xf32> -> vector<16x128xf32>
    %c0_295 = arith.constant 0 : index
    %c0_296 = arith.constant 0 : index
    %339 = vector.load %arg11[%c0_295, %c0_296] : memref<16x1xf32, #tpu.memory_space<vmem>>, vector<16x1xf32>
    %340 = vector.broadcast %339 : vector<16x1xf32> to vector<16x128xf32>
    %341 = arith.addf %338, %340 : vector<16x128xf32>
    %c0_297 = arith.constant 0 : index
    %c0_298 = arith.constant 0 : index
    %342 = vector.load %arg23[%c0_297, %c0_298] : memref<512x128xf32, #tpu.memory_space<vmem>>, vector<512x128xf32>
    %cst_299 = arith.constant dense<0.000000e+00> : vector<8x128xf32>
    %343 = tpu.matmul %199, %342, %cst_299 {dimension_numbers = #tpu.dot_dimension_numbers<[1], [0], [0], [1], [0, 0, 1, 1], [], []>} : vector<8x512xf32>, vector<512x128xf32>, vector<8x128xf32> -> vector<8x128xf32>
    %c0_300 = arith.constant 0 : index
    %c0_301 = arith.constant 0 : index
    %344 = vector.load %arg12[%c0_300, %c0_301] : memref<16x8xf32, #tpu.memory_space<vmem>>, vector<16x8xf32>
    %cst_302 = arith.constant dense<0.000000e+00> : vector<16x128xf32>
    %345 = tpu.matmul %344, %343, %cst_302 {dimension_numbers = #tpu.dot_dimension_numbers<[1], [0], [0], [1], [0, 0, 1, 1], [], []>} : vector<16x8xf32>, vector<8x128xf32>, vector<16x128xf32> -> vector<16x128xf32>
    %c0_303 = arith.constant 0 : index
    %c0_304 = arith.constant 0 : index
    %346 = vector.load %arg13[%c0_303, %c0_304] : memref<16x1xf32, #tpu.memory_space<vmem>>, vector<16x1xf32>
    %347 = vector.broadcast %346 : vector<16x1xf32> to vector<16x128xf32>
    %348 = arith.addf %345, %347 : vector<16x128xf32>
    %349 = arith.addf %341, %348 : vector<16x128xf32>
    %c0_305 = arith.constant 0 : index
    %c0_306 = arith.constant 0 : index
    %350 = vector.load %arg29[%c0_305, %c0_306] : memref<128x2xf32, #tpu.memory_space<vmem>>, vector<128x2xf32>
    %cst_307 = arith.constant dense<0.000000e+00> : vector<16x2xf32>
    %351 = tpu.matmul %349, %350, %cst_307 {dimension_numbers = #tpu.dot_dimension_numbers<[1], [0], [0], [1], [0, 0, 1, 1], [], []>} : vector<16x128xf32>, vector<128x2xf32>, vector<16x2xf32> -> vector<16x2xf32>
    %352 = arith.mulf %349, %349 : vector<16x128xf32>
    %c0_308 = arith.constant 0 : index
    %c0_309 = arith.constant 0 : index
    %353 = vector.load %arg29[%c0_308, %c0_309] : memref<128x2xf32, #tpu.memory_space<vmem>>, vector<128x2xf32>
    %cst_310 = arith.constant dense<0.000000e+00> : vector<16x2xf32>
    %354 = tpu.matmul %352, %353, %cst_310 {dimension_numbers = #tpu.dot_dimension_numbers<[1], [0], [0], [1], [0, 0, 1, 1], [], []>} : vector<16x128xf32>, vector<128x2xf32>, vector<16x2xf32> -> vector<16x2xf32>
    %c0_311 = arith.constant 0 : index
    %c0_312 = arith.constant 0 : index
    %355 = vector.load %arg28[%c0_311, %c0_312] : memref<16x16xf32, #tpu.memory_space<vmem>>, vector<16x16xf32>
    %cst_313 = arith.constant dense<0.000000e+00> : vector<16x2xf32>
    %356 = tpu.matmul %355, %351, %cst_313 {dimension_numbers = #tpu.dot_dimension_numbers<[1], [0], [0], [1], [0, 0, 1, 1], [], []>} : vector<16x16xf32>, vector<16x2xf32>, vector<16x2xf32> -> vector<16x2xf32>
    %c0_314 = arith.constant 0 : index
    %c0_315 = arith.constant 0 : index
    %357 = vector.load %arg28[%c0_314, %c0_315] : memref<16x16xf32, #tpu.memory_space<vmem>>, vector<16x16xf32>
    %cst_316 = arith.constant dense<0.000000e+00> : vector<16x2xf32>
    %358 = tpu.matmul %357, %354, %cst_316 {dimension_numbers = #tpu.dot_dimension_numbers<[1], [0], [0], [1], [0, 0, 1, 1], [], []>} : vector<16x16xf32>, vector<16x2xf32>, vector<16x2xf32> -> vector<16x2xf32>
    %359 = arith.mulf %356, %356 : vector<16x2xf32>
    %360 = arith.subf %358, %359 : vector<16x2xf32>
    %cst_317 = arith.constant 0.000000e+00 : f32
    %361 = vector.broadcast %cst_317 : f32 to vector<16x2xf32>
    %362 = arith.maximumf %360, %361 : vector<16x2xf32>
    %cst_318 = arith.constant 9.99999974E-6 : f32
    %363 = vector.broadcast %cst_318 : f32 to vector<16x2xf32>
    %364 = arith.addf %362, %363 : vector<16x2xf32>
    %365 = math.rsqrt %364 : vector<16x2xf32>
    %c0_319 = arith.constant 0 : index
    %c0_320 = arith.constant 0 : index
    %366 = vector.load %arg14[%c0_319, %c0_320] : memref<16x1xf32, #tpu.memory_space<vmem>>, vector<16x1xf32>
    %367 = vector.broadcast %366 : vector<16x1xf32> to vector<16x2xf32>
    %368 = arith.mulf %365, %367 : vector<16x2xf32>
    %c0_321 = arith.constant 0 : index
    %c0_322 = arith.constant 0 : index
    %369 = vector.load %arg15[%c0_321, %c0_322] : memref<16x1xf32, #tpu.memory_space<vmem>>, vector<16x1xf32>
    %370 = arith.mulf %356, %368 : vector<16x2xf32>
    %371 = vector.broadcast %369 : vector<16x1xf32> to vector<16x2xf32>
    %372 = arith.subf %371, %370 : vector<16x2xf32>
    %c0_323 = arith.constant 0 : index
    %c0_324 = arith.constant 0 : index
    %373 = vector.load %arg30[%c0_323, %c0_324] : memref<2x128xf32, #tpu.memory_space<vmem>>, vector<2x128xf32>
    %cst_325 = arith.constant dense<0.000000e+00> : vector<16x128xf32>
    %374 = tpu.matmul %368, %373, %cst_325 {dimension_numbers = #tpu.dot_dimension_numbers<[1], [0], [0], [1], [0, 0, 1, 1], [], []>} : vector<16x2xf32>, vector<2x128xf32>, vector<16x128xf32> -> vector<16x128xf32>
    %c0_326 = arith.constant 0 : index
    %c0_327 = arith.constant 0 : index
    %375 = vector.load %arg30[%c0_326, %c0_327] : memref<2x128xf32, #tpu.memory_space<vmem>>, vector<2x128xf32>
    %cst_328 = arith.constant dense<0.000000e+00> : vector<16x128xf32>
    %376 = tpu.matmul %372, %375, %cst_328 {dimension_numbers = #tpu.dot_dimension_numbers<[1], [0], [0], [1], [0, 0, 1, 1], [], []>} : vector<16x2xf32>, vector<2x128xf32>, vector<16x128xf32> -> vector<16x128xf32>
    %377 = arith.mulf %349, %374 : vector<16x128xf32>
    %378 = arith.addf %377, %376 : vector<16x128xf32>
    %cst_329 = arith.constant 0.000000e+00 : f32
    %379 = vector.broadcast %cst_329 : f32 to vector<16x128xf32>
    %380 = arith.maximumf %378, %379 : vector<16x128xf32>
    %c0_330 = arith.constant 0 : index
    %c0_331 = arith.constant 0 : index
    %381 = vector.load %arg16[%c0_330, %c0_331] : memref<4x16xf32, #tpu.memory_space<vmem>>, vector<4x16xf32>
    %cst_332 = arith.constant dense<0.000000e+00> : vector<4x128xf32>
    %382 = tpu.matmul %381, %380, %cst_332 {dimension_numbers = #tpu.dot_dimension_numbers<[1], [0], [0], [1], [0, 0, 1, 1], [], []>} : vector<4x16xf32>, vector<16x128xf32>, vector<4x128xf32> -> vector<4x128xf32>
    %c0_333 = arith.constant 0 : index
    %c0_334 = arith.constant 0 : index
    %383 = vector.load %arg17[%c0_333, %c0_334] : memref<4x1xf32, #tpu.memory_space<vmem>>, vector<4x1xf32>
    %384 = vector.broadcast %383 : vector<4x1xf32> to vector<4x128xf32>
    %385 = arith.addf %382, %384 : vector<4x128xf32>
    %c0_335 = arith.constant 0 : index
    %c0_336 = arith.constant 0 : index
    %386 = vector.load %arg31[%c0_335, %c0_336] : memref<4x128xf32, #tpu.memory_space<vmem>>, vector<4x128xf32>
    tpu.vector_store %arg31[%c0_335, %c0_336], %385 {strides = array<i32>} : memref<4x128xf32, #tpu.memory_space<vmem>>, vector<4x128xf32>,
    return
  }
  func.func @transform_0(%arg0: i32) -> (i32, i32) {
    %c0_i32 = arith.constant 0 : i32
    %c0_i32_0 = arith.constant 0 : i32
    %c0_i32_1 = arith.constant 0 : i32
    return %c0_i32, %c0_i32_0 : i32, i32
  }
  func.func @transform_1(%arg0: i32) -> (i32, i32) {
    %c0_i32 = arith.constant 0 : i32
    %c0_i32_0 = arith.constant 0 : i32
    %c0_i32_1 = arith.constant 0 : i32
    return %c0_i32, %c0_i32_0 : i32, i32
  }
  func.func @transform_2(%arg0: i32) -> (i32, i32) {
    %c0_i32 = arith.constant 0 : i32
    %c0_i32_0 = arith.constant 0 : i32
    %c0_i32_1 = arith.constant 0 : i32
    return %c0_i32, %c0_i32_0 : i32, i32
  }
  func.func @transform_3(%arg0: i32) -> (i32, i32) {
    %c0_i32 = arith.constant 0 : i32
    %c0_i32_0 = arith.constant 0 : i32
    %c0_i32_1 = arith.constant 0 : i32
    return %c0_i32, %c0_i32_0 : i32, i32
  }
  func.func @transform_4(%arg0: i32) -> (i32, i32) {
    %c0_i32 = arith.constant 0 : i32
    %c0_i32_0 = arith.constant 0 : i32
    %c0_i32_1 = arith.constant 0 : i32
    return %c0_i32, %c0_i32_0 : i32, i32
  }
  func.func @transform_5(%arg0: i32) -> (i32, i32) {
    %c0_i32 = arith.constant 0 : i32
    %c0_i32_0 = arith.constant 0 : i32
    %c0_i32_1 = arith.constant 0 : i32
    return %c0_i32, %c0_i32_0 : i32, i32
  }
  func.func @transform_6(%arg0: i32) -> (i32, i32) {
    %c0_i32 = arith.constant 0 : i32
    %c0_i32_0 = arith.constant 0 : i32
    %c0_i32_1 = arith.constant 0 : i32
    return %c0_i32, %c0_i32_0 : i32, i32
  }
  func.func @transform_7(%arg0: i32) -> (i32, i32) {
    %c0_i32 = arith.constant 0 : i32
    %c0_i32_0 = arith.constant 0 : i32
    %c0_i32_1 = arith.constant 0 : i32
    return %c0_i32, %c0_i32_0 : i32, i32
  }
  func.func @transform_8(%arg0: i32) -> (i32, i32) {
    %c0_i32 = arith.constant 0 : i32
    %c0_i32_0 = arith.constant 0 : i32
    %c0_i32_1 = arith.constant 0 : i32
    return %c0_i32, %c0_i32_0 : i32, i32
  }
  func.func @transform_9(%arg0: i32) -> (i32, i32) {
    %c0_i32 = arith.constant 0 : i32
    %c0_i32_0 = arith.constant 0 : i32
    %c0_i32_1 = arith.constant 0 : i32
    return %c0_i32, %c0_i32_0 : i32, i32
  }
  func.func @transform_10(%arg0: i32) -> (i32, i32) {
    %c0_i32 = arith.constant 0 : i32
    %c0_i32_0 = arith.constant 0 : i32
    %c0_i32_1 = arith.constant 0 : i32
    return %c0_i32, %c0_i32_0 : i32, i32
  }
  func.func @transform_11(%arg0: i32) -> (i32, i32) {
    %c0_i32 = arith.constant 0 : i32
    %c0_i32_0 = arith.constant 0 : i32
    %c0_i32_1 = arith.constant 0 : i32
    return %c0_i32, %c0_i32_0 : i32, i32
  }
  func.func @transform_12(%arg0: i32) -> (i32, i32) {
    %c0_i32 = arith.constant 0 : i32
    %c0_i32_0 = arith.constant 0 : i32
    %c0_i32_1 = arith.constant 0 : i32
    return %c0_i32, %c0_i32_0 : i32, i32
  }
  func.func @transform_13(%arg0: i32) -> (i32, i32) {
    %c0_i32 = arith.constant 0 : i32
    %c0_i32_0 = arith.constant 0 : i32
    %c0_i32_1 = arith.constant 0 : i32
    return %c0_i32, %c0_i32_0 : i32, i32
  }
  func.func @transform_14(%arg0: i32) -> (i32, i32) {
    %c0_i32 = arith.constant 0 : i32
    %c0_i32_0 = arith.constant 0 : i32
    %c0_i32_1 = arith.constant 0 : i32
    return %c0_i32, %c0_i32_0 : i32, i32
  }
  func.func @transform_15(%arg0: i32) -> (i32, i32) {
    %c0_i32 = arith.constant 0 : i32
    %c0_i32_0 = arith.constant 0 : i32
    %c0_i32_1 = arith.constant 0 : i32
    return %c0_i32, %c0_i32_0 : i32, i32
  }
  func.func @transform_16(%arg0: i32) -> (i32, i32) {
    %c0_i32 = arith.constant 0 : i32
    %c0_i32_0 = arith.constant 0 : i32
    %c0_i32_1 = arith.constant 0 : i32
    return %c0_i32, %c0_i32_0 : i32, i32
  }
  func.func @transform_17(%arg0: i32) -> (i32, i32) {
    %c0_i32 = arith.constant 0 : i32
    %c0_i32_0 = arith.constant 0 : i32
    %c0_i32_1 = arith.constant 0 : i32
    return %c0_i32, %c0_i32_0 : i32, i32
  }
  func.func @transform_18(%arg0: i32) -> (i32, i32) {
    %c0_i32 = arith.constant 0 : i32
    %c0_i32_0 = arith.constant 0 : i32
    %c0_i32_1 = arith.constant 0 : i32
    return %c0_i32, %c0_i32_0 : i32, i32
  }
  func.func @transform_19(%arg0: i32) -> (i32, i32) {
    %c0_i32 = arith.constant 0 : i32
    %c0_i32_0 = arith.constant 0 : i32
    %c0_i32_1 = arith.constant 0 : i32
    return %c0_i32, %c0_i32_0 : i32, i32
  }
  func.func @transform_20(%arg0: i32) -> (i32, i32) {
    %c0_i32 = arith.constant 0 : i32
    %c0_i32_0 = arith.constant 0 : i32
    %c0_i32_1 = arith.constant 0 : i32
    return %c0_i32, %c0_i32_0 : i32, i32
  }
  func.func @transform_21(%arg0: i32) -> (i32, i32) {
    %c0_i32 = arith.constant 0 : i32
    %c0_i32_0 = arith.constant 0 : i32
    %c0_i32_1 = arith.constant 0 : i32
    return %c0_i32, %c0_i32_0 : i32, i32
  }
  func.func @transform_22(%arg0: i32) -> (i32, i32) {
    %c0_i32 = arith.constant 0 : i32
    %c0_i32_0 = arith.constant 0 : i32
    %c0_i32_1 = arith.constant 0 : i32
    return %c0_i32, %c0_i32_0 : i32, i32
  }
  func.func @transform_23(%arg0: i32) -> (i32, i32) {
    %c0_i32 = arith.constant 0 : i32
    %c0_i32_0 = arith.constant 0 : i32
    %c0_i32_1 = arith.constant 0 : i32
    return %c0_i32, %c0_i32_0 : i32, i32
  }
  func.func @transform_24(%arg0: i32) -> (i32, i32) {
    %c0_i32 = arith.constant 0 : i32
    %c0_i32_0 = arith.constant 0 : i32
    %c0_i32_1 = arith.constant 0 : i32
    return %c0_i32, %c0_i32_0 : i32, i32
  }
  func.func @transform_25(%arg0: i32) -> (i32, i32) {
    %c0_i32 = arith.constant 0 : i32
    %c0_i32_0 = arith.constant 0 : i32
    %c0_i32_1 = arith.constant 0 : i32
    return %c0_i32, %c0_i32_0 : i32, i32
  }
  func.func @transform_26(%arg0: i32) -> (i32, i32) {
    %c0_i32 = arith.constant 0 : i32
    %c0_i32_0 = arith.constant 0 : i32
    %c0_i32_1 = arith.constant 0 : i32
    return %c0_i32, %c0_i32_0 : i32, i32
  }
  func.func @transform_27(%arg0: i32) -> (i32, i32) {
    %c0_i32 = arith.constant 0 : i32
    %c0_i32_0 = arith.constant 0 : i32
    %c0_i32_1 = arith.constant 0 : i32
    return %c0_i32, %c0_i32_0 : i32, i32
  }
  func.func @transform_28(%arg0: i32) -> (i32, i32) {
    %c0_i32 = arith.constant 0 : i32
    %c0_i32_0 = arith.constant 0 : i32
    %c0_i32_1 = arith.constant 0 : i32
    return %c0_i32, %c0_i32_0 : i32, i32
  }
  func.func @transform_29(%arg0: i32) -> (i32, i32) {
    %c0_i32 = arith.constant 0 : i32
    %c0_i32_0 = arith.constant 0 : i32
    %c0_i32_1 = arith.constant 0 : i32
    return %c0_i32, %c0_i32_0 : i32, i32
  }
  func.func @transform_30(%arg0: i32) -> (i32, i32) {
    %c0_i32 = arith.constant 0 : i32
    %c0_i32_0 = arith.constant 0 : i32
    %c0_i32_1 = arith.constant 0 : i32
    return %c0_i32, %c0_i32_0 : i32, i32
  }
}

</mosaic_0001>

<bundles_post_ra>
// kernel: local_encoder_back_forward.1
= control target key start
LH: loop header
LB: loop body
LE: loop exit
PB: predicated region body
PF: predicated region fallthrough
CT: control target
= control target key end

     0   :  { %s6671_s6 = smov 1   ;;  %s6672_s10 = smov 2   ;;  %s8303_s0 = inlined_call_operand.smem [shape: u32[31], index: -1, kind: input, shape index: {}] }
   0x1   :  { %s6777_s5 = sld [smem:[%s8303_s0]]   ;;  %s6673_s14 = smov 3  }
   0x2   :  { %s6782_s9 = sld [smem:[%s8303_s0 + %s6671_s6]]   ;;  %s6674_s18 = smov 4  }
   0x3   :  { %s6787_s13 = sld [smem:[%s8303_s0 + %s6672_s10]]   ;;  %s6675_s22 = smov 5  }
   0x4   :  { %s6792_s17 = sld [smem:[%s8303_s0 + %s6673_s14]]   ;;  %s6676_s26 = smov 6  }
   0x5   :  { %s6797_s21 = sld [smem:[%s8303_s0 + %s6674_s18]]   ;;  %s6677_s30 = smov 7  }
   0x6   :  { %s6802_s25 = sld [smem:[%s8303_s0 + %s6675_s22]]   ;;  %s6678_s4 = smov 8  }
   0x7   :  { %s6807_s29 = sld [smem:[%s8303_s0 + %s6676_s26]]   ;;  %s6679_s10 = smov 9  }
   0x8   :  { %s6812_s3 = sld [smem:[%s8303_s0 + %s6677_s30]]   ;;  %s6680_s15 = smov 10  }
   0x9   :  { %s6817_s8 = sld [smem:[%s8303_s0 + %s6678_s4]]   ;;  %s6681_s20 = smov 11  }
   0xa   :  { %s6822_s14 = sld [smem:[%s8303_s0 + %s6679_s10]]   ;;  %s6682_s26 = smov 12  }
   0xb   :  { %s6827_s19 = sld [smem:[%s8303_s0 + %s6680_s15]]   ;;  %s6683_s1 = smov 13  }
   0xc   :  { %8314 = sst [smem:[#allocation18_spill]] %s6802_s25  ;;  %s6684_s7 = smov 14  }
   0xd   :  { %s6832_s24 = sld [smem:[%s8303_s0 + %s6681_s20]]   ;;  %s6685_s15 = smov 15  }
   0xe   :  { %8315 = sst [smem:[#allocation19_spill]] %s6812_s3  ;;  %s6686_s22 = smov 16  }
   0xf   :  { %8316 = sst [smem:[#allocation20_spill]] %s6817_s8  ;;  %s6687_s28 = smov 17  }
  0x10   :  { %8317 = sst [smem:[#allocation21_spill]] %s6822_s14 }
  0x11   :  { %8318 = sst [smem:[#allocation22_spill]] %s6827_s19 }
  0x12   :  { %s6837_s30 = sld [smem:[%s8303_s0 + %s6682_s26]]  }
  0x13   :  { %8319 = sst [smem:[#allocation23_spill]] %s6832_s24 }
  0x14   :  { %s6842_s6 = sld [smem:[%s8303_s0 + %s6683_s1]]  }
  0x15   :  { %s6847_s12 = sld [smem:[%s8303_s0 + %s6684_s7]]   ;;  %s6688_s7 = smov 18  }
  0x16   :  { %s6852_s20 = sld [smem:[%s8303_s0 + %s6685_s15]]   ;;  %s6689_s15 = smov 19  }
  0x17   :  { %s6857_s27 = sld [smem:[%s8303_s0 + %s6686_s22]]   ;;  %s6690_s22 = smov 20  }
  0x18   :  { %8320 = sst [smem:[#allocation24_spill]] %s6837_s30 }
  0x19   :  { %s6862_s4 = sld [smem:[%s8303_s0 + %s6687_s28]]   ;;  %s6691_s28 = smov 21  }
  0x1a   :  { %8321 = sst [smem:[#allocation25_spill]] %s6842_s6 }
  0x1b   :  { %8322 = sst [smem:[#allocation26_spill]] %s6847_s12 }
  0x1c   :  { %8323 = sst [smem:[#allocation27_spill]] %s6852_s20 }
  0x1d   :  { %8324 = sst [smem:[#allocation28_spill]] %s6857_s27 }
  0x1e   :  { %s6867_s24 = sld [smem:[%s8303_s0 + %s6688_s7]]   ;;  %s6692_s7 = smov 22  }
  0x1f   :  { %s6872_s20 = sld [smem:[%s8303_s0 + %s6689_s15]]   ;;  %s6693_s15 = smov 23  }
  0x20   :  { %s6877_s27 = sld [smem:[%s8303_s0 + %s6690_s22]]   ;;  %s6694_s22 = smov 24  }
  0x21   :  { %s6882_s12 = sld [smem:[%s8303_s0 + %s6691_s28]]   ;;  %s6695_s28 = smov 25  }
  0x22   :  { %s6887_s6 = sld [smem:[%s8303_s0 + %s6692_s7]]   ;;  %s6696_s7 = smov 26  }
  0x23   :  { %s6892_s19 = sld [smem:[%s8303_s0 + %s6693_s15]]   ;;  %s6697_s15 = smov 27  }
  0x24   :  { %s6897_s30 = sld [smem:[%s8303_s0 + %s6694_s22]]   ;;  %s6698_s22 = smov 28  }
  0x25   :  { %s6902_s14 = sld [smem:[%s8303_s0 + %s6695_s28]]   ;;  %s6699_s28 = smov 29  }
  0x26   :  { %s6907_s25 = sld [smem:[%s8303_s0 + %s6696_s7]]   ;;  %s6700_s7 = smov 30  }
  0x27   :  { %s6917_s8 = sld [smem:[%s8303_s0 + %s6698_s22]]  }
  0x28   :  { %s6927_s3 = sld [smem:[%s8303_s0 + %s6700_s7]]  }
  0x29   :  { %8325 = sst [smem:[#allocation29_spill]] %s6892_s19 }
  0x2a   :  { %s6912_s19 = sld [smem:[%s8303_s0 + %s6697_s15]]  }
  0x2b   :  { %8326 = sst [smem:[#allocation30_spill]] %s6902_s14 }
  0x2c   :  { %s6922_s14 = sld [smem:[%s8303_s0 + %s6699_s28]]  }
  0x2d   :  { %66 = vsyncpa [#allocation4], 0 }
  0x2e   :  { %67 = vsyncpa [#allocation6], 0 }
  0x2f   :  { %68 = vsyncpa [#allocation9], 0 }
  0x30   :  { %69 = vsyncpa [#allocation12], 0  ;;  %s6701_s15 = smov [#allocation5]   ;;  %s6702_s18 = smov [#allocation8]  }
  0x31   :  { %s126_s16 = sshll.u32 %s6701_s15, 4  ;;  %s147_s22 = sshll.u32 %s6702_s18, 4  ;;  %s127_s16 = int_to_ptr.vmem [resolvable:$true] %s126_s16  ;;  %s6929_s22 = int_to_ptr.vmem [resolvable:$true] %s147_s22 }
  0x32   :  { %s6509_s23 = scalar_lea.hbm %s6877_s27, 128 }
  0x33   :  { %p6510_p0 = scmp.ne.s32.totalorder %s6877_s27, %s6509_s23  ;;  %p6513_p1 = scmp.lt.u32.totalorder %s6509_s23, %s6877_s27 }
  0x35   :  { %p6515_p2 = pnand %p6513_p1, %p6510_p0 }
  0x37   :  { %6518 = shalt.err (!%p6515_p2)
}
  0x38   :  { %s6519_s0 = scalar_lea.vmem %s127_s16, 128  ;;  %p6524_p4 = scmp.lt.s32.totalorder %s127_s16, %s127_s16 }
  0x39   :  { %p6520_p3 = scmp.ne.s32.totalorder %s127_s16, %s6519_s0  ;;  %p6525_p5 = scmp.lt.s32.totalorder %s6519_s0, %s6519_s0 }
  0x3b   :  { %p6526_p6 = por %p6525_p5, %p6524_p4 }
  0x3d   :  { %p6527_p7 = pnand %p6526_p6, %p6520_p3 }
  0x3f   :  { %6530 = shalt.err (!%p6527_p7)
}
  0x40   :  { %129 = dma.hbm_to_vmem [thread:$0]  %s6877_s27, 128, %s127_s16, [#allocation6]  }
  0x41   :  { %s6531_s26 = scalar_lea.hbm %s6887_s6, 8192 }
  0x42   :  { %p6532_p8 = scmp.ne.s32.totalorder %s6887_s6, %s6531_s26  ;;  %p6535_p9 = scmp.lt.u32.totalorder %s6531_s26, %s6887_s6 }
  0x44   :  { %p6537_p10 = pnand %p6535_p9, %p6532_p8 }
  0x46   :  { %6540 = shalt.err (!%p6537_p10)
}
  0x47   :  { %s6541_s28 = scalar_lea.vmem %s6929_s22, 8192  ;;  %p6546_p12 = scmp.lt.s32.totalorder %s6929_s22, %s6929_s22 }
  0x48   :  { %p6542_p11 = scmp.ne.s32.totalorder %s6929_s22, %s6541_s28  ;;  %p6547_p13 = scmp.lt.s32.totalorder %s6541_s28, %s6541_s28 }
  0x4a   :  { %p6548_p0 = por %p6547_p13, %p6546_p12 }
  0x4c   :  { %p6549_p1 = pnand %p6548_p0, %p6542_p11 }
  0x4e   :  { %6552 = shalt.err (!%p6549_p1)
}
  0x4f   :  { %s6703_s1 = smov 128   ;;  %s6704_s27 = smov 8  }
  0x50   :  { %153 = dma.hbm_to_vmem [thread:$0]  %s6887_s6, 8192, %s6929_s22, [#allocation9], %s6703_s1, %s6703_s1, %s6704_s27  }
  0x51   :  { %s6705_s2 = smov [#allocation11]   ;;  %s6706_s10 = smov [#allocation3]  }
  0x52   :  { %s175_s7 = sshll.u32 %s6705_s2, 4  ;;  %s109_s11 = sshll.u32 %s6706_s10, 4  ;;  %s176_s7 = int_to_ptr.vmem [resolvable:$true] %s175_s7  ;;  %s6947_s11 = int_to_ptr.vmem [resolvable:$true] %s109_s11 }
  0x53   :  { %s6553_s15 = scalar_lea.hbm %s6907_s25, 2304 }
  0x54   :  { %p6554_p2 = scmp.ne.s32.totalorder %s6907_s25, %s6553_s15  ;;  %p6557_p3 = scmp.lt.u32.totalorder %s6553_s15, %s6907_s25 }
  0x56   :  { %p6559_p4 = pnand %p6557_p3, %p6554_p2 }
  0x58   :  { %6562 = shalt.err (!%p6559_p4)
}
  0x59   :  { %s6563_s16 = scalar_lea.vmem %s176_s7, 2304  ;;  %p6568_p6 = scmp.lt.s32.totalorder %s176_s7, %s176_s7 }
  0x5a   :  { %p6564_p5 = scmp.ne.s32.totalorder %s176_s7, %s6563_s16  ;;  %p6569_p7 = scmp.lt.s32.totalorder %s6563_s16, %s6563_s16 }
  0x5c   :  { %p6570_p8 = por %p6569_p7, %p6568_p6 }
  0x5e   :  { %p6571_p9 = pnand %p6570_p8, %p6564_p5 }
  0x60   :  { %6574 = shalt.err (!%p6571_p9)
}
  0x61   :  { %181 = dma.hbm_to_vmem [thread:$0]  %s6907_s25, 2304, %s176_s7, [#allocation12], %s6703_s1, %s6703_s1, %s6704_s27  }
  0x62   :  { %s6575_s6 = scalar_lea.hbm %s6862_s4, 25088 }
  0x63   :  { %p6576_p10 = scmp.ne.s32.totalorder %s6862_s4, %s6575_s6  ;;  %p6579_p11 = scmp.lt.u32.totalorder %s6575_s6, %s6862_s4 }
  0x65   :  { %p6581_p12 = pnand %p6579_p11, %p6576_p10 }
  0x67   :  { %6584 = shalt.err (!%p6581_p12)
}
  0x68   :  { %s6585_s18 = scalar_lea.vmem %s6947_s11, 25088  ;;  %p6590_p0 = scmp.lt.s32.totalorder %s6947_s11, %s6947_s11 }
  0x69   :  { %p6586_p13 = scmp.ne.s32.totalorder %s6947_s11, %s6585_s18  ;;  %p6591_p1 = scmp.lt.s32.totalorder %s6585_s18, %s6585_s18 }
  0x6b   :  { %p6592_p2 = por %p6591_p1, %p6590_p0 }
  0x6d   :  { %p6593_p3 = pnand %p6592_p2, %p6586_p13 }
  0x6f   :  { %6596 = shalt.err (!%p6593_p3)
}
  0x70   :  { %s6707_s22 = smov 512   ;;  %s6708_s25 = smov 32  }
  0x71   :  { %115 = dma.hbm_to_vmem [thread:$0]  %s6862_s4, 25088, %s6947_s11, [#allocation4], %s6707_s22, %s6707_s22, %s6708_s25  }
  0x72   :  { %s6709_s23 = smov [#allocation7]   ;;  %s6710_s26 = smov [#allocation10]  }
  0x73   :  { %s135_s0 = sshll.u32 %s6709_s23, 4  ;;  %s161_s28 = sshll.u32 %s6710_s26, 4  ;;  %s136_s0 = int_to_ptr.vmem [resolvable:$true] %s135_s0  ;;  %s6966_s28 = int_to_ptr.vmem [resolvable:$true] %s161_s28 }
  0x74   :  { %s6597_s2 = scalar_lea.hbm %s6882_s12, 4608 }
  0x75   :  { %p6598_p4 = scmp.ne.s32.totalorder %s6882_s12, %s6597_s2  ;;  %p6601_p5 = scmp.lt.u32.totalorder %s6597_s2, %s6882_s12 }
  0x77   :  { %p6603_p6 = pnand %p6601_p5, %p6598_p4 }
  0x79   :  { %6606 = shalt.err (!%p6603_p6)
}
  0x7a   :  { %s6607_s7 = scalar_lea.vmem %s136_s0, 4608  ;;  %p6612_p8 = scmp.lt.s32.totalorder %s136_s0, %s136_s0 }
  0x7b   :  { %p6608_p7 = scmp.ne.s32.totalorder %s136_s0, %s6607_s7  ;;  %p6613_p9 = scmp.lt.s32.totalorder %s6607_s7, %s6607_s7 }
  0x7d   :  { %p6614_p10 = por %p6613_p9, %p6612_p8 }
  0x7f   :  { %p6615_p11 = pnand %p6614_p10, %p6608_p7 }
  0x81   :  { %6618 = shalt.err (!%p6615_p11)
}
  0x82   :  { %141 = dma.hbm_to_vmem [thread:$0]  %s6882_s12, 4608, %s136_s0, [#allocation6], %s6707_s22, %s6707_s22, %s6708_s25  }
  0x83   :  { %s6619_s4 = scalar_lea.hbm %s6897_s30, 2048 }
  0x84   :  { %p6620_p12 = scmp.ne.s32.totalorder %s6897_s30, %s6619_s4  ;;  %p6623_p13 = scmp.lt.u32.totalorder %s6619_s4, %s6897_s30 }
  0x86   :  { %p6625_p0 = pnand %p6623_p13, %p6620_p12 }
  0x88   :  { %6628 = shalt.err (!%p6625_p0)
}
  0x89   :  { %s6629_s10 = scalar_lea.vmem %s6966_s28, 2048  ;;  %p6634_p2 = scmp.lt.s32.totalorder %s6966_s28, %s6966_s28 }
  0x8a   :  { %p6630_p1 = scmp.ne.s32.totalorder %s6966_s28, %s6629_s10  ;;  %p6635_p3 = scmp.lt.s32.totalorder %s6629_s10, %s6629_s10 }
  0x8c   :  { %p6636_p4 = por %p6635_p3, %p6634_p2 }
  0x8e   :  { %p6637_p5 = pnand %p6636_p4, %p6630_p1 }
  0x90   :  { %6640 = shalt.err (!%p6637_p5)
}
  0x91   :  { %167 = dma.hbm_to_vmem [thread:$0]  %s6897_s30, 2048, %s6966_s28, [#allocation9], %s6703_s1, %s6703_s1, %s6704_s27  }
  0x92   :  { %s6711_s12 = smov [#allocation13]   ;;  %s6641_s15 = scalar_lea.hbm %s6917_s8, 2048 }
  0x93   :  { %s189_s11 = sshll.u32 %s6711_s12, 4  ;;  %p6642_p6 = scmp.ne.s32.totalorder %s6917_s8, %s6641_s15  ;;  %s190_s11 = int_to_ptr.vmem [resolvable:$true] %s189_s11 }
  0x94   :  { %p6645_p7 = scmp.lt.u32.totalorder %s6641_s15, %s6917_s8 }
  0x96   :  { %p6647_p8 = pnand %p6645_p7, %p6642_p6 }
  0x98   :  { %6650 = shalt.err (!%p6647_p8)
}
  0x99   :  { %s6651_s16 = scalar_lea.vmem %s190_s11, 2048  ;;  %p6656_p10 = scmp.lt.s32.totalorder %s190_s11, %s190_s11 }
  0x9a   :  { %p6652_p9 = scmp.ne.s32.totalorder %s190_s11, %s6651_s16  ;;  %p6657_p11 = scmp.lt.s32.totalorder %s6651_s16, %s6651_s16 }
  0x9c   :  { %p6658_p12 = por %p6657_p11, %p6656_p10 }
  0x9e   :  { %p6659_p13 = pnand %p6658_p12, %p6652_p9 }
  0xa0   :  { %6662 = shalt.err (!%p6659_p13)
}
  0xa1   :  { %195 = dma.hbm_to_vmem [thread:$0]  %s6917_s8, 2048, %s190_s11, [#allocation12], %s6703_s1, %s6703_s1, %s6704_s27  }
  0xa2   :  { %6663 = dma.done.wait [#allocation4], 25088  }
  0xa3   :  { %6664 = vsyncadd [#allocation4], 4294942208 }
  0xa4   :  { %6665 = dma.done.wait [#allocation6], 4736  }
  0xa5   :  { %6666 = vsyncadd [#allocation6], 4294962560 }
  0xa6   :  { %6667 = dma.done.wait [#allocation9], 10240  }
  0xa7   :  { %6668 = vsyncadd [#allocation9], 4294957056 }
  0xa8   :  { %6669 = dma.done.wait [#allocation12], 4352  }
  0xa9   :  { %6670 = vsyncadd [#allocation12], 4294962944  ;;  %v6993_v0 = vld [vmem:[%s6777_s5 + $0x10] sm:$0xff]  ;;  %v6996_v1 = vld [vmem:[%s6777_s5] sm:$0xff]  ;;  %s6712_s30 = smov 51   ;;  %s6713_s8 = smov 50   ;;  %v231_v4 = vlaneseq }
  0xaa   :  { %227 = vrot.lane.b32.xlu1 %v6993_v0, %s6712_s30  ;;  %223 = vrot.lane.b32.xlu0 %v6996_v1, %s6712_s30  ;;  %v7001_v2 = vld [vmem:[%s6777_s5 + $0x18] sm:$0xff]  ;;  %v7004_v3 = vld [vmem:[%s6777_s5 + $0x8] sm:$0xff]  ;;  %s6714_s1 = smov 49   ;;  %s6715_s6 = smov 48   ;;  %v238_v17 = vld [vmem:[#allocation3] sm:$0xff] }
  0xab   :  { %s6716_s18 = smov 47   ;;  %s6717_s22 = smov 46   ;;  %v7067_v7 = vand.u32 127, %v231_v4  ;;  %v239_v11 = vld [vmem:[#allocation3 + $0x8] sm:$0xff]  ;;  %v241_v19 = vld [vmem:[#allocation3 + $0x18] sm:$0xff]  ;;  %v240_v23 = vld [vmem:[#allocation3 + $0x10] sm:$0xff] }
  0xac   :  { %s6718_s23 = smov 45   ;;  %s6719_s0 = smov 35   ;;  %v264_v12 = vld [vmem:[#allocation3 + $0x28] sm:$0xff]  ;;  %v263_v24 = vld [vmem:[#allocation3 + $0x20] sm:$0xff]  ;;  %v266_v25 = vld [vmem:[#allocation3 + $0x38] sm:$0xff] }
  0xad   :  { %s6720_s26 = smov 34   ;;  %s6721_s28 = smov 33   ;;  %vm233_vm0 = vcmp.lt.s32.totalorder %v7067_v7, 51  ;;  %vm258_vm1 = vcmp.lt.s32.totalorder %v7067_v7, 50  ;;  %v265_v26 = vld [vmem:[#allocation3 + $0x30] sm:$0xff]  ;;  %vm283_vm2 = vcmp.lt.s32.totalorder %v7067_v7, 49 }
  0xae   :  { %229 = vrot.lane.b32.xlu1 %v7001_v2, %s6712_s30  ;;  %225 = vrot.lane.b32.xlu0 %v7004_v3, %s6712_s30  ;;  %s6722_s2 = smov 31   ;;  %s6723_s7 = smov 30   ;;  %vm308_vm3 = vcmp.lt.s32.totalorder %v7067_v7, 48  ;;  %v289_v46 = vld [vmem:[#allocation3 + $0x48] sm:$0xff]  ;;  %v288_v51 = vld [vmem:[#allocation3 + $0x40] sm:$0xff]  ;;  %v290_v53 = vld [vmem:[#allocation3 + $0x50] sm:$0xff] }
  0xaf   :  { %s6724_s4 = smov 29   ;;  %s6726_s10 = smov 18   ;;  %v314_v48 = vld [vmem:[#allocation3 + $0x68] sm:$0xff]  ;;  %v291_v57 = vld [vmem:[#allocation3 + $0x58] sm:$0xff]  ;;  %v313_v60 = vld [vmem:[#allocation3 + $0x60] sm:$0xff]  ;;  %vm333_vm4 = vcmp.lt.s32.totalorder %v7067_v7, 47 }
  0xb0   :  { %s6727_s12 = smov 17   ;;  %s6728_s11 = smov 16   ;;  %v315_v61 = vld [vmem:[#allocation3 + $0x70] sm:$0xff]  ;;  %v316_v62 = vld [vmem:[#allocation3 + $0x78] sm:$0xff]  ;;  %vm358_vm5 = vcmp.lt.s32.totalorder %v7067_v7, 46  ;;  %vm383_vm6 = vcmp.lt.s32.totalorder %v7067_v7, 45 }
  0xb1   :  { %s6729_s15 = smov 15   ;;  %s6730_s16 = smov 14   ;;  %vm408_vm7 = vcmp.lt.s32.totalorder %v7067_v7, 35  ;;  %vm433_vm8 = vcmp.lt.s32.totalorder %v7067_v7, 34  ;;  %vm458_vm9 = vcmp.lt.s32.totalorder %v7067_v7, 33  ;;  %vm483_vm10 = vcmp.lt.s32.totalorder %v7067_v7, 32 }
  0xb2   :  { %252 = vrot.lane.b32.xlu1 %v7004_v3, %s6713_s8  ;;  %250 = vrot.lane.b32.xlu0 %v6996_v1, %s6713_s8  ;;  %s6731_s30 = smov 13   ;;  %vm508_vm11 = vcmp.lt.s32.totalorder %v7067_v7, 31  ;;  %vm533_vm12 = vcmp.lt.s32.totalorder %v7067_v7, 30  ;;  %vm558_vm13 = vcmp.lt.s32.totalorder %v7067_v7, 29  ;;  %vm583_vm14 = vcmp.lt.s32.totalorder %v7067_v7, 19 }
  0xb3   :  { %vm608_vm15 = vcmp.lt.s32.totalorder %v7067_v7, 18 }
  0xb6   :  { %256 = vrot.lane.b32.xlu1 %v7001_v2, %s6713_s8  ;;  %254 = vrot.lane.b32.xlu0 %v6993_v0, %s6713_s8  ;;  %s6732_s8 = smov 3  }
  0xba   :  { %277 = vrot.lane.b32.xlu1 %v7004_v3, %s6714_s1  ;;  %275 = vrot.lane.b32.xlu0 %v6996_v1, %s6714_s1 }
  0xbe   :  { %281 = vrot.lane.b32.xlu1 %v7001_v2, %s6714_s1  ;;  %279 = vrot.lane.b32.xlu0 %v6993_v0, %s6714_s1  ;;  %s6733_s1 = smov 2  }
  0xc2   :  { %302 = vrot.lane.b32.xlu1 %v7004_v3, %s6715_s6  ;;  %300 = vrot.lane.b32.xlu0 %v6996_v1, %s6715_s6 }
  0xc6   :  { %306 = vrot.lane.b32.xlu1 %v7001_v2, %s6715_s6  ;;  %304 = vrot.lane.b32.xlu0 %v6993_v0, %s6715_s6  ;;  %s6734_s6 = smov 1  }
  0xca   :  { %327 = vrot.lane.b32.xlu1 %v7004_v3, %s6716_s18  ;;  %325 = vrot.lane.b32.xlu0 %v6996_v1, %s6716_s18 }
  0xce   :  { %331 = vrot.lane.b32.xlu1 %v7001_v2, %s6716_s18  ;;  %329 = vrot.lane.b32.xlu0 %v6993_v0, %s6716_s18  ;;  %s6735_s18 = smov 127  }
  0xd2   :  { %352 = vrot.lane.b32.xlu1 %v7004_v3, %s6717_s22  ;;  %350 = vrot.lane.b32.xlu0 %v6996_v1, %s6717_s22 }
  0xd6   :  { %356 = vrot.lane.b32.xlu1 %v7001_v2, %s6717_s22  ;;  %354 = vrot.lane.b32.xlu0 %v6993_v0, %s6717_s22  ;;  %s6736_s22 = smov 126  }
  0xda   :  { %377 = vrot.lane.b32.xlu1 %v7004_v3, %s6718_s23  ;;  %375 = vrot.lane.b32.xlu0 %v6996_v1, %s6718_s23 }
  0xde   :  { %381 = vrot.lane.b32.xlu1 %v7001_v2, %s6718_s23  ;;  %379 = vrot.lane.b32.xlu0 %v6993_v0, %s6718_s23  ;;  %s6737_s23 = smov 125  }
  0xe2   :  { %402 = vrot.lane.b32.xlu1 %v7004_v3, %s6719_s0  ;;  %400 = vrot.lane.b32.xlu0 %v6996_v1, %s6719_s0 }
  0xe6   :  { %406 = vrot.lane.b32.xlu1 %v7001_v2, %s6719_s0  ;;  %404 = vrot.lane.b32.xlu0 %v6993_v0, %s6719_s0  ;;  %s6738_s0 = smov 115  }
  0xea   :  { %427 = vrot.lane.b32.xlu1 %v7004_v3, %s6720_s26  ;;  %425 = vrot.lane.b32.xlu0 %v6996_v1, %s6720_s26 }
  0xee   :  { %431 = vrot.lane.b32.xlu1 %v7001_v2, %s6720_s26  ;;  %429 = vrot.lane.b32.xlu0 %v6993_v0, %s6720_s26  ;;  %s6739_s26 = smov 114  }
  0xf2   :  { %452 = vrot.lane.b32.xlu1 %v7004_v3, %s6721_s28  ;;  %450 = vrot.lane.b32.xlu0 %v6996_v1, %s6721_s28 }
  0xf6   :  { %456 = vrot.lane.b32.xlu1 %v7001_v2, %s6721_s28  ;;  %454 = vrot.lane.b32.xlu0 %v6993_v0, %s6721_s28  ;;  %s6740_s28 = smov 113  }
  0xfa   :  { %477 = vrot.lane.b32.xlu1 %v7004_v3, %s6708_s25  ;;  %475 = vrot.lane.b32.xlu0 %v6996_v1, %s6708_s25 }
  0xfe   :  { %481 = vrot.lane.b32.xlu1 %v7001_v2, %s6708_s25  ;;  %479 = vrot.lane.b32.xlu0 %v6993_v0, %s6708_s25  ;;  %s6725_s25 = smov 19  }
 0x102   :  { %502 = vrot.lane.b32.xlu1 %v7004_v3, %s6722_s2  ;;  %500 = vrot.lane.b32.xlu0 %v6996_v1, %s6722_s2 }
 0x106   :  { %506 = vrot.lane.b32.xlu1 %v7001_v2, %s6722_s2  ;;  %504 = vrot.lane.b32.xlu0 %v6993_v0, %s6722_s2  ;;  %s6741_s2 = smov 112  }
 0x10a   :  { %527 = vrot.lane.b32.xlu1 %v7004_v3, %s6723_s7  ;;  %525 = vrot.lane.b32.xlu0 %v6996_v1, %s6723_s7 }
 0x10e   :  { %531 = vrot.lane.b32.xlu1 %v7001_v2, %s6723_s7  ;;  %529 = vrot.lane.b32.xlu0 %v6993_v0, %s6723_s7  ;;  %s6742_s7 = smov 111  }
 0x112   :  { %552 = vrot.lane.b32.xlu1 %v7004_v3, %s6724_s4  ;;  %550 = vrot.lane.b32.xlu0 %v6996_v1, %s6724_s4 }
 0x116   :  { %556 = vrot.lane.b32.xlu1 %v7001_v2, %s6724_s4  ;;  %554 = vrot.lane.b32.xlu0 %v6993_v0, %s6724_s4  ;;  %s6743_s4 = smov 110  }
 0x11a   :  { %577 = vrot.lane.b32.xlu1 %v7004_v3, %s6725_s25  ;;  %575 = vrot.lane.b32.xlu0 %v6996_v1, %s6725_s25 }
 0x11c   :  { %v228_v5 = vpop.permute.xlu1 %227  ;;  %v224_v6 = vpop.permute.xlu0 %223 }
 0x11e   :  { %581 = vrot.lane.b32.xlu1 %v7001_v2, %s6725_s25  ;;  %579 = vrot.lane.b32.xlu0 %v6993_v0, %s6725_s25  ;;  %s6745_s25 = smov 99  }
 0x120   :  { %v230_v8 = vpop.permute.xlu1 %229  ;;  %v226_v9 = vpop.permute.xlu0 %225 }
 0x121   :  { %v236_v10 = vsel %vm233_vm0, %v224_v6, %v226_v9  ;;  %v237_v15 = vsel %vm233_vm0, %v230_v8, %v224_v6  ;;  %v234_v18 = vsel %vm233_vm0, %v228_v5, %v230_v8  ;;  %v235_v20 = vsel %vm233_vm0, %v226_v9, %v228_v5 }
 0x122   :  { %602 = vrot.lane.b32.xlu1 %v7004_v3, %s6726_s10  ;;  %600 = vrot.lane.b32.xlu0 %v6996_v1, %s6726_s10  ;;  %v243_v21 = vmul.f32 %v239_v11, %v236_v10  ;;  %v242_v30 = vmul.f32 %v238_v17, %v237_v15  ;;  %v245_v31 = vmul.f32 %v241_v19, %v234_v18  ;;  %vm633_vm0 = vcmp.lt.s32.totalorder %v7067_v7, 17 }
 0x123   :  { %v244_v35 = vmul.f32 %v240_v23, %v235_v20 }
 0x124   :  { %v253_v13 = vpop.permute.xlu1 %252  ;;  %v251_v14 = vpop.permute.xlu0 %250 }
 0x125   :  { %v261_v16 = vsel %vm258_vm1, %v251_v14, %v253_v13 }
 0x126   :  { %606 = vrot.lane.b32.xlu1 %v7001_v2, %s6726_s10  ;;  %604 = vrot.lane.b32.xlu0 %v6993_v0, %s6726_s10  ;;  %v268_v22 = vmul.f32 %v264_v12, %v261_v16  ;;  %s6746_s10 = smov 98  }
 0x128   :  { %v257_v27 = vpop.permute.xlu1 %256  ;;  %v255_v28 = vpop.permute.xlu0 %254  ;;  %v5732_v29 = vpack.c.bf16 %v268_v22, %v243_v21 }
 0x129   :  { %v262_v32 = vsel %vm258_vm1, %v257_v27, %v251_v14  ;;  %v260_v33 = vsel %vm258_vm1, %v253_v13, %v255_v28  ;;  %v259_v34 = vsel %vm258_vm1, %v255_v28, %v257_v27  ;;  %vm658_vm1 = vcmp.lt.s32.totalorder %v7067_v7, 16 }
 0x12a   :  { %627 = vrot.lane.b32.xlu1 %v7004_v3, %s6727_s12  ;;  %625 = vrot.lane.b32.xlu0 %v6996_v1, %s6727_s12  ;;  %v267_v36 = vmul.f32 %v263_v24, %v262_v32  ;;  %v270_v37 = vmul.f32 %v266_v25, %v259_v34  ;;  %v269_v38 = vmul.f32 %v265_v26, %v260_v33  ;;  %v339_v24 = vld [vmem:[#allocation3 + $0x88] sm:$0xff] }
 0x12b   :  { %5733 = vmatprep.subr.bf16.mxu0 %v5732_v29  ;;  %v364_v26 = vld [vmem:[#allocation3 + $0xa8] sm:$0xff]  ;;  %v338_v29 = vld [vmem:[#allocation3 + $0x80] sm:$0xff] }
 0x12c   :  { %v278_v39 = vpop.permute.xlu1 %277  ;;  %v276_v40 = vpop.permute.xlu0 %275  ;;  %v5734_v41 = vpack.c.bf16 %v267_v36, %v242_v30  ;;  %v5828_v42 = vpack.c.bf16 %v270_v37, %v245_v31  ;;  %v5830_v43 = vpack.c.bf16 %v269_v38, %v244_v35  ;;  %v340_v31 = vld [vmem:[#allocation3 + $0x90] sm:$0xff]  ;;  %v341_v35 = vld [vmem:[#allocation3 + $0x98] sm:$0xff]  ;;  %v363_v38 = vld [vmem:[#allocation3 + $0xa0] sm:$0xff] }
 0x12d   :  { %v286_v47 = vsel %vm283_vm2, %v276_v40, %v278_v39 }
 0x12e   :  { %631 = vrot.lane.b32.xlu1 %v7001_v2, %s6727_s12  ;;  %629 = vrot.lane.b32.xlu0 %v6993_v0, %s6727_s12  ;;  %v293_v56 = vmul.f32 %v289_v46, %v286_v47 }
 0x12f   :  { %5735 = vmatpush1.bf16.msra.mxu0 %v5734_v41  ;;  %5829 = vmatprep.subr.bf16.mxu1 %v5828_v42 }
 0x130   :  { %5831 = vmatpush1.bf16.msra.mxu1 %v5830_v43  ;;  %v282_v44 = vpop.permute.xlu1 %281  ;;  %v280_v45 = vpop.permute.xlu0 %279 }
 0x131   :  { %v287_v52 = vsel %vm283_vm2, %v282_v44, %v276_v40  ;;  %v285_v54 = vsel %vm283_vm2, %v278_v39, %v280_v45  ;;  %v284_v58 = vsel %vm283_vm2, %v280_v45, %v282_v44  ;;  %v365_v39 = vld [vmem:[#allocation3 + $0xb0] sm:$0xff]  ;;  %v366_v40 = vld [vmem:[#allocation3 + $0xb8] sm:$0xff]  ;;  %vm683_vm2 = vcmp.lt.s32.totalorder %v7067_v7, 15 }
 0x132   :  { %652 = vrot.lane.b32.xlu1 %v7004_v3, %s6728_s11  ;;  %650 = vrot.lane.b32.xlu0 %v6996_v1, %s6728_s11  ;;  %v292_v63 = vmul.f32 %v288_v51, %v287_v52  ;;  %v294_v5 = vmul.f32 %v290_v53, %v285_v54  ;;  %v295_v10 = vmul.f32 %v291_v57, %v284_v58 }
 0x134   :  { %v303_v49 = vpop.permute.xlu1 %302  ;;  %v301_v50 = vpop.permute.xlu0 %300 }
 0x135   :  { %v311_v55 = vsel %vm308_vm3, %v301_v50, %v303_v49 }
 0x136   :  { %v318_v59 = vmul.f32 %v314_v48, %v311_v55  ;;  %656 = vrot.lane.b32.xlu1 %v7001_v2, %s6728_s11  ;;  %654 = vrot.lane.b32.xlu0 %v6993_v0, %s6728_s11 }
 0x138   :  { %v307_v6 = vpop.permute.xlu1 %306  ;;  %v305_v8 = vpop.permute.xlu0 %304  ;;  %v5736_v9 = vpack.c.bf16 %v318_v59, %v293_v56 }
 0x139   :  { %v312_v11 = vsel %vm308_vm3, %v307_v6, %v301_v50  ;;  %v309_v12 = vsel %vm308_vm3, %v305_v8, %v307_v6  ;;  %v310_v13 = vsel %vm308_vm3, %v303_v49, %v305_v8  ;;  %v388_v6 = vld [vmem:[#allocation3 + $0xc0] sm:$0xff]  ;;  %vm708_vm3 = vcmp.lt.s32.totalorder %v7067_v7, 14 }
 0x13a   :  { %v317_v14 = vmul.f32 %v313_v60, %v312_v11  ;;  %v319_v15 = vmul.f32 %v315_v61, %v310_v13  ;;  %v320_v16 = vmul.f32 %v316_v62, %v309_v12  ;;  %677 = vrot.lane.b32.xlu1 %v7004_v3, %s6729_s15  ;;  %675 = vrot.lane.b32.xlu0 %v6996_v1, %s6729_s15  ;;  %v389_v60 = vld [vmem:[#allocation3 + $0xc8] sm:$0xff]  ;;  %v391_v13 = vld [vmem:[#allocation3 + $0xd8] sm:$0xff] }
 0x13b   :  { %5737 = vmatprep.subr.bf16.mxu0 %v5736_v9  ;;  %v414_v62 = vld [vmem:[#allocation3 + $0xe8] sm:$0xff]  ;;  %v390_v9 = vld [vmem:[#allocation3 + $0xd0] sm:$0xff] }
 0x13c   :  { %v328_v17 = vpop.permute.xlu1 %327  ;;  %v326_v18 = vpop.permute.xlu0 %325  ;;  %v5738_v19 = vpack.c.bf16 %v317_v14, %v292_v63  ;;  %v5832_v20 = vpack.c.bf16 %v320_v16, %v295_v10  ;;  %v5834_v21 = vpack.c.bf16 %v319_v15, %v294_v5  ;;  %v413_v16 = vld [vmem:[#allocation3 + $0xe0] sm:$0xff] }
 0x13d   :  { %v336_v25 = vsel %vm333_vm4, %v326_v18, %v328_v17 }
 0x13e   :  { %681 = vrot.lane.b32.xlu1 %v7001_v2, %s6729_s15  ;;  %679 = vrot.lane.b32.xlu0 %v6993_v0, %s6729_s15  ;;  %v343_v34 = vmul.f32 %v339_v24, %v336_v25 }
 0x13f   :  { %5739 = vmatpush1.bf16.msra.mxu0 %v5738_v19  ;;  %5833 = vmatprep.subr.bf16.mxu1 %v5832_v20 }
 0x140   :  { %5835 = vmatpush1.bf16.msra.mxu1 %v5834_v21  ;;  %v332_v22 = vpop.permute.xlu1 %331  ;;  %v330_v23 = vpop.permute.xlu0 %329 }
 0x141   :  { %v337_v30 = vsel %vm333_vm4, %v332_v22, %v326_v18  ;;  %v335_v32 = vsel %vm333_vm4, %v328_v17, %v330_v23  ;;  %v334_v36 = vsel %vm333_vm4, %v330_v23, %v332_v22  ;;  %v415_v17 = vld [vmem:[#allocation3 + $0xf0] sm:$0xff]  ;;  %v416_v18 = vld [vmem:[#allocation3 + $0xf8] sm:$0xff]  ;;  %vm733_vm4 = vcmp.lt.s32.totalorder %v7067_v7, 13 }
 0x142   :  { %702 = vrot.lane.b32.xlu1 %v7004_v3, %s6730_s16  ;;  %700 = vrot.lane.b32.xlu0 %v6996_v1, %s6730_s16  ;;  %v342_v41 = vmul.f32 %v338_v29, %v337_v30  ;;  %v344_v42 = vmul.f32 %v340_v31, %v335_v32  ;;  %v345_v46 = vmul.f32 %v341_v35, %v334_v36 }
 0x144   :  { %v353_v27 = vpop.permute.xlu1 %352  ;;  %v351_v28 = vpop.permute.xlu0 %350 }
 0x145   :  { %v361_v33 = vsel %vm358_vm5, %v351_v28, %v353_v27 }
 0x146   :  { %v368_v37 = vmul.f32 %v364_v26, %v361_v33  ;;  %706 = vrot.lane.b32.xlu1 %v7001_v2, %s6730_s16  ;;  %704 = vrot.lane.b32.xlu0 %v6993_v0, %s6730_s16  ;;  %s6747_s16 = smov 97  }
 0x148   :  { %v357_v43 = vpop.permute.xlu1 %356  ;;  %v355_v44 = vpop.permute.xlu0 %354  ;;  %v5740_v45 = vpack.c.bf16 %v368_v37, %v343_v34 }
 0x149   :  { %v362_v47 = vsel %vm358_vm5, %v357_v43, %v351_v28  ;;  %v359_v48 = vsel %vm358_vm5, %v355_v44, %v357_v43  ;;  %v360_v49 = vsel %vm358_vm5, %v353_v27, %v355_v44  ;;  %v438_v43 = vld [vmem:[#allocation3 + $0x100] sm:$0xff]  ;;  %vm758_vm5 = vcmp.lt.s32.totalorder %v7067_v7, 3 }
 0x14a   :  { %v367_v50 = vmul.f32 %v363_v38, %v362_v47  ;;  %v369_v51 = vmul.f32 %v365_v39, %v360_v49  ;;  %v370_v52 = vmul.f32 %v366_v40, %v359_v48  ;;  %727 = vrot.lane.b32.xlu1 %v7004_v3, %s6731_s30  ;;  %725 = vrot.lane.b32.xlu0 %v6996_v1, %s6731_s30  ;;  %v439_v38 = vld [vmem:[#allocation3 + $0x108] sm:$0xff]  ;;  %v441_v49 = vld [vmem:[#allocation3 + $0x118] sm:$0xff] }
 0x14b   :  { %5741 = vmatprep.subr.bf16.mxu0 %v5740_v45  ;;  %v464_v40 = vld [vmem:[#allocation3 + $0x128] sm:$0xff]  ;;  %v440_v45 = vld [vmem:[#allocation3 + $0x110] sm:$0xff] }
 0x14c   :  { %v378_v53 = vpop.permute.xlu1 %377  ;;  %v376_v54 = vpop.permute.xlu0 %375  ;;  %v5742_v55 = vpack.c.bf16 %v367_v50, %v342_v41  ;;  %v5836_v56 = vpack.c.bf16 %v370_v52, %v345_v46  ;;  %v5838_v57 = vpack.c.bf16 %v369_v51, %v344_v42  ;;  %v463_v52 = vld [vmem:[#allocation3 + $0x120] sm:$0xff] }
 0x14d   :  { %v386_v61 = vsel %vm383_vm6, %v376_v54, %v378_v53 }
 0x14e   :  { %731 = vrot.lane.b32.xlu1 %v7001_v2, %s6731_s30  ;;  %729 = vrot.lane.b32.xlu0 %v6993_v0, %s6731_s30  ;;  %v393_v12 = vmul.f32 %v389_v60, %v386_v61  ;;  %s6748_s30 = smov 96  }
 0x14f   :  { %5743 = vmatpush1.bf16.msra.mxu0 %v5742_v55  ;;  %5837 = vmatprep.subr.bf16.mxu1 %v5836_v56 }
 0x150   :  { %5839 = vmatpush1.bf16.msra.mxu1 %v5838_v57  ;;  %v382_v58 = vpop.permute.xlu1 %381  ;;  %v380_v59 = vpop.permute.xlu0 %379 }
 0x151   :  { %v387_v8 = vsel %vm383_vm6, %v382_v58, %v376_v54  ;;  %v385_v10 = vsel %vm383_vm6, %v378_v53, %v380_v59  ;;  %v384_v14 = vsel %vm383_vm6, %v380_v59, %v382_v58  ;;  %v465_v53 = vld [vmem:[#allocation3 + $0x130] sm:$0xff]  ;;  %v466_v54 = vld [vmem:[#allocation3 + $0x138] sm:$0xff]  ;;  %vm783_vm6 = vcmp.lt.s32.totalorder %v7067_v7, 2 }
 0x152   :  { %752 = vrot.lane.b32.xlu1 %v7004_v3, %s6732_s8  ;;  %750 = vrot.lane.b32.xlu0 %v6996_v1, %s6732_s8  ;;  %v392_v19 = vmul.f32 %v388_v6, %v387_v8  ;;  %v394_v20 = vmul.f32 %v390_v9, %v385_v10  ;;  %v395_v24 = vmul.f32 %v391_v13, %v384_v14 }
 0x154   :  { %v403_v63 = vpop.permute.xlu1 %402  ;;  %v401_v5 = vpop.permute.xlu0 %400 }
 0x155   :  { %v411_v11 = vsel %vm408_vm7, %v401_v5, %v403_v63 }
 0x156   :  { %v418_v15 = vmul.f32 %v414_v62, %v411_v11  ;;  %756 = vrot.lane.b32.xlu1 %v7001_v2, %s6732_s8  ;;  %754 = vrot.lane.b32.xlu0 %v6993_v0, %s6732_s8  ;;  %s6749_s8 = smov 95  }
 0x158   :  { %v407_v21 = vpop.permute.xlu1 %406  ;;  %v405_v22 = vpop.permute.xlu0 %404  ;;  %v5744_v23 = vpack.c.bf16 %v418_v15, %v393_v12 }
 0x159   :  { %v412_v25 = vsel %vm408_vm7, %v407_v21, %v401_v5  ;;  %v409_v26 = vsel %vm408_vm7, %v405_v22, %v407_v21  ;;  %v410_v27 = vsel %vm408_vm7, %v403_v63, %v405_v22  ;;  %v488_v21 = vld [vmem:[#allocation3 + $0x140] sm:$0xff]  ;;  %vm808_vm7 = vcmp.lt.s32.totalorder %v7067_v7, 1 }
 0x15a   :  { %v417_v28 = vmul.f32 %v413_v16, %v412_v25  ;;  %v419_v29 = vmul.f32 %v415_v17, %v410_v27  ;;  %v420_v30 = vmul.f32 %v416_v18, %v409_v26  ;;  %777 = vrot.lane.b32.xlu1 %v7004_v3, %s6733_s1  ;;  %775 = vrot.lane.b32.xlu0 %v6996_v1, %s6733_s1  ;;  %v489_v16 = vld [vmem:[#allocation3 + $0x148] sm:$0xff]  ;;  %v491_v27 = vld [vmem:[#allocation3 + $0x158] sm:$0xff] }
 0x15b   :  { %5745 = vmatprep.subr.bf16.mxu0 %v5744_v23  ;;  %v514_v18 = vld [vmem:[#allocation3 + $0x168] sm:$0xff]  ;;  %v490_v23 = vld [vmem:[#allocation3 + $0x150] sm:$0xff] }
 0x15c   :  { %v428_v31 = vpop.permute.xlu1 %427  ;;  %v426_v32 = vpop.permute.xlu0 %425  ;;  %v5746_v33 = vpack.c.bf16 %v417_v28, %v392_v19  ;;  %v5840_v34 = vpack.c.bf16 %v420_v30, %v395_v24  ;;  %v5842_v35 = vpack.c.bf16 %v419_v29, %v394_v20  ;;  %v513_v30 = vld [vmem:[#allocation3 + $0x160] sm:$0xff] }
 0x15d   :  { %v436_v39 = vsel %vm433_vm8, %v426_v32, %v428_v31 }
 0x15e   :  { %781 = vrot.lane.b32.xlu1 %v7001_v2, %s6733_s1  ;;  %779 = vrot.lane.b32.xlu0 %v6993_v0, %s6733_s1  ;;  %v443_v48 = vmul.f32 %v439_v38, %v436_v39  ;;  %s6750_s1 = smov 94  }
 0x15f   :  { %5747 = vmatpush1.bf16.msra.mxu0 %v5746_v33  ;;  %5841 = vmatprep.subr.bf16.mxu1 %v5840_v34 }
 0x160   :  { %5843 = vmatpush1.bf16.msra.mxu1 %v5842_v35  ;;  %v432_v36 = vpop.permute.xlu1 %431  ;;  %v430_v37 = vpop.permute.xlu0 %429 }
 0x161   :  { %v437_v44 = vsel %vm433_vm8, %v432_v36, %v426_v32  ;;  %v435_v46 = vsel %vm433_vm8, %v428_v31, %v430_v37  ;;  %v434_v50 = vsel %vm433_vm8, %v430_v37, %v432_v36  ;;  %v515_v31 = vld [vmem:[#allocation3 + $0x170] sm:$0xff]  ;;  %v516_v32 = vld [vmem:[#allocation3 + $0x178] sm:$0xff]  ;;  %vm837_vm8 = vcmp.lt.s32.totalorder %v7067_v7, 127 }
 0x162   :  { %802 = vrot.lane.b32.xlu1 %v7004_v3, %s6734_s6  ;;  %800 = vrot.lane.b32.xlu0 %v6996_v1, %s6734_s6  ;;  %v442_v55 = vmul.f32 %v438_v43, %v437_v44  ;;  %v444_v56 = vmul.f32 %v440_v45, %v435_v46  ;;  %v445_v60 = vmul.f32 %v441_v49, %v434_v50 }
 0x164   :  { %v453_v41 = vpop.permute.xlu1 %452  ;;  %v451_v42 = vpop.permute.xlu0 %450 }
 0x165   :  { %v461_v47 = vsel %vm458_vm9, %v451_v42, %v453_v41 }
 0x166   :  { %v468_v51 = vmul.f32 %v464_v40, %v461_v47  ;;  %806 = vrot.lane.b32.xlu1 %v7001_v2, %s6734_s6  ;;  %804 = vrot.lane.b32.xlu0 %v6993_v0, %s6734_s6 }
 0x168   :  { %v457_v57 = vpop.permute.xlu1 %456  ;;  %v455_v58 = vpop.permute.xlu0 %454  ;;  %v5748_v59 = vpack.c.bf16 %v468_v51, %v443_v48 }
 0x169   :  { %v462_v61 = vsel %vm458_vm9, %v457_v57, %v451_v42  ;;  %v459_v62 = vsel %vm458_vm9, %v455_v58, %v457_v57  ;;  %v460_v63 = vsel %vm458_vm9, %v453_v41, %v455_v58  ;;  %v538_v57 = vld [vmem:[#allocation3 + $0x180] sm:$0xff]  ;;  %vm887_vm9 = vcmp.lt.s32.totalorder %v7067_v7, 125 }
 0x16a   :  { %v467_v5 = vmul.f32 %v463_v52, %v462_v61  ;;  %v469_v6 = vmul.f32 %v465_v53, %v460_v63  ;;  %v470_v8 = vmul.f32 %v466_v54, %v459_v62  ;;  %831 = vrot.lane.b32.xlu1 %v7004_v3, %s6735_s18  ;;  %829 = vrot.lane.b32.xlu0 %v6996_v1, %s6735_s18  ;;  %v539_v52 = vld [vmem:[#allocation3 + $0x188] sm:$0xff]  ;;  %v541_v63 = vld [vmem:[#allocation3 + $0x198] sm:$0xff] }
 0x16b   :  { %5749 = vmatprep.subr.bf16.mxu0 %v5748_v59  ;;  %v564_v54 = vld [vmem:[#allocation3 + $0x1a8] sm:$0xff]  ;;  %v540_v59 = vld [vmem:[#allocation3 + $0x190] sm:$0xff] }
 0x16c   :  { %v478_v9 = vpop.permute.xlu1 %477  ;;  %v476_v10 = vpop.permute.xlu0 %475  ;;  %v5750_v11 = vpack.c.bf16 %v467_v5, %v442_v55  ;;  %v5844_v12 = vpack.c.bf16 %v470_v8, %v445_v60  ;;  %v5846_v13 = vpack.c.bf16 %v469_v6, %v444_v56  ;;  %v563_v8 = vld [vmem:[#allocation3 + $0x1a0] sm:$0xff] }
 0x16d   :  { %v486_v17 = vsel %vm483_vm10, %v476_v10, %v478_v9 }
 0x16e   :  { %835 = vrot.lane.b32.xlu1 %v7001_v2, %s6735_s18  ;;  %833 = vrot.lane.b32.xlu0 %v6993_v0, %s6735_s18  ;;  %v493_v26 = vmul.f32 %v489_v16, %v486_v17 }
 0x16f   :  { %5751 = vmatpush1.bf16.msra.mxu0 %v5750_v11  ;;  %5845 = vmatprep.subr.bf16.mxu1 %v5844_v12 }
 0x170   :  { %5847 = vmatpush1.bf16.msra.mxu1 %v5846_v13  ;;  %v482_v14 = vpop.permute.xlu1 %481  ;;  %v480_v15 = vpop.permute.xlu0 %479 }
 0x171   :  { %v487_v22 = vsel %vm483_vm10, %v482_v14, %v476_v10  ;;  %v485_v24 = vsel %vm483_vm10, %v478_v9, %v480_v15  ;;  %v484_v28 = vsel %vm483_vm10, %v480_v15, %v482_v14  ;;  %v565_v9 = vld [vmem:[#allocation3 + $0x1b0] sm:$0xff]  ;;  %v566_v10 = vld [vmem:[#allocation3 + $0x1b8] sm:$0xff]  ;;  %vm862_vm10 = vcmp.lt.s32.totalorder %v7067_v7, 126 }
 0x172   :  { %856 = vrot.lane.b32.xlu1 %v7004_v3, %s6736_s22  ;;  %854 = vrot.lane.b32.xlu0 %v6996_v1, %s6736_s22  ;;  %v492_v33 = vmul.f32 %v488_v21, %v487_v22  ;;  %v494_v34 = vmul.f32 %v490_v23, %v485_v24  ;;  %v495_v38 = vmul.f32 %v491_v27, %v484_v28 }
 0x174   :  { %v503_v19 = vpop.permute.xlu1 %502  ;;  %v501_v20 = vpop.permute.xlu0 %500 }
 0x175   :  { %v511_v25 = vsel %vm508_vm11, %v501_v20, %v503_v19 }
 0x176   :  { %v518_v29 = vmul.f32 %v514_v18, %v511_v25  ;;  %860 = vrot.lane.b32.xlu1 %v7001_v2, %s6736_s22  ;;  %858 = vrot.lane.b32.xlu0 %v6993_v0, %s6736_s22  ;;  %s6751_s22 = smov 93  }
 0x178   :  { %v507_v35 = vpop.permute.xlu1 %506  ;;  %v505_v36 = vpop.permute.xlu0 %504  ;;  %v5752_v37 = vpack.c.bf16 %v518_v29, %v493_v26 }
 0x179   :  { %v512_v39 = vsel %vm508_vm11, %v507_v35, %v501_v20  ;;  %v509_v40 = vsel %vm508_vm11, %v505_v36, %v507_v35  ;;  %v510_v41 = vsel %vm508_vm11, %v503_v19, %v505_v36  ;;  %v588_v35 = vld [vmem:[#allocation3 + $0x1c0] sm:$0xff]  ;;  %vm937_vm11 = vcmp.lt.s32.totalorder %v7067_v7, 114 }
 0x17a   :  { %v517_v42 = vmul.f32 %v513_v30, %v512_v39  ;;  %v519_v43 = vmul.f32 %v515_v31, %v510_v41  ;;  %v520_v44 = vmul.f32 %v516_v32, %v509_v40  ;;  %881 = vrot.lane.b32.xlu1 %v7004_v3, %s6737_s23  ;;  %879 = vrot.lane.b32.xlu0 %v6996_v1, %s6737_s23  ;;  %v589_v30 = vld [vmem:[#allocation3 + $0x1c8] sm:$0xff]  ;;  %v591_v41 = vld [vmem:[#allocation3 + $0x1d8] sm:$0xff] }
 0x17b   :  { %5753 = vmatprep.subr.bf16.mxu0 %v5752_v37  ;;  %v614_v32 = vld [vmem:[#allocation3 + $0x1e8] sm:$0xff]  ;;  %v590_v37 = vld [vmem:[#allocation3 + $0x1d0] sm:$0xff] }
 0x17c   :  { %v528_v45 = vpop.permute.xlu1 %527  ;;  %v526_v46 = vpop.permute.xlu0 %525  ;;  %v5754_v47 = vpack.c.bf16 %v517_v42, %v492_v33  ;;  %v5848_v48 = vpack.c.bf16 %v520_v44, %v495_v38  ;;  %v5850_v49 = vpack.c.bf16 %v519_v43, %v494_v34  ;;  %v613_v44 = vld [vmem:[#allocation3 + $0x1e0] sm:$0xff] }
 0x17d   :  { %v536_v53 = vsel %vm533_vm12, %v526_v46, %v528_v45 }
 0x17e   :  { %885 = vrot.lane.b32.xlu1 %v7001_v2, %s6737_s23  ;;  %883 = vrot.lane.b32.xlu0 %v6993_v0, %s6737_s23  ;;  %v543_v62 = vmul.f32 %v539_v52, %v536_v53  ;;  %s6752_s23 = smov 83  }
 0x17f   :  { %5755 = vmatpush1.bf16.msra.mxu0 %v5754_v47  ;;  %5849 = vmatprep.subr.bf16.mxu1 %v5848_v48 }
 0x180   :  { %5851 = vmatpush1.bf16.msra.mxu1 %v5850_v49  ;;  %v532_v50 = vpop.permute.xlu1 %531  ;;  %v530_v51 = vpop.permute.xlu0 %529 }
 0x181   :  { %v537_v58 = vsel %vm533_vm12, %v532_v50, %v526_v46  ;;  %v535_v60 = vsel %vm533_vm12, %v528_v45, %v530_v51  ;;  %v534_v5 = vsel %vm533_vm12, %v530_v51, %v532_v50  ;;  %v615_v45 = vld [vmem:[#allocation3 + $0x1f0] sm:$0xff]  ;;  %v616_v46 = vld [vmem:[#allocation3 + $0x1f8] sm:$0xff]  ;;  %vm912_vm12 = vcmp.lt.s32.totalorder %v7067_v7, 115 }
 0x182   :  { %906 = vrot.lane.b32.xlu1 %v7004_v3, %s6738_s0  ;;  %904 = vrot.lane.b32.xlu0 %v6996_v1, %s6738_s0  ;;  %v542_v11 = vmul.f32 %v538_v57, %v537_v58  ;;  %v544_v12 = vmul.f32 %v540_v59, %v535_v60  ;;  %v545_v16 = vmul.f32 %v541_v63, %v534_v5 }
 0x184   :  { %v553_v55 = vpop.permute.xlu1 %552  ;;  %v551_v56 = vpop.permute.xlu0 %550 }
 0x185   :  { %v561_v61 = vsel %vm558_vm13, %v551_v56, %v553_v55 }
 0x186   :  { %v568_v6 = vmul.f32 %v564_v54, %v561_v61  ;;  %910 = vrot.lane.b32.xlu1 %v7001_v2, %s6738_s0  ;;  %908 = vrot.lane.b32.xlu0 %v6993_v0, %s6738_s0  ;;  %s6753_s0 = smov 82  }
 0x188   :  { %v557_v13 = vpop.permute.xlu1 %556  ;;  %v555_v14 = vpop.permute.xlu0 %554  ;;  %v5756_v15 = vpack.c.bf16 %v568_v6, %v543_v62 }
 0x189   :  { %v562_v17 = vsel %vm558_vm13, %v557_v13, %v551_v56  ;;  %v559_v18 = vsel %vm558_vm13, %v555_v14, %v557_v13  ;;  %v560_v19 = vsel %vm558_vm13, %v553_v55, %v555_v14  ;;  %vm987_vm13 = vcmp.lt.s32.totalorder %v7067_v7, 112 }
 0x18a   :  { %v567_v20 = vmul.f32 %v563_v8, %v562_v17  ;;  %v569_v21 = vmul.f32 %v565_v9, %v560_v19  ;;  %v570_v22 = vmul.f32 %v566_v10, %v559_v18  ;;  %931 = vrot.lane.b32.xlu1 %v7004_v3, %s6739_s26  ;;  %929 = vrot.lane.b32.xlu0 %v6996_v1, %s6739_s26  ;;  %v664_v8 = vld [vmem:[#allocation3 + $0x228] sm:$0xff]  ;;  %v7324_v18 = vld [vmem:[%s6777_s5 + $0x18] sm:$0xff]  ;;  %v7329_v19 = vld [vmem:[%s6777_s5 + $0x10] sm:$0xff] }
 0x18b   :  { %5757 = vmatprep.subr.bf16.mxu0 %v5756_v15  ;;  %v641_v15 = vld [vmem:[#allocation3 + $0x218] sm:$0xff] }
 0x18c   :  { %v578_v23 = vpop.permute.xlu1 %577  ;;  %v576_v24 = vpop.permute.xlu0 %575  ;;  %v5758_v25 = vpack.c.bf16 %v567_v20, %v542_v11  ;;  %v5852_v26 = vpack.c.bf16 %v570_v22, %v545_v16  ;;  %v5854_v27 = vpack.c.bf16 %v569_v21, %v544_v12  ;;  %v638_v11 = vld [vmem:[#allocation3 + $0x200] sm:$0xff]  ;;  %v1430_v20 = vld [vmem:[%s6782_s9 + $0x8] sm:$0xff]  ;;  %v665_v22 = vld [vmem:[#allocation3 + $0x230] sm:$0xff] }
 0x18d   :  { %v586_v31 = vsel %vm583_vm14, %v576_v24, %v578_v23  ;;  %v663_v21 = vld [vmem:[#allocation3 + $0x220] sm:$0xff]  ;;  %1703 = vmatprep.mubr.f32.mxu0 %v1430_v20  ;;  %1845 = vmatprep.mubr.f32.mxu1 %v1430_v20 }
 0x18e   :  { %935 = vrot.lane.b32.xlu1 %v7001_v2, %s6739_s26  ;;  %933 = vrot.lane.b32.xlu0 %v6993_v0, %s6739_s26  ;;  %v593_v40 = vmul.f32 %v589_v30, %v586_v31  ;;  %s6754_s26 = smov 81  }
 0x18f   :  { %5759 = vmatpush1.bf16.msra.mxu0 %v5758_v25  ;;  %5853 = vmatprep.subr.bf16.mxu1 %v5852_v26 }
 0x190   :  { %5855 = vmatpush1.bf16.msra.mxu1 %v5854_v27  ;;  %v582_v28 = vpop.permute.xlu1 %581  ;;  %v580_v29 = vpop.permute.xlu0 %579 }
 0x191   :  { %v587_v36 = vsel %vm583_vm14, %v582_v28, %v576_v24  ;;  %v585_v38 = vsel %vm583_vm14, %v578_v23, %v580_v29  ;;  %v584_v42 = vsel %vm583_vm14, %v580_v29, %v582_v28  ;;  %v666_v23 = vld [vmem:[#allocation3 + $0x238] sm:$0xff]  ;;  %vm962_vm14 = vcmp.lt.s32.totalorder %v7067_v7, 113 }
 0x192   :  { %956 = vrot.lane.b32.xlu1 %v7004_v3, %s6740_s28  ;;  %954 = vrot.lane.b32.xlu0 %v6996_v1, %s6740_s28  ;;  %v592_v47 = vmul.f32 %v588_v35, %v587_v36  ;;  %v594_v48 = vmul.f32 %v590_v37, %v585_v38  ;;  %v595_v52 = vmul.f32 %v591_v41, %v584_v42  ;;  %v7341_v36 = vld [vmem:[%s6777_s5 + $0x8] sm:$0xff]  ;;  %v7345_v37 = vld [vmem:[%s6777_s5] sm:$0xff]  ;;  %s6744_s5 = smov 109  }
 0x194   :  { %v603_v33 = vpop.permute.xlu1 %602  ;;  %v601_v34 = vpop.permute.xlu0 %600 }
 0x195   :  { %v611_v39 = vsel %vm608_vm15, %v601_v34, %v603_v33 }
 0x196   :  { %v618_v43 = vmul.f32 %v614_v32, %v611_v39  ;;  %960 = vrot.lane.b32.xlu1 %v7001_v2, %s6740_s28  ;;  %958 = vrot.lane.b32.xlu0 %v6993_v0, %s6740_s28 }
 0x198   :  { %v607_v49 = vpop.permute.xlu1 %606  ;;  %v605_v50 = vpop.permute.xlu0 %604  ;;  %v5760_v51 = vpack.c.bf16 %v618_v43, %v593_v40 }
 0x199   :  { %v612_v53 = vsel %vm608_vm15, %v607_v49, %v601_v34  ;;  %v609_v54 = vsel %vm608_vm15, %v605_v50, %v607_v49  ;;  %v610_v55 = vsel %vm608_vm15, %v603_v33, %v605_v50  ;;  %v688_v50 = vld [vmem:[#allocation3 + $0x240] sm:$0xff]  ;;  %vm1037_vm15 = vcmp.lt.s32.totalorder %v7067_v7, 110 }
 0x19a   :  { %v617_v56 = vmul.f32 %v613_v44, %v612_v53  ;;  %v619_v57 = vmul.f32 %v615_v45, %v610_v55  ;;  %v620_v58 = vmul.f32 %v616_v46, %v609_v54  ;;  %981 = vrot.lane.b32.xlu1 %v7004_v3, %s6741_s2  ;;  %979 = vrot.lane.b32.xlu0 %v6996_v1, %s6741_s2  ;;  %v689_v45 = vld [vmem:[#allocation3 + $0x248] sm:$0xff] }
 0x19b   :  { %5761 = vmatprep.subr.bf16.mxu0 %v5760_v51 }
 0x19c   :  { %v628_v59 = vpop.permute.xlu1 %627  ;;  %v626_v60 = vpop.permute.xlu0 %625  ;;  %v5762_v61 = vpack.c.bf16 %v617_v56, %v592_v47  ;;  %v5856_v62 = vpack.c.bf16 %v620_v58, %v595_v52  ;;  %v5858_v63 = vpack.c.bf16 %v619_v57, %v594_v48  ;;  %v714_v47 = vld [vmem:[#allocation3 + $0x268] sm:$0xff]  ;;  %v690_v52 = vld [vmem:[#allocation3 + $0x250] sm:$0xff]  ;;  %v691_v56 = vld [vmem:[#allocation3 + $0x258] sm:$0xff] }
 0x19e   :  { %985 = vrot.lane.b32.xlu1 %v7001_v2, %s6741_s2  ;;  %983 = vrot.lane.b32.xlu0 %v6993_v0, %s6741_s2  ;;  %v639_v2 = vld [vmem:[#allocation3 + $0x208] sm:$0xff]  ;;  %v636_v0 = vsel %vm633_vm0, %v626_v60, %v628_v59 }
 0x19f   :  { %5763 = vmatpush1.bf16.msra.mxu0 %v5762_v61  ;;  %5857 = vmatprep.subr.bf16.mxu1 %v5856_v62  ;;  %v643_v14 = vmul.f32 %v639_v2, %v636_v0  ;;  %v716_v61 = vld [vmem:[#allocation3 + $0x278] sm:$0xff] }
 0x1a0   :  { %5859 = vmatpush1.bf16.msra.mxu1 %v5858_v63  ;;  %v632_v5 = vpop.permute.xlu1 %631  ;;  %v630_v6 = vpop.permute.xlu0 %629 }
 0x1a1   :  { %v637_v12 = vsel %vm633_vm0, %v632_v5, %v626_v60  ;;  %v634_v16 = vsel %vm633_vm0, %v630_v6, %v632_v5  ;;  %v715_v60 = vld [vmem:[#allocation3 + $0x270] sm:$0xff] }
 0x1a2   :  { %1006 = vrot.lane.b32.xlu1 %v7004_v3, %s6742_s7  ;;  %1004 = vrot.lane.b32.xlu0 %v6996_v1, %s6742_s7  ;;  %v640_v3 = vld [vmem:[#allocation3 + $0x210] sm:$0xff]  ;;  %v635_v1 = vsel %vm633_vm0, %v628_v59, %v630_v6  ;;  %v642_v24 = vmul.f32 %v638_v11, %v637_v12  ;;  %v645_v29 = vmul.f32 %v641_v15, %v634_v16  ;;  %v713_v59 = vld [vmem:[#allocation3 + $0x260] sm:$0xff] }
 0x1a3   :  { %v644_v25 = vmul.f32 %v640_v3, %v635_v1 }
 0x1a4   :  { %v653_v9 = vpop.permute.xlu1 %652  ;;  %v651_v10 = vpop.permute.xlu0 %650 }
 0x1a5   :  { %v661_v13 = vsel %vm658_vm1, %v651_v10, %v653_v9 }
 0x1a6   :  { %v668_v17 = vmul.f32 %v664_v8, %v661_v13  ;;  %1010 = vrot.lane.b32.xlu1 %v7324_v18, %s6742_s7  ;;  %1008 = vrot.lane.b32.xlu0 %v7329_v19, %s6742_s7 }
 0x1a8   :  { %v657_v26 = vpop.permute.xlu1 %656  ;;  %v655_v27 = vpop.permute.xlu0 %654  ;;  %v5764_v28 = vpack.c.bf16 %v668_v17, %v643_v14 }
 0x1a9   :  { %v662_v30 = vsel %vm658_vm1, %v657_v26, %v651_v10  ;;  %v659_v31 = vsel %vm658_vm1, %v655_v27, %v657_v26  ;;  %v660_v32 = vsel %vm658_vm1, %v653_v9, %v655_v27  ;;  %v738_v26 = vld [vmem:[#allocation3 + $0x280] sm:$0xff] }
 0x1aa   :  { %v667_v33 = vmul.f32 %v663_v21, %v662_v30  ;;  %v669_v34 = vmul.f32 %v665_v22, %v660_v32  ;;  %v670_v35 = vmul.f32 %v666_v23, %v659_v31  ;;  %1031 = vrot.lane.b32.xlu1 %v7341_v36, %s6743_s4  ;;  %1029 = vrot.lane.b32.xlu0 %v7345_v37, %s6743_s4  ;;  %v739_v21 = vld [vmem:[#allocation3 + $0x288] sm:$0xff]  ;;  %v741_v32 = vld [vmem:[#allocation3 + $0x298] sm:$0xff] }
 0x1ab   :  { %5765 = vmatprep.subr.bf16.mxu0 %v5764_v28  ;;  %v764_v23 = vld [vmem:[#allocation3 + $0x2a8] sm:$0xff]  ;;  %v740_v28 = vld [vmem:[#allocation3 + $0x290] sm:$0xff] }
 0x1ac   :  { %v678_v38 = vpop.permute.xlu1 %677  ;;  %v676_v39 = vpop.permute.xlu0 %675  ;;  %v5766_v40 = vpack.c.bf16 %v667_v33, %v642_v24  ;;  %v5860_v41 = vpack.c.bf16 %v670_v35, %v645_v29  ;;  %v5862_v42 = vpack.c.bf16 %v669_v34, %v644_v25  ;;  %v763_v35 = vld [vmem:[#allocation3 + $0x2a0] sm:$0xff] }
 0x1ad   :  { %v686_v46 = vsel %vm683_vm2, %v676_v39, %v678_v38 }
 0x1ae   :  { %1035 = vrot.lane.b32.xlu1 %v7324_v18, %s6743_s4  ;;  %1033 = vrot.lane.b32.xlu0 %v7329_v19, %s6743_s4  ;;  %v693_v55 = vmul.f32 %v689_v45, %v686_v46  ;;  %s6755_s4 = smov 80  }
 0x1af   :  { %5767 = vmatpush1.bf16.msra.mxu0 %v5766_v40  ;;  %5861 = vmatprep.subr.bf16.mxu1 %v5860_v41 }
 0x1b0   :  { %5863 = vmatpush1.bf16.msra.mxu1 %v5862_v42  ;;  %v682_v43 = vpop.permute.xlu1 %681  ;;  %v680_v44 = vpop.permute.xlu0 %679 }
 0x1b1   :  { %v687_v51 = vsel %vm683_vm2, %v682_v43, %v676_v39  ;;  %v685_v53 = vsel %vm683_vm2, %v678_v38, %v680_v44  ;;  %v684_v57 = vsel %vm683_vm2, %v680_v44, %v682_v43  ;;  %v765_v38 = vld [vmem:[#allocation3 + $0x2b0] sm:$0xff]  ;;  %v766_v39 = vld [vmem:[#allocation3 + $0x2b8] sm:$0xff] }
 0x1b2   :  { %1056 = vrot.lane.b32.xlu1 %v7341_v36, %s6744_s5  ;;  %1054 = vrot.lane.b32.xlu0 %v7345_v37, %s6744_s5  ;;  %v692_v62 = vmul.f32 %v688_v50, %v687_v51  ;;  %v694_v63 = vmul.f32 %v690_v52, %v685_v53  ;;  %v695_v0 = vmul.f32 %v691_v56, %v684_v57 }
 0x1b4   :  { %v703_v48 = vpop.permute.xlu1 %702  ;;  %v701_v49 = vpop.permute.xlu0 %700 }
 0x1b5   :  { %v711_v54 = vsel %vm708_vm3, %v701_v49, %v703_v48 }
 0x1b6   :  { %v718_v58 = vmul.f32 %v714_v47, %v711_v54  ;;  %1060 = vrot.lane.b32.xlu1 %v7324_v18, %s6744_s5  ;;  %1058 = vrot.lane.b32.xlu0 %v7329_v19, %s6744_s5  ;;  %s6756_s5 = smov 79  }
 0x1b8   :  { %v707_v5 = vpop.permute.xlu1 %706  ;;  %v705_v6 = vpop.permute.xlu0 %704  ;;  %v5768_v2 = vpack.c.bf16 %v718_v58, %v693_v55 }
 0x1b9   :  { %v712_v8 = vsel %vm708_vm3, %v707_v5, %v701_v49  ;;  %v709_v9 = vsel %vm708_vm3, %v705_v6, %v707_v5  ;;  %v710_v10 = vsel %vm708_vm3, %v703_v48, %v705_v6  ;;  %v788_v5 = vld [vmem:[#allocation3 + $0x2c0] sm:$0xff]  ;;  %vm1012_vm3 = vcmp.lt.s32.totalorder %v7067_v7, 111 }
 0x1ba   :  { %v717_v11 = vmul.f32 %v713_v59, %v712_v8  ;;  %v719_v12 = vmul.f32 %v715_v60, %v710_v10  ;;  %v720_v3 = vmul.f32 %v716_v61, %v709_v9  ;;  %1081 = vrot.lane.b32.xlu1 %v7341_v36, %s6745_s25  ;;  %1079 = vrot.lane.b32.xlu0 %v7345_v37, %s6745_s25  ;;  %v789_v59 = vld [vmem:[#allocation3 + $0x2c8] sm:$0xff]  ;;  %v791_v10 = vld [vmem:[#allocation3 + $0x2d8] sm:$0xff] }
 0x1bb   :  { %5769 = vmatprep.subr.bf16.mxu0 %v5768_v2  ;;  %v814_v61 = vld [vmem:[#allocation3 + $0x2e8] sm:$0xff]  ;;  %v790_v2 = vld [vmem:[#allocation3 + $0x2d0] sm:$0xff] }
 0x1bc   :  { %v728_v1 = vpop.permute.xlu1 %727  ;;  %v726_v13 = vpop.permute.xlu0 %725  ;;  %v5770_v14 = vpack.c.bf16 %v717_v11, %v692_v62  ;;  %v5864_v15 = vpack.c.bf16 %v720_v3, %v695_v0  ;;  %v5866_v16 = vpack.c.bf16 %v719_v12, %v694_v63  ;;  %v813_v3 = vld [vmem:[#allocation3 + $0x2e0] sm:$0xff] }
 0x1bd   :  { %v736_v22 = vsel %vm733_vm4, %v726_v13, %v728_v1 }
 0x1be   :  { %1085 = vrot.lane.b32.xlu1 %v7324_v18, %s6745_s25  ;;  %1083 = vrot.lane.b32.xlu0 %v7329_v19, %s6745_s25  ;;  %v743_v31 = vmul.f32 %v739_v21, %v736_v22  ;;  %s6757_s25 = smov 78  }
 0x1bf   :  { %5771 = vmatpush1.bf16.msra.mxu0 %v5770_v14  ;;  %5865 = vmatprep.subr.bf16.mxu1 %v5864_v15 }
 0x1c0   :  { %5867 = vmatpush1.bf16.msra.mxu1 %v5866_v16  ;;  %v732_v17 = vpop.permute.xlu1 %731  ;;  %v730_v20 = vpop.permute.xlu0 %729 }
 0x1c1   :  { %v737_v27 = vsel %vm733_vm4, %v732_v17, %v726_v13  ;;  %v735_v29 = vsel %vm733_vm4, %v728_v1, %v730_v20  ;;  %v734_v33 = vsel %vm733_vm4, %v730_v20, %v732_v17  ;;  %v815_v1 = vld [vmem:[#allocation3 + $0x2f0] sm:$0xff]  ;;  %v816_v13 = vld [vmem:[#allocation3 + $0x2f8] sm:$0xff]  ;;  %vm1635_vm4 = vcmask 64512  }
 0x1c2   :  { %1106 = vrot.lane.b32.xlu1 %v7341_v36, %s6746_s10  ;;  %1104 = vrot.lane.b32.xlu0 %v7345_v37, %s6746_s10  ;;  %v742_v40 = vmul.f32 %v738_v26, %v737_v27  ;;  %v744_v41 = vmul.f32 %v740_v28, %v735_v29  ;;  %v745_v45 = vmul.f32 %v741_v32, %v734_v33  ;;  %v842_v33 = vld [vmem:[#allocation3 + $0x320] sm:$0xff] }
 0x1c4   :  { %v753_v24 = vpop.permute.xlu1 %752  ;;  %v751_v25 = vpop.permute.xlu0 %750 }
 0x1c5   :  { %v761_v30 = vsel %vm758_vm5, %v751_v25, %v753_v24 }
 0x1c6   :  { %v768_v34 = vmul.f32 %v764_v23, %v761_v30  ;;  %1110 = vrot.lane.b32.xlu1 %v7324_v18, %s6746_s10  ;;  %1108 = vrot.lane.b32.xlu0 %v7329_v19, %s6746_s10  ;;  %s6759_s10 = smov 77  }
 0x1c8   :  { %v757_v42 = vpop.permute.xlu1 %756  ;;  %v755_v43 = vpop.permute.xlu0 %754  ;;  %v5772_v44 = vpack.c.bf16 %v768_v34, %v743_v31 }
 0x1c9   :  { %v762_v46 = vsel %vm758_vm5, %v757_v42, %v751_v25  ;;  %v759_v47 = vsel %vm758_vm5, %v755_v43, %v757_v42  ;;  %v760_v48 = vsel %vm758_vm5, %v753_v24, %v755_v43  ;;  %vm1087_vm5 = vcmp.lt.s32.totalorder %v7067_v7, 99 }
 0x1ca   :  { %v767_v49 = vmul.f32 %v763_v35, %v762_v46  ;;  %v769_v50 = vmul.f32 %v765_v38, %v760_v48  ;;  %v770_v51 = vmul.f32 %v766_v39, %v759_v47  ;;  %1131 = vrot.lane.b32.xlu1 %v7341_v36, %s6747_s16  ;;  %1129 = vrot.lane.b32.xlu0 %v7345_v37, %s6747_s16  ;;  %v845_v35 = vld [vmem:[#allocation3 + $0x338] sm:$0xff]  ;;  %v843_v38 = vld [vmem:[#allocation3 + $0x328] sm:$0xff]  ;;  %v844_v39 = vld [vmem:[#allocation3 + $0x330] sm:$0xff] }
 0x1cb   :  { %5773 = vmatprep.subr.bf16.mxu0 %v5772_v44 }
 0x1cc   :  { %v778_v52 = vpop.permute.xlu1 %777  ;;  %v776_v53 = vpop.permute.xlu0 %775  ;;  %v5774_v54 = vpack.c.bf16 %v767_v49, %v742_v40  ;;  %v5868_v55 = vpack.c.bf16 %v770_v51, %v745_v45  ;;  %v5870_v56 = vpack.c.bf16 %v769_v50, %v744_v41 }
 0x1cd   :  { %v786_v60 = vsel %vm783_vm6, %v776_v53, %v778_v52 }
 0x1ce   :  { %1135 = vrot.lane.b32.xlu1 %v7324_v18, %s6747_s16  ;;  %1133 = vrot.lane.b32.xlu0 %v7329_v19, %s6747_s16  ;;  %v793_v9 = vmul.f32 %v789_v59, %v786_v60  ;;  %v870_v59 = vld [vmem:[#allocation3 + $0x358] sm:$0xff]  ;;  %s8338_s16 = sld [smem:[#allocation23_spill]] }
 0x1cf   :  { %5775 = vmatpush1.bf16.msra.mxu0 %v5774_v54  ;;  %5869 = vmatprep.subr.bf16.mxu1 %v5868_v55 }
 0x1d0   :  { %5871 = vmatpush1.bf16.msra.mxu1 %v5870_v56  ;;  %v782_v57 = vpop.permute.xlu1 %781  ;;  %v780_v58 = vpop.permute.xlu0 %779 }
 0x1d1   :  { %v787_v6 = vsel %vm783_vm6, %v782_v57, %v776_v53  ;;  %v785_v0 = vsel %vm783_vm6, %v778_v52, %v780_v58  ;;  %v784_v11 = vsel %vm783_vm6, %v780_v58, %v782_v57  ;;  %vm1062_vm6 = vcmp.lt.s32.totalorder %v7067_v7, 109 }
 0x1d2   :  { %1156 = vrot.lane.b32.xlu1 %v7341_v36, %s6748_s30  ;;  %1154 = vrot.lane.b32.xlu0 %v7345_v37, %s6748_s30  ;;  %v792_v14 = vmul.f32 %v788_v5, %v787_v6  ;;  %v794_v15 = vmul.f32 %v790_v2, %v785_v0  ;;  %v795_v21 = vmul.f32 %v791_v10, %v784_v11  ;;  %v892_v6 = vld [vmem:[#allocation3 + $0x360] sm:$0xff]  ;;  %v895_v0 = vld [vmem:[#allocation3 + $0x378] sm:$0xff] }
 0x1d4   :  { %v803_v62 = vpop.permute.xlu1 %802  ;;  %v801_v63 = vpop.permute.xlu0 %800 }
 0x1d5   :  { %v811_v8 = vsel %vm808_vm7, %v801_v63, %v803_v62 }
 0x1d6   :  { %v818_v12 = vmul.f32 %v814_v61, %v811_v8  ;;  %1160 = vrot.lane.b32.xlu1 %v7324_v18, %s6748_s30  ;;  %1158 = vrot.lane.b32.xlu0 %v7329_v19, %s6748_s30  ;;  %v868_v61 = vld [vmem:[#allocation3 + $0x348] sm:$0xff] }
 0x1d7   :  { %v893_v8 = vld [vmem:[#allocation3 + $0x368] sm:$0xff] }
 0x1d8   :  { %v807_v16 = vpop.permute.xlu1 %806  ;;  %v805_v17 = vpop.permute.xlu0 %804  ;;  %v5776_v20 = vpack.c.bf16 %v818_v12, %v793_v9  ;;  %v894_v9 = vld [vmem:[#allocation3 + $0x370] sm:$0xff] }
 0x1d9   :  { %v812_v22 = vsel %vm808_vm7, %v807_v16, %v801_v63  ;;  %v809_v23 = vsel %vm808_vm7, %v805_v17, %v807_v16  ;;  %v810_v24 = vsel %vm808_vm7, %v803_v62, %v805_v17  ;;  %v869_v62 = vld [vmem:[#allocation3 + $0x350] sm:$0xff] }
 0x1da   :  { %v817_v25 = vmul.f32 %v813_v3, %v812_v22  ;;  %v819_v26 = vmul.f32 %v815_v1, %v810_v24  ;;  %v820_v27 = vmul.f32 %v816_v13, %v809_v23  ;;  %1181 = vrot.lane.b32.xlu1 %v7341_v36, %s6749_s8  ;;  %1179 = vrot.lane.b32.xlu0 %v7345_v37, %s6749_s8 }
 0x1db   :  { %5777 = vmatprep.subr.bf16.mxu0 %v5776_v20 }
 0x1dc   :  { %v832_v28 = vpop.permute.xlu1 %831  ;;  %v830_v29 = vpop.permute.xlu0 %829  ;;  %v5778_v30 = vpack.c.bf16 %v817_v25, %v792_v14  ;;  %v5872_v31 = vpack.c.bf16 %v820_v27, %v795_v21  ;;  %v5874_v32 = vpack.c.bf16 %v819_v26, %v794_v15  ;;  %v867_v14 = vld [vmem:[#allocation3 + $0x340] sm:$0xff] }
 0x1dd   :  { %v840_v34 = vsel %vm837_vm8, %v830_v29, %v832_v28 }
 0x1de   :  { %1185 = vrot.lane.b32.xlu1 %v7324_v18, %s6749_s8  ;;  %1183 = vrot.lane.b32.xlu0 %v7329_v19, %s6749_s8  ;;  %v846_v42 = vmul.f32 %v842_v33, %v840_v34 }
 0x1df   :  { %5779 = vmatpush1.bf16.msra.mxu0 %v5778_v30  ;;  %5873 = vmatprep.subr.bf16.mxu1 %v5872_v31 }
 0x1e0   :  { %5875 = vmatpush1.bf16.msra.mxu1 %v5874_v32  ;;  %v836_v40 = vpop.permute.xlu1 %835  ;;  %v834_v41 = vpop.permute.xlu0 %833  ;;  %v5782_v54 = vpack.c.bf16 %v846_v42, %v7345_v37 }
 0x1e1   :  { %v841_v43 = vsel %vm837_vm8, %v836_v40, %v830_v29  ;;  %v838_v44 = vsel %vm837_vm8, %v834_v41, %v836_v40  ;;  %v839_v45 = vsel %vm837_vm8, %v832_v28, %v834_v41  ;;  %v919_v40 = vld [vmem:[#allocation3 + $0x390] sm:$0xff] }
 0x1e2   :  { %v849_v46 = vmul.f32 %v845_v35, %v841_v43  ;;  %v847_v47 = vmul.f32 %v843_v38, %v839_v45  ;;  %v848_v48 = vmul.f32 %v844_v39, %v838_v44  ;;  %1206 = vrot.lane.b32.xlu1 %v7341_v36, %s6750_s1  ;;  %1204 = vrot.lane.b32.xlu0 %v7345_v37, %s6750_s1  ;;  %v920_v35 = vld [vmem:[#allocation3 + $0x398] sm:$0xff]  ;;  %v918_v39 = vld [vmem:[#allocation3 + $0x388] sm:$0xff]  ;;  %v942_v43 = vld [vmem:[#allocation3 + $0x3a0] sm:$0xff] }
 0x1e3   :  { %v945_v45 = vld [vmem:[#allocation3 + $0x3b8] sm:$0xff] }
 0x1e4   :  { %v857_v49 = vpop.permute.xlu1 %856  ;;  %v855_v50 = vpop.permute.xlu0 %854  ;;  %v5780_v51 = vpack.c.bf16 %v847_v47, %v7341_v36  ;;  %v5876_v52 = vpack.c.bf16 %v849_v46, %v7324_v18  ;;  %v5878_v53 = vpack.c.bf16 %v848_v48, %v7329_v19  ;;  %v943_v46 = vld [vmem:[#allocation3 + $0x3a8] sm:$0xff]  ;;  %v944_v47 = vld [vmem:[#allocation3 + $0x3b0] sm:$0xff] }
 0x1e5   :  { %v865_v10 = vsel %vm862_vm10, %v855_v50, %v857_v49 }
 0x1e6   :  { %1210 = vrot.lane.b32.xlu1 %v7324_v18, %s6750_s1  ;;  %1208 = vrot.lane.b32.xlu0 %v7329_v19, %s6750_s1  ;;  %v871_v24 = vmul.f32 %v867_v14, %v865_v10  ;;  %v969_v14 = vld [vmem:[#allocation3 + $0x3d0] sm:$0xff] }
 0x1e7   :  { %5781 = vmatprep.subr.bf16.mxu0 %v5780_v51  ;;  %5877 = vmatprep.subr.bf16.mxu1 %v5876_v52 }
 0x1e8   :  { %5783 = vmatpush1.bf16.msra.mxu0 %v5782_v54  ;;  %5879 = vmatpush1.bf16.msra.mxu1 %v5878_v53  ;;  %v861_v55 = vpop.permute.xlu1 %860  ;;  %v859_v56 = vpop.permute.xlu0 %858  ;;  %v917_v54 = vld [vmem:[#allocation3 + $0x380] sm:$0xff] }
 0x1e9   :  { %v866_v60 = vsel %vm862_vm10, %v861_v55, %v855_v50  ;;  %v863_v63 = vsel %vm862_vm10, %v859_v56, %v861_v55  ;;  %v864_v5 = vsel %vm862_vm10, %v857_v49, %v859_v56  ;;  %vm1112_vm10 = vcmp.lt.s32.totalorder %v7067_v7, 98 }
 0x1ea   :  { %1231 = vrot.lane.b32.xlu1 %v7341_v36, %s6751_s22  ;;  %1229 = vrot.lane.b32.xlu0 %v7345_v37, %s6751_s22  ;;  %v874_v11 = vmul.f32 %v870_v59, %v866_v60  ;;  %v872_v12 = vmul.f32 %v868_v61, %v864_v5  ;;  %v873_v3 = vmul.f32 %v869_v62, %v863_v63 }
 0x1ec   :  { %v882_v57 = vpop.permute.xlu1 %881  ;;  %v880_v58 = vpop.permute.xlu0 %879 }
 0x1ed   :  { %v890_v2 = vsel %vm887_vm9, %v880_v58, %v882_v57 }
 0x1ee   :  { %1235 = vrot.lane.b32.xlu1 %v7324_v18, %s6751_s22  ;;  %1233 = vrot.lane.b32.xlu0 %v7329_v19, %s6751_s22  ;;  %v896_v15 = vmul.f32 %v892_v6, %v890_v2 }
 0x1f0   :  { %v886_v1 = vpop.permute.xlu1 %885  ;;  %v884_v13 = vpop.permute.xlu0 %883  ;;  %v5786_v30 = vpack.c.bf16 %v896_v15, %v871_v24 }
 0x1f1   :  { %v891_v16 = vsel %vm887_vm9, %v886_v1, %v880_v58  ;;  %v888_v17 = vsel %vm887_vm9, %v884_v13, %v886_v1  ;;  %v889_v20 = vsel %vm887_vm9, %v882_v57, %v884_v13  ;;  %v968_v13 = vld [vmem:[#allocation3 + $0x3c8] sm:$0xff]  ;;  %vm1137_vm9 = vcmp.lt.s32.totalorder %v7067_v7, 97 }
 0x1f2   :  { %v899_v21 = vmul.f32 %v895_v0, %v891_v16  ;;  %v897_v22 = vmul.f32 %v893_v8, %v889_v20  ;;  %v898_v23 = vmul.f32 %v894_v9, %v888_v17  ;;  %1256 = vrot.lane.b32.xlu1 %v7341_v36, %s6752_s23  ;;  %1254 = vrot.lane.b32.xlu0 %v7345_v37, %s6752_s23  ;;  %v992_v17 = vld [vmem:[#allocation3 + $0x3e0] sm:$0xff] }
 0x1f4   :  { %v907_v25 = vpop.permute.xlu1 %906  ;;  %v905_v26 = vpop.permute.xlu0 %904  ;;  %v5784_v27 = vpack.c.bf16 %v897_v22, %v872_v12  ;;  %v5880_v28 = vpack.c.bf16 %v899_v21, %v874_v11  ;;  %v5882_v29 = vpack.c.bf16 %v898_v23, %v873_v3  ;;  %v970_v3 = vld [vmem:[#allocation3 + $0x3d8] sm:$0xff]  ;;  %v993_v22 = vld [vmem:[#allocation3 + $0x3e8] sm:$0xff]  ;;  %v994_v23 = vld [vmem:[#allocation3 + $0x3f0] sm:$0xff] }
 0x1f5   :  { %v915_v48 = vsel %vm912_vm12, %v905_v26, %v907_v25  ;;  %v995_v21 = vld [vmem:[#allocation3 + $0x3f8] sm:$0xff] }
 0x1f6   :  { %1260 = vrot.lane.b32.xlu1 %v7324_v18, %s6752_s23  ;;  %1258 = vrot.lane.b32.xlu0 %v7329_v19, %s6752_s23  ;;  %v921_v62 = vmul.f32 %v917_v54, %v915_v48  ;;  %v1018_v54 = vld [vmem:[#allocation3 + $0x408] sm:$0xff] }
 0x1f7   :  { %5785 = vmatprep.subr.bf16.mxu0 %v5784_v27  ;;  %5881 = vmatprep.subr.bf16.mxu1 %v5880_v28 }
 0x1f8   :  { %5787 = vmatpush1.bf16.msra.mxu0 %v5786_v30  ;;  %5883 = vmatpush1.bf16.msra.mxu1 %v5882_v29  ;;  %v911_v31 = vpop.permute.xlu1 %910  ;;  %v909_v32 = vpop.permute.xlu0 %908  ;;  %v967_v30 = vld [vmem:[#allocation3 + $0x3c0] sm:$0xff] }
 0x1f9   :  { %v916_v38 = vsel %vm912_vm12, %v911_v31, %v905_v26  ;;  %v913_v41 = vsel %vm912_vm12, %v909_v32, %v911_v31  ;;  %v914_v42 = vsel %vm912_vm12, %v907_v25, %v909_v32  ;;  %vm1162_vm12 = vcmp.lt.s32.totalorder %v7067_v7, 96 }
 0x1fa   :  { %1281 = vrot.lane.b32.xlu1 %v7341_v36, %s6753_s0  ;;  %1279 = vrot.lane.b32.xlu0 %v7345_v37, %s6753_s0  ;;  %v924_v49 = vmul.f32 %v920_v35, %v916_v38  ;;  %v922_v50 = vmul.f32 %v918_v39, %v914_v42  ;;  %v923_v51 = vmul.f32 %v919_v40, %v913_v41 }
 0x1fc   :  { %v932_v33 = vpop.permute.xlu1 %931  ;;  %v930_v34 = vpop.permute.xlu0 %929 }
 0x1fd   :  { %v940_v44 = vsel %vm937_vm11, %v930_v34, %v932_v33 }
 0x1fe   :  { %1285 = vrot.lane.b32.xlu1 %v7324_v18, %s6753_s0  ;;  %1283 = vrot.lane.b32.xlu0 %v7329_v19, %s6753_s0  ;;  %v946_v55 = vmul.f32 %v942_v43, %v940_v44 }
 0x200   :  { %v936_v52 = vpop.permute.xlu1 %935  ;;  %v934_v53 = vpop.permute.xlu0 %933  ;;  %v5790_v8 = vpack.c.bf16 %v946_v55, %v921_v62  ;;  %v1019_v55 = vld [vmem:[#allocation3 + $0x410] sm:$0xff]  ;;  %v1045_v62 = vld [vmem:[#allocation3 + $0x438] sm:$0xff] }
 0x201   :  { %v941_v56 = vsel %vm937_vm11, %v936_v52, %v930_v34  ;;  %v938_v57 = vsel %vm937_vm11, %v934_v53, %v936_v52  ;;  %v939_v58 = vsel %vm937_vm11, %v932_v33, %v934_v53  ;;  %vm1187_vm11 = vcmp.lt.s32.totalorder %v7067_v7, 95 }
 0x202   :  { %v949_v59 = vmul.f32 %v945_v45, %v941_v56  ;;  %v947_v60 = vmul.f32 %v943_v46, %v939_v58  ;;  %v948_v61 = vmul.f32 %v944_v47, %v938_v57  ;;  %1306 = vrot.lane.b32.xlu1 %v7341_v36, %s6754_s26  ;;  %1304 = vrot.lane.b32.xlu0 %v7345_v37, %s6754_s26  ;;  %v1432_v58 = vld [vmem:[%s6782_s9 + $0x18] sm:$0xff] }
 0x204   :  { %v957_v63 = vpop.permute.xlu1 %956  ;;  %v955_v5 = vpop.permute.xlu0 %954  ;;  %v5788_v6 = vpack.c.bf16 %v947_v60, %v922_v50  ;;  %v5884_v2 = vpack.c.bf16 %v949_v59, %v924_v49  ;;  %v5886_v0 = vpack.c.bf16 %v948_v61, %v923_v51  ;;  %v1429_v49 = vld [vmem:[%s6782_s9] sm:$0xff]  ;;  %v1020_v50 = vld [vmem:[#allocation3 + $0x418] sm:$0xff] }
 0x205   :  { %v965_v24 = vsel %vm962_vm14, %v955_v5, %v957_v63  ;;  %v1042_v59 = vld [vmem:[#allocation3 + $0x420] sm:$0xff] }
 0x206   :  { %1310 = vrot.lane.b32.xlu1 %v7324_v18, %s6754_s26  ;;  %1308 = vrot.lane.b32.xlu0 %v7329_v19, %s6754_s26  ;;  %v971_v40 = vmul.f32 %v967_v30, %v965_v24 }
 0x207   :  { %5789 = vmatprep.subr.bf16.mxu0 %v5788_v6  ;;  %5885 = vmatprep.subr.bf16.mxu1 %v5884_v2 }
 0x208   :  { %5791 = vmatpush1.bf16.msra.mxu0 %v5790_v8  ;;  %5887 = vmatpush1.bf16.msra.mxu1 %v5886_v0  ;;  %v961_v9 = vpop.permute.xlu1 %960  ;;  %v959_v10 = vpop.permute.xlu0 %958 }
 0x209   :  { %v966_v1 = vsel %vm962_vm14, %v961_v9, %v955_v5  ;;  %v963_v15 = vsel %vm962_vm14, %v959_v10, %v961_v9  ;;  %v964_v16 = vsel %vm962_vm14, %v957_v63, %v959_v10  ;;  %v1043_v63 = vld [vmem:[#allocation3 + $0x428] sm:$0xff]  ;;  %v1044_v5 = vld [vmem:[#allocation3 + $0x430] sm:$0xff]  ;;  %v6758_v10 = vmov 0  }
 0x20a   :  { %1331 = vrot.lane.b32.xlu1 %v7341_v36, %s6755_s4  ;;  %1329 = vrot.lane.b32.xlu0 %v7345_v37, %s6755_s4  ;;  %v974_v25 = vmul.f32 %v970_v3, %v966_v1  ;;  %v972_v26 = vmul.f32 %v968_v13, %v964_v16  ;;  %v973_v27 = vmul.f32 %v969_v14, %v963_v15 }
 0x20b   :  { %6492 = vset.pattern.permute.xlu0 %v6758_v10  ;;  %6493 = vset.pattern.permute.xlu1 %v6758_v10  ;;  %v1142_v10 = vld [vmem:[#allocation3 + $0x4a0] sm:$0xff] }
 0x20c   :  { %v982_v11 = vpop.permute.xlu1 %981  ;;  %v980_v12 = vpop.permute.xlu0 %979 }
 0x20d   :  { %v990_v20 = vsel %vm987_vm13, %v980_v12, %v982_v11 }
 0x20e   :  { %1335 = vrot.lane.b32.xlu1 %v7324_v18, %s6755_s4  ;;  %1333 = vrot.lane.b32.xlu0 %v7329_v19, %s6755_s4  ;;  %v996_v31 = vmul.f32 %v992_v17, %v990_v20 }
 0x210   :  { %v986_v28 = vpop.permute.xlu1 %985  ;;  %v984_v29 = vpop.permute.xlu0 %983  ;;  %v5794_v46 = vpack.c.bf16 %v996_v31, %v971_v40  ;;  %v1068_v31 = vld [vmem:[#allocation3 + $0x448] sm:$0xff]  ;;  %v1067_v40 = vld [vmem:[#allocation3 + $0x440] sm:$0xff] }
 0x211   :  { %v991_v32 = vsel %vm987_vm13, %v986_v28, %v980_v12  ;;  %v988_v33 = vsel %vm987_vm13, %v984_v29, %v986_v28  ;;  %v989_v34 = vsel %vm987_vm13, %v982_v11, %v984_v29  ;;  %v1017_v11 = vld [vmem:[#allocation3 + $0x400] sm:$0xff]  ;;  %v1070_v29 = vld [vmem:[#allocation3 + $0x458] sm:$0xff] }
 0x212   :  { %v999_v35 = vmul.f32 %v995_v21, %v991_v32  ;;  %v997_v38 = vmul.f32 %v993_v22, %v989_v34  ;;  %v998_v39 = vmul.f32 %v994_v23, %v988_v33  ;;  %1356 = vrot.lane.b32.xlu1 %v7341_v36, %s6756_s5  ;;  %1354 = vrot.lane.b32.xlu0 %v7345_v37, %s6756_s5  ;;  %v1069_v32 = vld [vmem:[#allocation3 + $0x450] sm:$0xff] }
 0x214   :  { %v1007_v41 = vpop.permute.xlu1 %1006  ;;  %v1005_v42 = vpop.permute.xlu0 %1004  ;;  %v5792_v43 = vpack.c.bf16 %v997_v38, %v972_v26  ;;  %v5888_v44 = vpack.c.bf16 %v999_v35, %v974_v25  ;;  %v5890_v45 = vpack.c.bf16 %v998_v39, %v973_v27  ;;  %v1629_v26 = vld [vmem:[%s6787_s13] sm:$0xff]  ;;  %v1095_v35 = vld [vmem:[#allocation3 + $0x478] sm:$0xff]  ;;  %v1093_v38 = vld [vmem:[#allocation3 + $0x468] sm:$0xff]  ;;  %s8328_s13 = sld [smem:[#allocation20_spill]] }
 0x215   :  { %v1015_v61 = vsel %vm1012_vm3, %v1005_v42, %v1007_v41  ;;  %v1094_v39 = vld [vmem:[#allocation3 + $0x470] sm:$0xff] }
 0x216   :  { %1360 = vrot.lane.b32.xlu1 %v7324_v18, %s6756_s5  ;;  %1358 = vrot.lane.b32.xlu0 %v7329_v19, %s6756_s5  ;;  %v1021_v17 = vmul.f32 %v1017_v11, %v1015_v61 }
 0x217   :  { %5793 = vmatprep.subr.bf16.mxu0 %v5792_v43  ;;  %5889 = vmatprep.subr.bf16.mxu1 %v5888_v44 }
 0x218   :  { %5795 = vmatpush1.bf16.msra.mxu0 %v5794_v46  ;;  %5891 = vmatpush1.bf16.msra.mxu1 %v5890_v45  ;;  %v1011_v47 = vpop.permute.xlu1 %1010  ;;  %v1009_v48 = vpop.permute.xlu0 %1008 }
 0x219   :  { %v1016_v53 = vsel %vm1012_vm3, %v1011_v47, %v1005_v42  ;;  %v1013_v56 = vsel %vm1012_vm3, %v1009_v48, %v1011_v47  ;;  %v1014_v57 = vsel %vm1012_vm3, %v1007_v41, %v1009_v48 }
 0x21a   :  { %1381 = vrot.lane.b32.xlu1 %v7341_v36, %s6757_s25  ;;  %1379 = vrot.lane.b32.xlu0 %v7345_v37, %s6757_s25  ;;  %v1024_v6 = vmul.f32 %v1020_v50, %v1016_v53  ;;  %v1022_v2 = vmul.f32 %v1018_v54, %v1014_v57  ;;  %v1023_v0 = vmul.f32 %v1019_v55, %v1013_v56 }
 0x21b   :  { %1704 = vmatmul.mubr.f32.vlgmr.msra.gmra.mrb[0].mxu0 %v1429_v49  ;;  %1846 = vmatmul.mubr.f32.vlgmr.msra.gmra.mrb[0].mxu1 %v1429_v49 }
 0x21c   :  { %v1032_v51 = vpop.permute.xlu1 %1031  ;;  %v1030_v52 = vpop.permute.xlu0 %1029  ;;  %5081 = vmatprep.mubr.msk.f32.mxu0 %vm1635_vm4, %v1432_v58  ;;  %5082 = vmatprep.mubr.msk.f32.mxu1 %vm1635_vm4, %v1432_v58 }
 0x21d   :  { %v1040_v60 = vsel %vm1037_vm15, %v1030_v52, %v1032_v51 }
 0x21e   :  { %1385 = vrot.lane.b32.xlu1 %v7324_v18, %s6757_s25  ;;  %1383 = vrot.lane.b32.xlu0 %v7329_v19, %s6757_s25  ;;  %v1046_v12 = vmul.f32 %v1042_v59, %v1040_v60 }
 0x220   :  { %v1036_v8 = vpop.permute.xlu1 %1035  ;;  %v1034_v9 = vpop.permute.xlu0 %1033  ;;  %v5798_v25 = vpack.c.bf16 %v1046_v12, %v1021_v17 }
 0x221   :  { %v1041_v3 = vsel %vm1037_vm15, %v1036_v8, %v1030_v52  ;;  %v1038_v1 = vsel %vm1037_vm15, %v1034_v9, %v1036_v8  ;;  %v1039_v13 = vsel %vm1037_vm15, %v1032_v51, %v1034_v9  ;;  %v1119_v9 = vld [vmem:[#allocation3 + $0x490] sm:$0xff]  ;;  %vm1237_vm15 = vcmp.lt.s32.totalorder %v7067_v7, 93 }
 0x222   :  { %v1049_v14 = vmul.f32 %v1045_v62, %v1041_v3  ;;  %v1047_v15 = vmul.f32 %v1043_v63, %v1039_v13  ;;  %v1048_v16 = vmul.f32 %v1044_v5, %v1038_v1  ;;  %1406 = vrot.lane.b32.xlu1 %v7341_v36, %s6759_s10  ;;  %1404 = vrot.lane.b32.xlu0 %v7345_v37, %s6759_s10  ;;  %v1145_v3 = vld [vmem:[#allocation3 + $0x4b8] sm:$0xff]  ;;  %v1143_v1 = vld [vmem:[#allocation3 + $0x4a8] sm:$0xff]  ;;  %v1144_v13 = vld [vmem:[#allocation3 + $0x4b0] sm:$0xff] }
 0x224   :  { %v5894_v20 = vpack.c.bf16 %v1048_v16, %v1023_v0  ;;  %v1057_v21 = vpop.permute.xlu1 %1056  ;;  %v1055_v22 = vpop.permute.xlu0 %1054  ;;  %v5796_v23 = vpack.c.bf16 %v1047_v15, %v1022_v2  ;;  %v5892_v24 = vpack.c.bf16 %v1049_v14, %v1024_v6  ;;  %v1120_v6 = vld [vmem:[#allocation3 + $0x498] sm:$0xff]  ;;  %v1118_v0 = vld [vmem:[#allocation3 + $0x488] sm:$0xff]  ;;  %v1117_v14 = vld [vmem:[#allocation3 + $0x480] sm:$0xff] }
 0x225   :  { %v1065_v41 = vsel %vm1062_vm6, %v1055_v22, %v1057_v21 }
 0x226   :  { %1410 = vrot.lane.b32.xlu1 %v7324_v18, %s6759_s10  ;;  %1408 = vrot.lane.b32.xlu0 %v7329_v19, %s6759_s10  ;;  %v1092_v19 = vld [vmem:[#allocation3 + $0x460] sm:$0xff]  ;;  %v1071_v54 = vmul.f32 %v1067_v40, %v1065_v41  ;;  %v1168_v41 = vld [vmem:[#allocation3 + $0x4c8] sm:$0xff] }
 0x227   :  { %5797 = vmatprep.subr.bf16.mxu0 %v5796_v23  ;;  %5893 = vmatprep.subr.bf16.mxu1 %v5892_v24 }
 0x228   :  { %5799 = vmatpush1.bf16.msra.mxu0 %v5798_v25  ;;  %5895 = vmatpush1.bf16.msra.mxu1 %v5894_v20  ;;  %v1061_v27 = vpop.permute.xlu1 %1060  ;;  %v1059_v36 = vpop.permute.xlu0 %1058 }
 0x229   :  { %v1066_v30 = vsel %vm1062_vm6, %v1061_v27, %v1055_v22  ;;  %v1064_v18 = vsel %vm1062_vm6, %v1057_v21, %v1059_v36  ;;  %v1063_v34 = vsel %vm1062_vm6, %v1059_v36, %v1061_v27  ;;  %vm1287_vm6 = vcmp.lt.s32.totalorder %v7067_v7, 82 }
 0x22a   :  { %1632 = vperm.xlu0 %6492, %v1629_v26   ;;  %v1074_v42 = vmul.f32 %v1070_v29, %v1066_v30  ;;  %v1072_v43 = vmul.f32 %v1068_v31, %v1064_v18  ;;  %v1073_v50 = vmul.f32 %v1069_v32, %v1063_v34 }
 0x22c   :  { %v1082_v37 = vpop.permute.xlu1 %1081  ;;  %v1080_v28 = vpop.permute.xlu0 %1079 }
 0x22d   :  { %v1090_v33 = vsel %vm1087_vm5, %v1080_v28, %v1082_v37 }
 0x22e   :  { %v1096_v46 = vmul.f32 %v1092_v19, %v1090_v33 }
 0x230   :  { %v1086_v44 = vpop.permute.xlu1 %1085  ;;  %v1084_v45 = vpop.permute.xlu0 %1083  ;;  %v5802_v60 = vpack.c.bf16 %v1096_v46, %v1071_v54 }
 0x231   :  { %v1091_v47 = vsel %vm1087_vm5, %v1086_v44, %v1080_v28  ;;  %v1088_v48 = vsel %vm1087_vm5, %v1084_v45, %v1086_v44  ;;  %v1089_v49 = vsel %vm1087_vm5, %v1082_v37, %v1084_v45  ;;  %v1192_v44 = vld [vmem:[#allocation3 + $0x4e0] sm:$0xff]  ;;  %vm1212_vm5 = vcmp.lt.s32.totalorder %v7067_v7, 94 }
 0x232   :  { %v1099_v51 = vmul.f32 %v1095_v35, %v1091_v47  ;;  %v1097_v52 = vmul.f32 %v1093_v38, %v1089_v49  ;;  %v1098_v53 = vmul.f32 %v1094_v39, %v1088_v48  ;;  %v1170_v39 = vld [vmem:[#allocation3 + $0x4d8] sm:$0xff]  ;;  %v1193_v48 = vld [vmem:[#allocation3 + $0x4e8] sm:$0xff]  ;;  %v1194_v49 = vld [vmem:[#allocation3 + $0x4f0] sm:$0xff] }
 0x233   :  { %v1195_v47 = vld [vmem:[#allocation3 + $0x4f8] sm:$0xff] }
 0x234   :  { %v5898_v55 = vpack.c.bf16 %v1098_v53, %v1073_v50  ;;  %v1107_v56 = vpop.permute.xlu1 %1106  ;;  %v1105_v57 = vpop.permute.xlu0 %1104  ;;  %v5800_v58 = vpack.c.bf16 %v1097_v52, %v1072_v43  ;;  %v5896_v59 = vpack.c.bf16 %v1099_v51, %v1074_v42  ;;  %v1169_v43 = vld [vmem:[#allocation3 + $0x4d0] sm:$0xff]  ;;  %v1167_v50 = vld [vmem:[#allocation3 + $0x4c0] sm:$0xff] }
 0x235   :  { %v1115_v15 = vsel %vm1112_vm10, %v1105_v57, %v1107_v56 }
 0x236   :  { %5801 = vmatprep.subr.bf16.mxu0 %v5800_v58  ;;  %5897 = vmatprep.subr.bf16.mxu1 %v5896_v59  ;;  %v1121_v28 = vmul.f32 %v1117_v14, %v1115_v15  ;;  %v1218_v15 = vld [vmem:[#allocation3 + $0x508] sm:$0xff] }
 0x237   :  { %5803 = vmatpush1.bf16.msra.mxu0 %v5802_v60  ;;  %5899 = vmatpush1.bf16.msra.mxu1 %v5898_v55 }
 0x238   :  { %v1111_v61 = vpop.permute.xlu1 %1110  ;;  %v1109_v62 = vpop.permute.xlu0 %1108 }
 0x239   :  { %v1116_v2 = vsel %vm1112_vm10, %v1111_v61, %v1105_v57  ;;  %v1114_v8 = vsel %vm1112_vm10, %v1107_v56, %v1109_v62  ;;  %v1113_v12 = vsel %vm1112_vm10, %v1109_v62, %v1111_v61  ;;  %vm1337_vm10 = vcmp.lt.s32.totalorder %v7067_v7, 80 }
 0x23a   :  { %v1124_v16 = vmul.f32 %v1120_v6, %v1116_v2  ;;  %v1122_v17 = vmul.f32 %v1118_v0, %v1114_v8  ;;  %v1123_v26 = vmul.f32 %v1119_v9, %v1113_v12 }
 0x23c   :  { %v1132_v63 = vpop.permute.xlu1 %1131  ;;  %v1130_v5 = vpop.permute.xlu0 %1129 }
 0x23d   :  { %v1140_v11 = vsel %vm1137_vm9, %v1130_v5, %v1132_v63 }
 0x23e   :  { %v1146_v22 = vmul.f32 %v1142_v10, %v1140_v11 }
 0x240   :  { %v1136_v20 = vpop.permute.xlu1 %1135  ;;  %v1134_v21 = vpop.permute.xlu0 %1133  ;;  %v5806_v19 = vpack.c.bf16 %v1146_v22, %v1121_v28 }
 0x241   :  { %v1141_v23 = vsel %vm1137_vm9, %v1136_v20, %v1130_v5  ;;  %v1138_v24 = vsel %vm1137_vm9, %v1134_v21, %v1136_v20  ;;  %v1139_v25 = vsel %vm1137_vm9, %v1132_v63, %v1134_v21  ;;  %v1242_v20 = vld [vmem:[#allocation3 + $0x520] sm:$0xff]  ;;  %vm1262_vm9 = vcmp.lt.s32.totalorder %v7067_v7, 83 }
 0x242   :  { %v1149_v27 = vmul.f32 %v1145_v3, %v1141_v23  ;;  %v1147_v36 = vmul.f32 %v1143_v1, %v1139_v25  ;;  %v1148_v37 = vmul.f32 %v1144_v13, %v1138_v24  ;;  %v1220_v13 = vld [vmem:[#allocation3 + $0x518] sm:$0xff]  ;;  %v1243_v24 = vld [vmem:[#allocation3 + $0x528] sm:$0xff]  ;;  %v1244_v25 = vld [vmem:[#allocation3 + $0x530] sm:$0xff] }
 0x243   :  { %v1245_v23 = vld [vmem:[#allocation3 + $0x538] sm:$0xff] }
 0x244   :  { %v5902_v29 = vpack.c.bf16 %v1148_v37, %v1123_v26  ;;  %v1157_v30 = vpop.permute.xlu1 %1156  ;;  %v1155_v31 = vpop.permute.xlu0 %1154  ;;  %v5804_v18 = vpack.c.bf16 %v1147_v36, %v1122_v17  ;;  %v5900_v32 = vpack.c.bf16 %v1149_v27, %v1124_v16  ;;  %v1219_v17 = vld [vmem:[#allocation3 + $0x510] sm:$0xff]  ;;  %v1217_v26 = vld [vmem:[#allocation3 + $0x500] sm:$0xff] }
 0x245   :  { %v1165_v51 = vsel %vm1162_vm12, %v1155_v31, %v1157_v30 }
 0x246   :  { %5805 = vmatprep.subr.bf16.mxu0 %v5804_v18  ;;  %5901 = vmatprep.subr.bf16.mxu1 %v5900_v32  ;;  %v1171_v5 = vmul.f32 %v1167_v50, %v1165_v51  ;;  %v1268_v51 = vld [vmem:[#allocation3 + $0x548] sm:$0xff] }
 0x247   :  { %5807 = vmatpush1.bf16.msra.mxu0 %v5806_v19  ;;  %5903 = vmatpush1.bf16.msra.mxu1 %v5902_v29 }
 0x248   :  { %v1161_v33 = vpop.permute.xlu1 %1160  ;;  %v1159_v34 = vpop.permute.xlu0 %1158 }
 0x249   :  { %v1166_v40 = vsel %vm1162_vm12, %v1161_v33, %v1155_v31  ;;  %v1164_v42 = vsel %vm1162_vm12, %v1157_v30, %v1159_v34  ;;  %v1163_v46 = vsel %vm1162_vm12, %v1159_v34, %v1161_v33  ;;  %vm1387_vm12 = vcmp.lt.s32.totalorder %v7067_v7, 78 }
 0x24a   :  { %v1174_v52 = vmul.f32 %v1170_v39, %v1166_v40  ;;  %v1172_v53 = vmul.f32 %v1168_v41, %v1164_v42  ;;  %v1173_v60 = vmul.f32 %v1169_v43, %v1163_v46 }
 0x24c   :  { %v1182_v35 = vpop.permute.xlu1 %1181  ;;  %v1180_v38 = vpop.permute.xlu0 %1179 }
 0x24d   :  { %v1190_v45 = vsel %vm1187_vm11, %v1180_v38, %v1182_v35 }
 0x24e   :  { %v1196_v56 = vmul.f32 %v1192_v44, %v1190_v45 }
 0x250   :  { %v1186_v54 = vpop.permute.xlu1 %1185  ;;  %v1184_v55 = vpop.permute.xlu0 %1183  ;;  %v5810_v10 = vpack.c.bf16 %v1196_v56, %v1171_v5 }
 0x251   :  { %v1191_v57 = vsel %vm1187_vm11, %v1186_v54, %v1180_v38  ;;  %v1188_v58 = vsel %vm1187_vm11, %v1184_v55, %v1186_v54  ;;  %v1189_v59 = vsel %vm1187_vm11, %v1182_v35, %v1184_v55  ;;  %v1292_v54 = vld [vmem:[#allocation3 + $0x560] sm:$0xff]  ;;  %vm1312_vm11 = vcmp.lt.s32.totalorder %v7067_v7, 81 }
 0x252   :  { %v1199_v61 = vmul.f32 %v1195_v47, %v1191_v57  ;;  %v1197_v62 = vmul.f32 %v1193_v48, %v1189_v59  ;;  %v1198_v63 = vmul.f32 %v1194_v49, %v1188_v58  ;;  %v1270_v49 = vld [vmem:[#allocation3 + $0x558] sm:$0xff]  ;;  %v1293_v58 = vld [vmem:[#allocation3 + $0x568] sm:$0xff]  ;;  %v1294_v59 = vld [vmem:[#allocation3 + $0x570] sm:$0xff] }
 0x253   :  { %v1295_v57 = vld [vmem:[#allocation3 + $0x578] sm:$0xff] }
 0x254   :  { %v5906_v6 = vpack.c.bf16 %v1198_v63, %v1173_v60  ;;  %v1207_v2 = vpop.permute.xlu1 %1206  ;;  %v1205_v0 = vpop.permute.xlu0 %1204  ;;  %v5808_v8 = vpack.c.bf16 %v1197_v62, %v1172_v53  ;;  %v5904_v9 = vpack.c.bf16 %v1199_v61, %v1174_v52  ;;  %v1269_v53 = vld [vmem:[#allocation3 + $0x550] sm:$0xff]  ;;  %v1267_v60 = vld [vmem:[#allocation3 + $0x540] sm:$0xff] }
 0x255   :  { %v1215_v27 = vsel %vm1212_vm5, %v1205_v0, %v1207_v2 }
 0x256   :  { %5809 = vmatprep.subr.bf16.mxu0 %v5808_v8  ;;  %5905 = vmatprep.subr.bf16.mxu1 %v5904_v9  ;;  %v1221_v38 = vmul.f32 %v1217_v26, %v1215_v27  ;;  %v1318_v27 = vld [vmem:[#allocation3 + $0x588] sm:$0xff] }
 0x257   :  { %5811 = vmatpush1.bf16.msra.mxu0 %v5810_v10  ;;  %5907 = vmatpush1.bf16.msra.mxu1 %v5906_v6 }
 0x258   :  { %v1211_v11 = vpop.permute.xlu1 %1210  ;;  %v1209_v12 = vpop.permute.xlu0 %1208 }
 0x259   :  { %v1216_v14 = vsel %vm1212_vm5, %v1211_v11, %v1205_v0  ;;  %v1214_v16 = vsel %vm1212_vm5, %v1207_v2, %v1209_v12  ;;  %v1213_v22 = vsel %vm1212_vm5, %v1209_v12, %v1211_v11  ;;  %vm1412_vm5 = vcmp.lt.s32.totalorder %v7067_v7, 77 }
 0x25a   :  { %v1224_v36 = vmul.f32 %v1220_v13, %v1216_v14  ;;  %v1222_v37 = vmul.f32 %v1218_v15, %v1214_v16  ;;  %v1223_v19 = vmul.f32 %v1219_v17, %v1213_v22 }
 0x25c   :  { %v1232_v3 = vpop.permute.xlu1 %1231  ;;  %v1230_v1 = vpop.permute.xlu0 %1229 }
 0x25d   :  { %v1240_v21 = vsel %vm1237_vm15, %v1230_v1, %v1232_v3 }
 0x25e   :  { %v1246_v30 = vmul.f32 %v1242_v20, %v1240_v21 }
 0x260   :  { %v1236_v28 = vpop.permute.xlu1 %1235  ;;  %v1234_v29 = vpop.permute.xlu0 %1233  ;;  %v5814_v44 = vpack.c.bf16 %v1246_v30, %v1221_v38 }
 0x261   :  { %v1241_v31 = vsel %vm1237_vm15, %v1236_v28, %v1230_v1  ;;  %v1238_v18 = vsel %vm1237_vm15, %v1234_v29, %v1236_v28  ;;  %v1239_v32 = vsel %vm1237_vm15, %v1232_v3, %v1234_v29  ;;  %v1342_v28 = vld [vmem:[#allocation3 + $0x5a0] sm:$0xff]  ;;  %vm1362_vm15 = vcmp.lt.s32.totalorder %v7067_v7, 79 }
 0x262   :  { %v1249_v33 = vmul.f32 %v1245_v23, %v1241_v31  ;;  %v1247_v34 = vmul.f32 %v1243_v24, %v1239_v32  ;;  %v1248_v35 = vmul.f32 %v1244_v25, %v1238_v18  ;;  %v1320_v25 = vld [vmem:[#allocation3 + $0x598] sm:$0xff]  ;;  %v1343_v18 = vld [vmem:[#allocation3 + $0x5a8] sm:$0xff]  ;;  %v1344_v32 = vld [vmem:[#allocation3 + $0x5b0] sm:$0xff] }
 0x263   :  { %v1345_v31 = vld [vmem:[#allocation3 + $0x5b8] sm:$0xff] }
 0x264   :  { %v5910_v39 = vpack.c.bf16 %v1248_v35, %v1223_v19  ;;  %v1257_v40 = vpop.permute.xlu1 %1256  ;;  %v1255_v41 = vpop.permute.xlu0 %1254  ;;  %v5812_v42 = vpack.c.bf16 %v1247_v34, %v1222_v37  ;;  %v5908_v43 = vpack.c.bf16 %v1249_v33, %v1224_v36  ;;  %v1319_v37 = vld [vmem:[#allocation3 + $0x590] sm:$0xff]  ;;  %v1317_v19 = vld [vmem:[#allocation3 + $0x580] sm:$0xff] }
 0x265   :  { %v1265_v61 = vsel %vm1262_vm9, %v1255_v41, %v1257_v40 }
 0x266   :  { %5813 = vmatprep.subr.bf16.mxu0 %v5812_v42  ;;  %5909 = vmatprep.subr.bf16.mxu1 %v5908_v43  ;;  %v1271_v1 = vmul.f32 %v1267_v60, %v1265_v61  ;;  %v1368_v61 = vld [vmem:[#allocation3 + $0x5c8] sm:$0xff] }
 0x267   :  { %5815 = vmatpush1.bf16.msra.mxu0 %v5814_v44  ;;  %5911 = vmatpush1.bf16.msra.mxu1 %v5910_v39 }
 0x268   :  { %v1261_v45 = vpop.permute.xlu1 %1260  ;;  %v1259_v46 = vpop.permute.xlu0 %1258 }
 0x269   :  { %v1266_v50 = vsel %vm1262_vm9, %v1261_v45, %v1255_v41  ;;  %v1264_v52 = vsel %vm1262_vm9, %v1257_v40, %v1259_v46  ;;  %v1263_v56 = vsel %vm1262_vm9, %v1259_v46, %v1261_v45  ;;  %vm2458_vm9 = vcmask 1041408  }
 0x26a   :  { %v1274_v62 = vmul.f32 %v1270_v49, %v1266_v50  ;;  %v1272_v63 = vmul.f32 %v1268_v51, %v1264_v52  ;;  %v1273_v10 = vmul.f32 %v1269_v53, %v1263_v56 }
 0x26c   :  { %v1282_v47 = vpop.permute.xlu1 %1281  ;;  %v1280_v48 = vpop.permute.xlu0 %1279 }
 0x26d   :  { %v1290_v55 = vsel %vm1287_vm6, %v1280_v48, %v1282_v47 }
 0x26e   :  { %v1296_v2 = vmul.f32 %v1292_v54, %v1290_v55 }
 0x270   :  { %v1286_v5 = vpop.permute.xlu1 %1285  ;;  %v1284_v6 = vpop.permute.xlu0 %1283  ;;  %v5818_v20 = vpack.c.bf16 %v1296_v2, %v1271_v1 }
 0x271   :  { %v1291_v0 = vsel %vm1287_vm6, %v1286_v5, %v1280_v48  ;;  %v1288_v8 = vsel %vm1287_vm6, %v1284_v6, %v1286_v5  ;;  %v1289_v9 = vsel %vm1287_vm6, %v1282_v47, %v1284_v6  ;;  %v1392_v5 = vld [vmem:[#allocation3 + $0x5e0] sm:$0xff]  ;;  %vm6761_vm6 = vmmov 0  }
 0x272   :  { %v1299_v11 = vmul.f32 %v1295_v57, %v1291_v0  ;;  %v1297_v12 = vmul.f32 %v1293_v58, %v1289_v9  ;;  %v1298_v3 = vmul.f32 %v1294_v59, %v1288_v8  ;;  %v1370_v59 = vld [vmem:[#allocation3 + $0x5d8] sm:$0xff]  ;;  %v1393_v8 = vld [vmem:[#allocation3 + $0x5e8] sm:$0xff]  ;;  %v1394_v9 = vld [vmem:[#allocation3 + $0x5f0] sm:$0xff] }
 0x273   :  { %v1395_v0 = vld [vmem:[#allocation3 + $0x5f8] sm:$0xff] }
 0x274   :  { %v5914_v13 = vpack.c.bf16 %v1298_v3, %v1273_v10  ;;  %v1307_v14 = vpop.permute.xlu1 %1306  ;;  %v1305_v15 = vpop.permute.xlu0 %1304  ;;  %v5816_v16 = vpack.c.bf16 %v1297_v12, %v1272_v63  ;;  %v5912_v17 = vpack.c.bf16 %v1299_v11, %v1274_v62  ;;  %v1369_v63 = vld [vmem:[#allocation3 + $0x5d0] sm:$0xff]  ;;  %v1367_v10 = vld [vmem:[#allocation3 + $0x5c0] sm:$0xff] }
 0x275   :  { %v1315_v33 = vsel %vm1312_vm11, %v1305_v15, %v1307_v14 }
 0x276   :  { %5817 = vmatprep.subr.bf16.mxu0 %v5816_v16  ;;  %5913 = vmatprep.subr.bf16.mxu1 %v5912_v17  ;;  %v1321_v48 = vmul.f32 %v1317_v19, %v1315_v33  ;;  %v1940_v19 = vld [vmem:[%s6872_s20 + $0x88] sm:$0xff]  ;;  %v1971_v33 = vld [vmem:[%s6872_s20 + $0x180] sm:$0xff] }
 0x277   :  { %5819 = vmatpush1.bf16.msra.mxu0 %v5818_v20  ;;  %5915 = vmatpush1.bf16.msra.mxu1 %v5914_v13 }
 0x278   :  { %v1311_v21 = vpop.permute.xlu1 %1310  ;;  %v1309_v22 = vpop.permute.xlu0 %1308 }
 0x279   :  { %v1316_v26 = vsel %vm1312_vm11, %v1311_v21, %v1305_v15  ;;  %v1314_v36 = vsel %vm1312_vm11, %v1307_v14, %v1309_v22  ;;  %v1313_v30 = vsel %vm1312_vm11, %v1309_v22, %v1311_v21 }
 0x27a   :  { %v1324_v34 = vmul.f32 %v1320_v25, %v1316_v26  ;;  %v1322_v35 = vmul.f32 %v1318_v27, %v1314_v36  ;;  %v1323_v44 = vmul.f32 %v1319_v37, %v1313_v30  ;;  %v1420_v30 = vld [vmem:[#allocation3 + $0x618] sm:$0xff] }
 0x27c   :  { %v1332_v23 = vpop.permute.xlu1 %1331  ;;  %v1330_v24 = vpop.permute.xlu0 %1329 }
 0x27d   :  { %v1340_v29 = vsel %vm1337_vm10, %v1330_v24, %v1332_v23 }
 0x27e   :  { %v1346_v40 = vmul.f32 %v1342_v28, %v1340_v29  ;;  %v1417_v29 = vld [vmem:[#allocation3 + $0x600] sm:$0xff] }
 0x280   :  { %v1336_v38 = vpop.permute.xlu1 %1335  ;;  %v1334_v39 = vpop.permute.xlu0 %1333  ;;  %v5822_v54 = vpack.c.bf16 %v1346_v40, %v1321_v48  ;;  %v1923_v40 = vld [vmem:[%s6872_s20] sm:$0xff] }
 0x281   :  { %v1341_v41 = vsel %vm1337_vm10, %v1336_v38, %v1330_v24  ;;  %v1338_v42 = vsel %vm1337_vm10, %v1334_v39, %v1336_v38  ;;  %v1339_v43 = vsel %vm1337_vm10, %v1332_v23, %v1334_v39  ;;  %v1972_v39 = vld [vmem:[%s6872_s20 + $0x188] sm:$0xff]  ;;  %vm2454_vm10 = vcmask 15360  }
 0x282   :  { %v1349_v45 = vmul.f32 %v1345_v31, %v1341_v41  ;;  %v1347_v46 = vmul.f32 %v1343_v18, %v1339_v43  ;;  %v1348_v47 = vmul.f32 %v1344_v32, %v1338_v42  ;;  %v1418_v31 = vld [vmem:[#allocation3 + $0x608] sm:$0xff]  ;;  %v1419_v18 = vld [vmem:[#allocation3 + $0x610] sm:$0xff]  ;;  %v1939_v32 = vld [vmem:[%s6872_s20 + $0x80] sm:$0xff] }
 0x283   :  { %v1924_v41 = vld [vmem:[%s6872_s20 + $0x8] sm:$0xff] }
 0x284   :  { %v5918_v49 = vpack.c.bf16 %v1348_v47, %v1323_v44  ;;  %v1357_v50 = vpop.permute.xlu1 %1356  ;;  %v1355_v51 = vpop.permute.xlu0 %1354  ;;  %v5820_v52 = vpack.c.bf16 %v1347_v46, %v1322_v35  ;;  %v5916_v53 = vpack.c.bf16 %v1349_v45, %v1324_v34  ;;  %v1955_v45 = vld [vmem:[%s6872_s20 + $0x100] sm:$0xff]  ;;  %v1956_v46 = vld [vmem:[%s6872_s20 + $0x108] sm:$0xff]  ;;  %v1941_v47 = vld [vmem:[%s6872_s20 + $0x90] sm:$0xff] }
 0x285   :  { %v1365_v11 = vsel %vm1362_vm15, %v1355_v51, %v1357_v50 }
 0x286   :  { %5821 = vmatprep.subr.bf16.mxu0 %v5820_v52  ;;  %5917 = vmatprep.subr.bf16.mxu1 %v5916_v53  ;;  %v1371_v24 = vmul.f32 %v1367_v10, %v1365_v11  ;;  %v1973_v52 = vld [vmem:[%s6872_s20 + $0x190] sm:$0xff]  ;;  %v1974_v53 = vld [vmem:[%s6872_s20 + $0x198] sm:$0xff] }
 0x287   :  { %5823 = vmatpush1.bf16.msra.mxu0 %v5822_v54  ;;  %5919 = vmatpush1.bf16.msra.mxu1 %v5918_v49 }
 0x288   :  { %v1361_v55 = vpop.permute.xlu1 %1360  ;;  %v1359_v56 = vpop.permute.xlu0 %1358 }
 0x289   :  { %v1366_v60 = vsel %vm1362_vm15, %v1361_v55, %v1355_v51  ;;  %v1364_v62 = vsel %vm1362_vm15, %v1357_v50, %v1359_v56  ;;  %v1363_v2 = vsel %vm1362_vm15, %v1359_v56, %v1361_v55  ;;  %v1942_v51 = vld [vmem:[%s6872_s20 + $0x98] sm:$0xff]  ;;  %v1431_v55 = vld [vmem:[%s6782_s9 + $0x10] sm:$0xff]  ;;  %v7646_v56 = vpack.c.bf16 %v1940_v19, %v1939_v32  ;;  %v1931_v19 = vld [vmem:[%s6872_s20 + $0x40] sm:$0xff]  ;;  %s8327_s9 = sld [smem:[#allocation19_spill]] }
 0x28a   :  { %v1374_v12 = vmul.f32 %v1370_v59, %v1366_v60  ;;  %v1372_v3 = vmul.f32 %v1368_v61, %v1364_v62  ;;  %v1373_v20 = vmul.f32 %v1369_v63, %v1363_v2  ;;  %v7652_v59 = vpack.c.bf16 %v1956_v46, %v1955_v45  ;;  %v1925_v60 = vld [vmem:[%s6872_s20 + $0x10] sm:$0xff]  ;;  %v1926_v61 = vld [vmem:[%s6872_s20 + $0x18] sm:$0xff]  ;;  %v1943_v2 = vld [vmem:[%s6872_s20 + $0xa0] sm:$0xff] }
 0x28b   :  { %v7656_v62 = vpack.c.bf16 %v1942_v51, %v1941_v47  ;;  %v7658_v63 = vpack.c.bf16 %v1974_v53, %v1973_v52  ;;  %v7670_v10 = vpack.c.bf16 %v1926_v61, %v1925_v60  ;;  %v1933_v46 = vld [vmem:[%s6872_s20 + $0x50] sm:$0xff]  ;;  %v1934_v47 = vld [vmem:[%s6872_s20 + $0x58] sm:$0xff]  ;;  %v1951_v52 = vld [vmem:[%s6872_s20 + $0xe0] sm:$0xff] }
 0x28c   :  { %v1382_v57 = vpop.permute.xlu1 %1381  ;;  %v1380_v58 = vpop.permute.xlu0 %1379  ;;  %v1966_v51 = vld [vmem:[%s6872_s20 + $0x158] sm:$0xff]  ;;  %v1952_v53 = vld [vmem:[%s6872_s20 + $0xe8] sm:$0xff]  ;;  %v7750_v60 = vpack.c.bf16 %v1934_v47, %v1933_v46  ;;  %v6762_v47 = vmov 1983009808  }
 0x28d   :  { %v1390_v6 = vsel %vm1387_vm12, %v1380_v58, %v1382_v57 }
 0x28e   :  { %v1396_v14 = vmul.f32 %v1392_v5, %v1390_v6  ;;  %v1957_v5 = vld [vmem:[%s6872_s20 + $0x110] sm:$0xff]  ;;  %v1958_v6 = vld [vmem:[%s6872_s20 + $0x118] sm:$0xff] }
 0x28f   :  { %v7672_v11 = vpack.c.bf16 %v1958_v6, %v1957_v5  ;;  %v1935_v5 = vld [vmem:[%s6872_s20 + $0x60] sm:$0xff]  ;;  %v7757_v6 = vpack.c.bf16 %v1952_v53, %v1951_v52 }
 0x290   :  { %v1386_v1 = vpop.permute.xlu1 %1385  ;;  %v1384_v13 = vpop.permute.xlu0 %1383  ;;  %v5826_v28 = vpack.c.bf16 %v1396_v14, %v1371_v24  ;;  %v1959_v14 = vld [vmem:[%s6872_s20 + $0x120] sm:$0xff]  ;;  %v1929_v24 = vld [vmem:[%s6872_s20 + $0x30] sm:$0xff] }
 0x291   :  { %v1391_v15 = vsel %vm1387_vm12, %v1386_v1, %v1380_v58  ;;  %v1388_v16 = vsel %vm1387_vm12, %v1384_v13, %v1386_v1  ;;  %v1389_v17 = vsel %vm1387_vm12, %v1382_v57, %v1384_v13  ;;  %v7648_v57 = vpack.c.bf16 %v1972_v39, %v1971_v33  ;;  %v1932_v33 = vld [vmem:[%s6872_s20 + $0x48] sm:$0xff] }
 0x292   :  { %v1399_v21 = vmul.f32 %v1395_v0, %v1391_v15  ;;  %v1397_v22 = vmul.f32 %v1393_v8, %v1389_v17  ;;  %v1398_v23 = vmul.f32 %v1394_v9, %v1388_v16  ;;  %v7650_v58 = vpack.c.bf16 %v1924_v41, %v1923_v40  ;;  %v1944_v0 = vld [vmem:[%s6872_s20 + $0xa8] sm:$0xff]  ;;  %v1975_v8 = vld [vmem:[%s6872_s20 + $0x1a0] sm:$0xff]  ;;  %v1945_v16 = vld [vmem:[%s6872_s20 + $0xb0] sm:$0xff] }
 0x293   :  { %v1976_v9 = vld [vmem:[%s6872_s20 + $0x1a8] sm:$0xff]  ;;  %v7678_v1 = vpack.c.bf16 %v1944_v0, %v1943_v2  ;;  %v1946_v17 = vld [vmem:[%s6872_s20 + $0xb8] sm:$0xff]  ;;  %v1949_v40 = vld [vmem:[%s6872_s20 + $0xd0] sm:$0xff] }
 0x294   :  { %v5922_v25 = vpack.c.bf16 %v1398_v23, %v1373_v20  ;;  %v1407_v26 = vpop.permute.xlu1 %1406  ;;  %v1405_v27 = vpop.permute.xlu0 %1404  ;;  %v5824_v36 = vpack.c.bf16 %v1397_v22, %v1372_v3  ;;  %v5920_v37 = vpack.c.bf16 %v1399_v21, %v1374_v12  ;;  %v1927_v12 = vld [vmem:[%s6872_s20 + $0x20] sm:$0xff]  ;;  %v1928_v3 = vld [vmem:[%s6872_s20 + $0x28] sm:$0xff]  ;;  %v7680_v13 = vpack.c.bf16 %v1976_v9, %v1975_v8  ;;  %v1977_v20 = vld [vmem:[%s6872_s20 + $0x1b0] sm:$0xff] }
 0x295   :  { %v1415_v34 = vsel %vm1412_vm5, %v1405_v27, %v1407_v26  ;;  %v1960_v15 = vld [vmem:[%s6872_s20 + $0x128] sm:$0xff]  ;;  %v1978_v21 = vld [vmem:[%s6872_s20 + $0x1b8] sm:$0xff]  ;;  %v7690_v22 = vpack.c.bf16 %v1928_v3, %v1927_v12  ;;  %v1967_v8 = vld [vmem:[%s6872_s20 + $0x160] sm:$0xff] }
 0x296   :  { %5825 = vmatprep.subr.bf16.mxu0 %v5824_v36  ;;  %5921 = vmatprep.subr.bf16.mxu1 %v5920_v37  ;;  %v1421_v54 = vmul.f32 %v1417_v29, %v1415_v34  ;;  %v7692_v23 = vpack.c.bf16 %v1960_v15, %v1959_v14  ;;  %v1961_v36 = vld [vmem:[%s6872_s20 + $0x130] sm:$0xff]  ;;  %v1962_v37 = vld [vmem:[%s6872_s20 + $0x138] sm:$0xff]  ;;  %v1948_v29 = vld [vmem:[%s6872_s20 + $0xc8] sm:$0xff] }
 0x297   :  { %5827 = vmatpush1.bf16.msra.mxu0 %v5826_v28  ;;  %5923 = vmatpush1.bf16.msra.mxu1 %v5922_v25  ;;  %v1930_v25 = vld [vmem:[%s6872_s20 + $0x38] sm:$0xff]  ;;  %v1947_v28 = vld [vmem:[%s6872_s20 + $0xc0] sm:$0xff]  ;;  %v7712_v32 = vpack.c.bf16 %v1962_v37, %v1961_v36  ;;  %v1964_v39 = vld [vmem:[%s6872_s20 + $0x148] sm:$0xff] }
 0x298   :  { %v1411_v35 = vpop.permute.xlu1 %1410  ;;  %v1409_v38 = vpop.permute.xlu0 %1408  ;;  %v7718_v34 = vpack.c.bf16 %v1948_v29, %v1947_v28  ;;  %v1950_v41 = vld [vmem:[%s6872_s20 + $0xd8] sm:$0xff]  ;;  %v1936_v0 = vld [vmem:[%s6872_s20 + $0x68] sm:$0xff]  ;;  %v1953_v14 = vld [vmem:[%s6872_s20 + $0xf0] sm:$0xff] }
 0x299   :  { %v1416_v42 = vsel %vm1412_vm5, %v1411_v35, %v1405_v27  ;;  %v1413_v43 = vsel %vm1412_vm5, %v1409_v38, %v1411_v35  ;;  %v1414_v44 = vsel %vm1412_vm5, %v1407_v26, %v1409_v38  ;;  %v7698_v26 = vpack.c.bf16 %v1946_v17, %v1945_v16  ;;  %v1963_v38 = vld [vmem:[%s6872_s20 + $0x140] sm:$0xff]  ;;  %v1968_v9 = vld [vmem:[%s6872_s20 + $0x168] sm:$0xff]  ;;  %v1954_v15 = vld [vmem:[%s6872_s20 + $0xf8] sm:$0xff] }
 0x29a   :  { %v1424_v48 = vmul.f32 %v1420_v30, %v1416_v42  ;;  %v1422_v49 = vmul.f32 %v1418_v31, %v1414_v44  ;;  %v1423_v50 = vmul.f32 %v1419_v18, %v1413_v43  ;;  %v7700_v27 = vpack.c.bf16 %v1978_v21, %v1977_v20  ;;  %v1979_v30 = vld [vmem:[%s6872_s20 + $0x1c0] sm:$0xff]  ;;  %v1980_v31 = vld [vmem:[%s6872_s20 + $0x1c8] sm:$0xff]  ;;  %v1981_v42 = vld [vmem:[%s6872_s20 + $0x1d0] sm:$0xff] }
 0x29b   :  { %v7710_v18 = vpack.c.bf16 %v1930_v25, %v1929_v24  ;;  %v7720_v35 = vpack.c.bf16 %v1980_v31, %v1979_v30  ;;  %v1982_v43 = vld [vmem:[%s6872_s20 + $0x1d8] sm:$0xff]  ;;  %v7730_v44 = vpack.c.bf16 %v1932_v33, %v1931_v19  ;;  %v7732_v45 = vpack.c.bf16 %v1964_v39, %v1963_v38  ;;  %v1985_v16 = vld [vmem:[%s6872_s20 + $0x1f0] sm:$0xff] }
 0x29c   :  { %1742 = vmatprep.subr.mxu0 %v1422_v49  ;;  %1884 = vmatprep.subr.mxu1 %v1424_v48  ;;  %v7738_v48 = vpack.c.bf16 %v1950_v41, %v1949_v40  ;;  %v7740_v49 = vpack.c.bf16 %v1982_v43, %v1981_v42  ;;  %v7766_v12 = vpack.c.bf16 %v1936_v0, %v1935_v5  ;;  %v1986_v20 = vld [vmem:[%s6872_s20 + $0x1f8] sm:$0xff]  ;;  %v1937_v21 = vld [vmem:[%s6872_s20 + $0x70] sm:$0xff] }
 0x29d   :  { %1743 = vmatpush1.msra.mxu0 %v1421_v54  ;;  %1885 = vmatpush1.msra.mxu1 %v1423_v50  ;;  %v1965_v50 = vld [vmem:[%s6872_s20 + $0x150] sm:$0xff]  ;;  %v1983_v54 = vld [vmem:[%s6872_s20 + $0x1e0] sm:$0xff]  ;;  %v7768_v3 = vpack.c.bf16 %v1968_v9, %v1967_v8  ;;  %v5952_v17 = vpack.c.bf16 %v1954_v15, %v1953_v14  ;;  %v1938_v24 = vld [vmem:[%s6872_s20 + $0x78] sm:$0xff]  ;;  %v5984_v25 = vpack.c.bf16 %v1986_v20, %v1985_v16 }
 0x29e   :  { %1775 = vmatmul.mubr.f32.vlgmr.msra.gmra.mrb[0].mxu0 %v1431_v55  ;;  %1917 = vmatmul.mubr.f32.vlgmr.msra.gmra.mrb[0].mxu1 %v1431_v55  ;;  %v1984_v55 = vld [vmem:[%s6872_s20 + $0x1e8] sm:$0xff]  ;;  %v7752_v61 = vpack.c.bf16 %v1966_v51, %v1965_v50  ;;  %v5954_v36 = vpack.c.bf16 %v1938_v24, %v1937_v21  ;;  %v1969_v37 = vld [vmem:[%s6872_s20 + $0x170] sm:$0xff]  ;;  %v1970_v28 = vld [vmem:[%s6872_s20 + $0x178] sm:$0xff]  ;;  %v2442_v50 = vshrl.u32 %v231_v4, 7  ;;  %s8332_s20 = sld [smem:[#allocation21_spill]] }
 0x29f   :  { %5925 = vmatprep.subr.bf16.mxu0 %v7646_v56  ;;  %5957 = vmatprep.subr.bf16.mxu1 %v7648_v57  ;;  %v7759_v2 = vpack.c.bf16 %v1984_v55, %v1983_v54  ;;  %v5986_v29 = vpack.c.bf16 %v1970_v28, %v1969_v37  ;;  %v2435_v51 = vld [vmem:[#allocation5] sm:$0xff] }
 0x2a0   :  { %5927 = vmatpush3.bf16.msra.mxu0 %v7650_v58  ;;  %5959 = vmatpush3.bf16.msra.mxu1 %v7652_v59  ;;  %v2437_v53 = vcombine.high %v2435_v51, %v2435_v51 }
 0x2a1   :  { %5929 = vmatprep.subr.bf16.mxu0 %v7656_v62  ;;  %5961 = vmatprep.subr.bf16.mxu1 %v7658_v63 }
 0x2a4   :  { %5931 = vmatpush3.bf16.msra.mxu0 %v7670_v10  ;;  %5963 = vmatpush3.bf16.msra.mxu1 %v7672_v11 }
 0x2a5   :  { %5933 = vmatprep.subr.bf16.mxu0 %v7678_v1  ;;  %5965 = vmatprep.subr.bf16.mxu1 %v7680_v13 }
 0x2a8   :  { %5935 = vmatpush3.bf16.msra.mxu0 %v7690_v22  ;;  %5967 = vmatpush3.bf16.msra.mxu1 %v7692_v23 }
 0x2a9   :  { %5937 = vmatprep.subr.bf16.mxu0 %v7698_v26  ;;  %5969 = vmatprep.subr.bf16.mxu1 %v7700_v27  ;;  %v1633_v30 = vpop.permute.xlu0 %1632 }
 0x2ac   :  { %5939 = vmatpush3.bf16.msra.mxu0 %v7710_v18  ;;  %5971 = vmatpush3.bf16.msra.mxu1 %v7712_v32 }
 0x2ad   :  { %5941 = vmatprep.subr.bf16.mxu0 %v7718_v34  ;;  %5973 = vmatprep.subr.bf16.mxu1 %v7720_v35 }
 0x2b0   :  { %5943 = vmatpush3.bf16.msra.mxu0 %v7730_v44  ;;  %5975 = vmatpush3.bf16.msra.mxu1 %v7732_v45 }
 0x2b1   :  { %5945 = vmatprep.subr.bf16.mxu0 %v7738_v48  ;;  %5977 = vmatprep.subr.bf16.mxu1 %v7740_v49 }
 0x2b4   :  { %5947 = vmatpush3.bf16.msra.mxu0 %v7750_v60  ;;  %5979 = vmatpush3.bf16.msra.mxu1 %v7752_v61 }
 0x2b5   :  { %5949 = vmatprep.subr.bf16.mxu0 %v7757_v6  ;;  %5981 = vmatprep.subr.bf16.mxu1 %v7759_v2 }
 0x2b8   :  { %5951 = vmatpush3.bf16.msra.mxu0 %v7766_v12  ;;  %5983 = vmatpush3.bf16.msra.mxu1 %v7768_v3 }
 0x2b9   :  { %5953 = vmatprep.subr.bf16.mxu0 %v5952_v17  ;;  %5985 = vmatprep.subr.bf16.mxu1 %v5984_v25 }
 0x2bc   :  { %5955 = vmatpush3.bf16.msra.mxu0 %v5954_v36  ;;  %5987 = vmatpush3.bf16.msra.mxu1 %v5986_v29 }
 0x2bd   :  { %5989 = vmatprep.subr.bf16.mxu0 %v7646_v56  ;;  %6021 = vmatprep.subr.bf16.mxu1 %v7648_v57 }
 0x371   :  { %v1776_v31 = vpop.f32.mrb[0].mxu0  ;;  %v1918_v19 = vpop.f32.mrb[0].mxu1 }
 0x372   :  { %v1778_v33 = vpop.f32.mrb[1].mxu0  ;;  %v1920_v38 = vpop.f32.mrb[1].mxu1  ;;  %v7788_v41 = vadd.f32 %v1776_v31, %v1633_v30  ;;  %v7790_v42 = vadd.f32 %v1918_v19, %v1633_v30 }
 0x373   :  { %v7784_v39 = vadd.f32 %v1778_v33, %v1633_v30  ;;  %v7786_v40 = vadd.f32 %v1920_v38, %v1633_v30 }
 0x375   :  { %2051 = vmatprep.mubr.f32.mxu0 %v7784_v39  ;;  %2121 = vmatprep.mubr.f32.mxu1 %v7786_v40  ;;  %v2128_v56 = vmul.f32 %v7784_v39, %v7784_v39  ;;  %v2130_v57 = vmul.f32 %v7786_v40, %v7786_v40 }
 0x376   :  { %2052 = vmatmul.mubr.f32.vlgmr.msra.gmra.mrb[2].mxu0 %v7788_v41  ;;  %2122 = vmatmul.mubr.f32.vlgmr.msra.gmra.mrb[2].mxu1 %v7790_v42 }
 0x377   :  { %5991 = vmatpush3.bf16.msra.mxu0 %v7650_v58  ;;  %6023 = vmatpush3.bf16.msra.mxu1 %v7652_v59  ;;  %v2127_v58 = vmul.f32 %v7788_v41, %v7788_v41  ;;  %v2129_v59 = vmul.f32 %v7790_v42, %v7790_v42 }
 0x378   :  { %2195 = vmatprep.mubr.f32.mxu0 %v2128_v56  ;;  %2265 = vmatprep.mubr.f32.mxu1 %v2130_v57 }
 0x379   :  { %5993 = vmatprep.subr.bf16.mxu0 %v7656_v62  ;;  %6025 = vmatprep.subr.bf16.mxu1 %v7658_v63  ;;  %v6760_v62 = vmov 0.0   ;;  %v2420_v63 = vld [vmem:[%s6792_s17] sm:$0xff]  ;;  %s8329_s17 = sld [smem:[#allocation18_spill]] }
 0x37a   :  { %2423 = vperm.xlu1 %6493, %v2420_v63  }
 0x37b   :  { %5995 = vmatpush3.bf16.msra.mxu0 %v7670_v10  ;;  %6027 = vmatpush3.bf16.msra.mxu1 %v7672_v11  ;;  %v2427_v10 = vld [vmem:[%s6797_s21] sm:$0xff]  ;;  %s8330_s21 = sld [smem:[#allocation29_spill]] }
 0x37c   :  { %5997 = vmatprep.subr.bf16.mxu0 %v7678_v1  ;;  %6029 = vmatprep.subr.bf16.mxu1 %v7680_v13 }
 0x37e   :  { %2431 = vperm.xlu1 %6493, %v2427_v10  }
 0x37f   :  { %5999 = vmatpush3.bf16.msra.mxu0 %v7690_v22  ;;  %6031 = vmatpush3.bf16.msra.mxu1 %v7692_v23  ;;  %v2963_v7 = vld [vmem:[%s8329_s17 + $0x8] sm:$0xff] }
 0x380   :  { %6001 = vmatprep.subr.bf16.mxu0 %v7698_v26  ;;  %6033 = vmatprep.subr.bf16.mxu1 %v7700_v27 }
 0x383   :  { %6003 = vmatpush3.bf16.msra.mxu0 %v7710_v18  ;;  %6035 = vmatpush3.bf16.msra.mxu1 %v7712_v32  ;;  %v2271_v18 = vld [vmem:[%s6867_s24] sm:$0xff]  ;;  %s6764_s24 = smov 9  }
 0x384   :  { %6005 = vmatprep.subr.bf16.mxu0 %v7718_v34  ;;  %6037 = vmatprep.subr.bf16.mxu1 %v7720_v35 }
 0x387   :  { %6007 = vmatpush3.bf16.msra.mxu0 %v7730_v44  ;;  %6039 = vmatpush3.bf16.msra.mxu1 %v7732_v45 }
 0x388   :  { %6009 = vmatprep.subr.bf16.mxu0 %v7738_v48  ;;  %6041 = vmatprep.subr.bf16.mxu1 %v7740_v49  ;;  %v2439_v48 = vunpack.c.l.s4 %v6762_v47  ;;  %v2803_v47 = vld [vmem:[#allocation7 + $0x28] sm:$0xff] }
 0x38a   :  { %v2440_v49 = vunpack.c.0.s8 %v2439_v48 }
 0x38b   :  { %6011 = vmatpush3.bf16.msra.mxu0 %v7750_v60  ;;  %6043 = vmatpush3.bf16.msra.mxu1 %v7752_v61 }
 0x38c   :  { %6013 = vmatprep.subr.bf16.mxu0 %v7757_v6  ;;  %6045 = vmatprep.subr.bf16.mxu1 %v7759_v2  ;;  %v2443_v52 = vsub.s32 %v2440_v49, %v2442_v50 }
 0x38e   :  { %v2444_v54 = vrot.slane %v2435_v51, %v2443_v52  ;;  %v2451_v55 = vrot.slane %v2437_v53, %v2443_v52  ;;  %v2778_v51 = vld [vmem:[#allocation7] sm:$0xff]  ;;  %v2804_v53 = vld [vmem:[#allocation7 + $0x30] sm:$0xff] }
 0x38f   :  { %6015 = vmatpush3.bf16.msra.mxu0 %v7766_v12  ;;  %6047 = vmatpush3.bf16.msra.mxu1 %v7768_v3 }
 0x390   :  { %6017 = vmatprep.subr.bf16.mxu0 %v5952_v17  ;;  %6049 = vmatprep.subr.bf16.mxu1 %v5984_v25  ;;  %v2452_v60 = vcombine.high %v2444_v54, %v2444_v54  ;;  %v2453_v61 = vcombine.high %v2451_v55, %v2451_v55 }
 0x393   :  { %6019 = vmatpush3.bf16.msra.mxu0 %v5954_v36  ;;  %6051 = vmatpush3.bf16.msra.mxu1 %v5986_v29 }
 0x394   :  { %5522 = vmatprep.subr.mxu0 %v6760_v62  ;;  %5527 = vmatprep.subr.mxu1 %v6760_v62 }
 0x396   :  { %2196 = vmatmul.mubr.f32.vlgmr.msra.gmra.mrb[4].mxu0 %v2127_v58  ;;  %2266 = vmatmul.mubr.f32.vlgmr.msra.gmra.mrb[4].mxu1 %v2129_v59 }
 0x397   :  { %5524 = vmatprep.mubr.msk.f32.mxu0 %vm6761_vm6, %v6760_v62  ;;  %5529 = vmatprep.mubr.msk.f32.mxu1 %vm6761_vm6, %v6760_v62 }
 0x3f9   :  { %v2424_v3 = vpop.permute.xlu1 %2423 }
 0x3fd   :  { %v2432_v17 = vpop.permute.xlu1 %2431 }
 0x449   :  { %v5158_v11 = vpop.f32.mrb[2].mxu0  ;;  %v5193_v1 = vpop.f32.mrb[2].mxu1 }
 0x44a   :  { %v5159_v13 = vpop.f32.mrb[3].mxu0  ;;  %v5194_v22 = vpop.f32.mrb[3].mxu1 }
 0x44b   :  { %v5160_v23 = vadd.f32 %v5159_v13, %v5158_v11  ;;  %v5195_v26 = vadd.f32 %v5194_v22, %v5193_v1  ;;  %v3000_v13 = vld [vmem:[%s6807_s29] sm:$0xff]  ;;  %v3001_v22 = vld [vmem:[%s6807_s29 + $0x8] sm:$0xff]  ;;  %s8331_s29 = sld [smem:[#allocation30_spill]] }
 0x44d   :  { %v2124_v27 = vadd.f32 %v5195_v26, %v5160_v23  ;;  %v3724_v23 = vld [vmem:[%s8327_s9] sm:$0xff]  ;;  %v3725_v26 = vld [vmem:[%s8327_s9 + $0x8] sm:$0xff] }
 0x44f   :  { %5523 = vmatpush3.msra.mxu0 %v2124_v27  ;;  %v3738_v27 = vld [vmem:[%s8328_s13] sm:$0xff] }
 0x450   :  { %5525 = vmatmul.mubr.msk.f32.vlgmr.msra.gmra.mrb[6].mxu0 %vm1635_vm4, %v2271_v18  ;;  %5085 = vmatprep.subr.msk.mxu0 %vm2458_vm9, %v2452_v60 }
 0x451   :  { %2531 = vmatprep.mubr.f32.mxu0 %v6760_v62  ;;  %5086 = vmatpush1.msk.msra.mxu0 %vm2458_vm9, %v2444_v54 }
 0x452   :  { %5091 = vmatprep.subr.msk.mxu0 %vm2458_vm9, %v2452_v60 }
 0x469   :  { %v5228_v32 = vpop.f32.mrb[4].mxu0  ;;  %v5263_v34 = vpop.f32.mrb[4].mxu1 }
 0x46a   :  { %v5229_v35 = vpop.f32.mrb[5].mxu0  ;;  %v5264_v43 = vpop.f32.mrb[5].mxu1 }
 0x46b   :  { %v5230_v44 = vadd.f32 %v5229_v35, %v5228_v32  ;;  %v5265_v45 = vadd.f32 %v5264_v43, %v5263_v34 }
 0x46d   :  { %v2268_v46 = vadd.f32 %v5265_v45, %v5230_v44  ;;  %v2779_v44 = vld [vmem:[#allocation7 + $0x8] sm:$0xff] }
 0x46f   :  { %5528 = vmatpush3.msra.mxu1 %v2268_v46 }
 0x470   :  { %5530 = vmatmul.mubr.msk.f32.vlgmr.msra.gmra.mrb[6].mxu1 %vm1635_vm4, %v2271_v18  ;;  %5088 = vmatprep.subr.msk.mxu1 %vm2458_vm9, %v2453_v61  ;;  %v3739_v18 = vld [vmem:[%s8328_s13 + $0x8] sm:$0xff] }
 0x471   :  { %2602 = vmatprep.mubr.f32.mxu1 %v6760_v62  ;;  %5089 = vmatpush1.msk.msra.mxu1 %vm2458_vm9, %v2451_v55 }
 0x472   :  { %5094 = vmatprep.subr.msk.mxu1 %vm2458_vm9, %v2453_v61 }
 0x523   :  { %v2341_v4 = vpop.f32.mrb[6].mxu0 }
 0x524   :  { %v5526_v5 = vpop.f32.mrb[7].mxu0  ;;  %v2415_v6 = vmul.f32 %v2341_v4, %v2341_v4 }
 0x525   :  { %v2805_v5 = vld [vmem:[#allocation7 + $0x38] sm:$0xff] }
 0x543   :  { %v2411_v2 = vpop.f32.mrb[6].mxu1 }
 0x544   :  { %v2416_v0 = vsub.f32 %v2411_v2, %v2415_v6  ;;  %v5531_v8 = vpop.f32.mrb[7].mxu1  ;;  %v2780_v6 = vld [vmem:[#allocation7 + $0x10] sm:$0xff] }
 0x546   :  { %v2417_v9 = vmax.f32 %v2416_v0, 0.0 }
 0x548   :  { %v2418_v12 = vadd.f32 1e-05, %v2417_v9 }
 0x54a   :  { %6495 = vrsqrt.f32 %v2418_v12 }
 0x554   :  { %v6496_v14 = vpop.eup %6495 }
 0x555   :  { %v2426_v15 = vmul.f32 %v6496_v14, %v2424_v3 }
 0x557   :  { %v2428_v16 = vmul.f32 %v2426_v15, %v2341_v4  ;;  %5087 = vmatmul.mubr.msk.f32.vlgmr.msra.gmra.mrb[8].mxu0 %vm2454_vm10, %v2426_v15  ;;  %5090 = vmatmul.mubr.msk.f32.vlgmr.msra.gmra.mrb[8].mxu1 %vm2454_vm10, %v2426_v15  ;;  %v2802_v4 = vld [vmem:[#allocation7 + $0x20] sm:$0xff] }
 0x558   :  { %5092 = vmatpush1.msk.msra.mxu0 %vm2458_vm9, %v2444_v54  ;;  %2676 = vmatprep.mubr.f32.mxu0 %v6760_v62  ;;  %v2781_v54 = vld [vmem:[#allocation7 + $0x18] sm:$0xff] }
 0x559   :  { %v2434_v20 = vsub.f32 %v2432_v17, %v2428_v16  ;;  %5095 = vmatpush1.msk.msra.mxu1 %vm2458_vm9, %v2451_v55  ;;  %2747 = vmatprep.mubr.f32.mxu1 %v6760_v62 }
 0x55b   :  { %5093 = vmatmul.mubr.msk.f32.vlgmr.msra.gmra.mrb[10].mxu0 %vm2454_vm10, %v2434_v20  ;;  %5096 = vmatmul.mubr.msk.f32.vlgmr.msra.gmra.mrb[10].mxu1 %vm2454_vm10, %v2434_v20 }
 0x55c   :  { %3083 = vmatprep.mubr.f32.mxu0 %v6760_v62  ;;  %3160 = vmatprep.mubr.f32.mxu1 %v6760_v62 }
 0x62a   :  { %v2533_v21 = vpop.f32.mrb[8].mxu0  ;;  %v2604_v24 = vpop.f32.mrb[8].mxu1 }
 0x62b   :  { %v2535_v25 = vpop.f32.mrb[9].mxu0  ;;  %v2606_v36 = vpop.f32.mrb[9].mxu1  ;;  %v2754_v37 = vmul.f32 %v7788_v41, %v2533_v21  ;;  %v2756_v28 = vmul.f32 %v7790_v42, %v2604_v24 }
 0x62c   :  { %v2755_v29 = vmul.f32 %v7784_v39, %v2535_v25  ;;  %v2757_v30 = vmul.f32 %v7786_v40, %v2606_v36 }
 0x62e   :  { %v2678_v31 = vpop.f32.mrb[10].mxu0  ;;  %v2749_v19 = vpop.f32.mrb[10].mxu1 }
 0x62f   :  { %v2758_v33 = vadd.f32 %v2754_v37, %v2678_v31  ;;  %v2760_v38 = vadd.f32 %v2756_v28, %v2749_v19  ;;  %v2680_v56 = vpop.f32.mrb[11].mxu0  ;;  %v2751_v57 = vpop.f32.mrb[11].mxu1  ;;  %v2827_v31 = vld [vmem:[#allocation7 + $0x48] sm:$0xff] }
 0x630   :  { %v2759_v58 = vadd.f32 %v2755_v29, %v2680_v56  ;;  %v2761_v59 = vadd.f32 %v2757_v30, %v2751_v57 }
 0x631   :  { %v7864_v63 = vmax.f32 %v2758_v33, 0.0  ;;  %v7872_v11 = vmax.f32 %v2760_v38, 0.0  ;;  %v2851_v38 = vld [vmem:[#allocation7 + $0x68] sm:$0xff] }
 0x632   :  { %v7866_v10 = vmax.f32 %v2759_v58, 0.0  ;;  %v7874_v1 = vmax.f32 %v2761_v59, 0.0  ;;  %v2826_v59 = vld [vmem:[#allocation7 + $0x40] sm:$0xff] }
 0x633   :  { %2766 = vrot.lane.b32.xlu0 %v7864_v63, %s6727_s12 }
 0x634   :  { %2768 = vrot.lane.b32.xlu1 %v7866_v10, %s6727_s12 }
 0x637   :  { %2770 = vrot.lane.b32.xlu0 %v7872_v11, %s6727_s12 }
 0x638   :  { %2772 = vrot.lane.b32.xlu1 %v7874_v1, %s6727_s12  ;;  %s6765_s12 = smov 7  }
 0x63b   :  { %2790 = vrot.lane.b32.xlu0 %v7864_v63, %s6728_s11 }
 0x63c   :  { %2792 = vrot.lane.b32.xlu1 %v7866_v10, %s6728_s11 }
 0x63f   :  { %2794 = vrot.lane.b32.xlu0 %v7872_v11, %s6728_s11 }
 0x640   :  { %2796 = vrot.lane.b32.xlu1 %v7874_v1, %s6728_s11  ;;  %s8333_s11 = sld [smem:[#allocation24_spill]] }
 0x643   :  { %2814 = vrot.lane.b32.xlu0 %v7864_v63, %s6729_s15 }
 0x644   :  { %2816 = vrot.lane.b32.xlu1 %v7866_v10, %s6729_s15 }
 0x647   :  { %2818 = vrot.lane.b32.xlu0 %v7872_v11, %s6729_s15 }
 0x648   :  { %2820 = vrot.lane.b32.xlu1 %v7874_v1, %s6729_s15  ;;  %s8334_s15 = sld [smem:[#allocation22_spill]] }
 0x64b   :  { %2838 = vrot.lane.b32.xlu0 %v7864_v63, %s6734_s6 }
 0x64c   :  { %2840 = vrot.lane.b32.xlu1 %v7866_v10, %s6734_s6 }
 0x64f   :  { %2842 = vrot.lane.b32.xlu0 %v7872_v11, %s6734_s6 }
 0x650   :  { %2844 = vrot.lane.b32.xlu1 %v7874_v1, %s6734_s6 }
 0x653   :  { %2866 = vrot.lane.b32.xlu0 %v7864_v63, %s6735_s18 }
 0x654   :  { %2868 = vrot.lane.b32.xlu1 %v7866_v10, %s6735_s18 }
 0x657   :  { %2870 = vrot.lane.b32.xlu0 %v7872_v11, %s6735_s18 }
 0x658   :  { %2872 = vrot.lane.b32.xlu1 %v7874_v1, %s6735_s18 }
 0x65b   :  { %2890 = vrot.lane.b32.xlu0 %v7864_v63, %s6740_s28 }
 0x65c   :  { %2892 = vrot.lane.b32.xlu1 %v7866_v10, %s6740_s28 }
 0x65f   :  { %2894 = vrot.lane.b32.xlu0 %v7872_v11, %s6740_s28 }
 0x660   :  { %2896 = vrot.lane.b32.xlu1 %v7874_v1, %s6740_s28  ;;  %s6767_s28 = smov 120  }
 0x663   :  { %2914 = vrot.lane.b32.xlu0 %v7864_v63, %s6741_s2 }
 0x664   :  { %2916 = vrot.lane.b32.xlu1 %v7866_v10, %s6741_s2 }
 0x667   :  { %2918 = vrot.lane.b32.xlu0 %v7872_v11, %s6741_s2 }
 0x668   :  { %2920 = vrot.lane.b32.xlu1 %v7874_v1, %s6741_s2  ;;  %s8336_s2 = sld [smem:[#allocation26_spill]] }
 0x66b   :  { %2938 = vrot.lane.b32.xlu0 %v7864_v63, %s6742_s7 }
 0x66c   :  { %2940 = vrot.lane.b32.xlu1 %v7866_v10, %s6742_s7 }
 0x66f   :  { %2942 = vrot.lane.b32.xlu0 %v7872_v11, %s6742_s7 }
 0x670   :  { %2944 = vrot.lane.b32.xlu1 %v7874_v1, %s6742_s7  ;;  %s8337_s7 = sld [smem:[#allocation28_spill]] }
 0x673   :  { %3004 = vperm.xlu0 %6492, %v3000_v13  }
 0x674   :  { %3009 = vperm.xlu1 %6493, %v3001_v22   ;;  %v2852_v22 = vld [vmem:[#allocation7 + $0x70] sm:$0xff] }
 0x677   :  { %3728 = vperm.xlu0 %6492, %v3724_v23   ;;  %v2829_v23 = vld [vmem:[#allocation7 + $0x58] sm:$0xff] }
 0x678   :  { %3733 = vperm.xlu1 %6493, %v3725_v26  }
 0x67b   :  { %3744 = vperm.xlu0 %6492, %v3738_v27  }
 0x67c   :  { %3749 = vperm.xlu1 %6493, %v3739_v18  }
 0x6a5   :  { %v2767_v32 = vpop.permute.xlu0 %2766 }
 0x6a6   :  { %v2769_v34 = vpop.permute.xlu1 %2768 }
 0x6a7   :  { %v2776_v45 = vsel %vm633_vm0, %v2767_v32, %v2769_v34 }
 0x6a8   :  { %v2783_v50 = vmul.f32 %v2779_v44, %v2776_v45 }
 0x6a9   :  { %v2771_v35 = vpop.permute.xlu0 %2770 }
 0x6aa   :  { %v2773_v43 = vpop.permute.xlu1 %2772  ;;  %v2775_v2 = vsel %vm633_vm0, %v2769_v34, %v2771_v35  ;;  %v2853_v34 = vld [vmem:[#allocation7 + $0x78] sm:$0xff] }
 0x6ab   :  { %v2774_v55 = vsel %vm633_vm0, %v2771_v35, %v2773_v43  ;;  %v2777_v60 = vsel %vm633_vm0, %v2773_v43, %v2767_v32  ;;  %v2784_v21 = vmul.f32 %v2780_v6, %v2775_v2  ;;  %v2850_v32 = vld [vmem:[#allocation7 + $0x60] sm:$0xff]  ;;  %v2828_v35 = vld [vmem:[#allocation7 + $0x50] sm:$0xff]  ;;  %vm3012_vm0 = vcmask 588800  }
 0x6ac   :  { %v2782_v15 = vmul.f32 %v2778_v51, %v2777_v60  ;;  %v2785_v16 = vmul.f32 %v2781_v54, %v2774_v55  ;;  %v2878_v6 = vld [vmem:[#allocation7 + $0xa0] sm:$0xff] }
 0x6ad   :  { %v2791_v46 = vpop.permute.xlu0 %2790 }
 0x6ae   :  { %v2793_v48 = vpop.permute.xlu1 %2792 }
 0x6af   :  { %v2800_v49 = vsel %vm658_vm1, %v2791_v46, %v2793_v48 }
 0x6b0   :  { %v2807_v52 = vmul.f32 %v2803_v47, %v2800_v49 }
 0x6b1   :  { %v2795_v61 = vpop.permute.xlu0 %2794 }
 0x6b2   :  { %v2799_v0 = vsel %vm658_vm1, %v2793_v48, %v2795_v61  ;;  %v2797_v8 = vpop.permute.xlu1 %2796  ;;  %v6052_v9 = vpack.c.bf16 %v2807_v52, %v2783_v50 }
 0x6b3   :  { %v2808_v12 = vmul.f32 %v2804_v53, %v2799_v0  ;;  %v2798_v3 = vsel %vm658_vm1, %v2795_v61, %v2797_v8  ;;  %v2801_v14 = vsel %vm658_vm1, %v2797_v8, %v2791_v46  ;;  %v2879_v0 = vld [vmem:[#allocation7 + $0xa8] sm:$0xff]  ;;  %vm3557_vm1 = vcmask 130048  }
 0x6b4   :  { %v2806_v17 = vmul.f32 %v2802_v4, %v2801_v14  ;;  %v2809_v20 = vmul.f32 %v2805_v5, %v2798_v3  ;;  %6053 = vmatprep.subr.bf16.mxu0 %v6052_v9  ;;  %v2880_v9 = vld [vmem:[#allocation7 + $0xb0] sm:$0xff] }
 0x6b5   :  { %v2815_v24 = vpop.permute.xlu0 %2814  ;;  %v6070_v28 = vpack.c.bf16 %v2808_v12, %v2784_v21  ;;  %v2881_v12 = vld [vmem:[#allocation7 + $0xb8] sm:$0xff] }
 0x6b6   :  { %v6054_v25 = vpack.c.bf16 %v2806_v17, %v2782_v15  ;;  %v2817_v36 = vpop.permute.xlu1 %2816  ;;  %v6068_v37 = vpack.c.bf16 %v2809_v20, %v2785_v16 }
 0x6b7   :  { %v2824_v19 = vsel %vm683_vm2, %v2815_v24, %v2817_v36 }
 0x6b8   :  { %6055 = vmatpush1.bf16.msra.mxu0 %v6054_v25  ;;  %6069 = vmatprep.subr.bf16.mxu1 %v6068_v37  ;;  %v2831_v58 = vmul.f32 %v2827_v31, %v2824_v19 }
 0x6b9   :  { %v2819_v29 = vpop.permute.xlu0 %2818  ;;  %6071 = vmatpush1.bf16.msra.mxu1 %v6070_v28 }
 0x6ba   :  { %v2821_v30 = vpop.permute.xlu1 %2820  ;;  %v2823_v43 = vsel %vm683_vm2, %v2817_v36, %v2819_v29 }
 0x6bb   :  { %v2822_v26 = vsel %vm683_vm2, %v2819_v29, %v2821_v30  ;;  %v2825_v27 = vsel %vm683_vm2, %v2821_v30, %v2815_v24  ;;  %v2832_v54 = vmul.f32 %v2828_v35, %v2823_v43 }
 0x6bc   :  { %v2830_v50 = vmul.f32 %v2826_v59, %v2825_v27  ;;  %v2833_v51 = vmul.f32 %v2829_v23, %v2822_v26  ;;  %v2927_v59 = vld [vmem:[#allocation7 + $0xe8] sm:$0xff]  ;;  %v2928_v27 = vld [vmem:[#allocation7 + $0xf0] sm:$0xff] }
 0x6bd   :  { %v2839_v33 = vpop.permute.xlu0 %2838 }
 0x6be   :  { %v2841_v56 = vpop.permute.xlu1 %2840 }
 0x6bf   :  { %v2848_v57 = vsel %vm808_vm7, %v2839_v33, %v2841_v56 }
 0x6c0   :  { %v2855_v13 = vmul.f32 %v2851_v38, %v2848_v57 }
 0x6c1   :  { %v2843_v18 = vpop.permute.xlu0 %2842 }
 0x6c2   :  { %v2847_v44 = vsel %vm808_vm7, %v2841_v56, %v2843_v18  ;;  %v2845_v45 = vpop.permute.xlu1 %2844  ;;  %v6056_v46 = vpack.c.bf16 %v2855_v13, %v2831_v58  ;;  %v2902_v56 = vld [vmem:[#allocation7 + $0xc0] sm:$0xff]  ;;  %v2904_v58 = vld [vmem:[#allocation7 + $0xd0] sm:$0xff]  ;;  %v2905_v13 = vld [vmem:[#allocation7 + $0xd8] sm:$0xff] }
 0x6c3   :  { %v2856_v47 = vmul.f32 %v2852_v22, %v2847_v44  ;;  %v2846_v48 = vsel %vm808_vm7, %v2843_v18, %v2845_v45  ;;  %v2849_v49 = vsel %vm808_vm7, %v2845_v45, %v2839_v33  ;;  %v2929_v18 = vld [vmem:[#allocation7 + $0xf8] sm:$0xff] }
 0x6c4   :  { %v2854_v52 = vmul.f32 %v2850_v32, %v2849_v49  ;;  %v2857_v53 = vmul.f32 %v2853_v34, %v2846_v48  ;;  %6057 = vmatprep.subr.bf16.mxu0 %v6056_v46 }
 0x6c5   :  { %v2867_v55 = vpop.permute.xlu0 %2866  ;;  %v6074_v5 = vpack.c.bf16 %v2856_v47, %v2832_v54 }
 0x6c6   :  { %v6058_v60 = vpack.c.bf16 %v2854_v52, %v2830_v50  ;;  %v2869_v61 = vpop.permute.xlu1 %2868  ;;  %v6072_v4 = vpack.c.bf16 %v2857_v53, %v2833_v51 }
 0x6c7   :  { %v2876_v2 = vsel %vm837_vm8, %v2867_v55, %v2869_v61 }
 0x6c8   :  { %6059 = vmatpush1.bf16.msra.mxu0 %v6058_v60  ;;  %6073 = vmatprep.subr.bf16.mxu1 %v6072_v4  ;;  %v2882_v3 = vmul.f32 %v2878_v6, %v2876_v2  ;;  %v2951_v4 = vld [vmem:[#allocation7 + $0x108] sm:$0xff] }
 0x6c9   :  { %v2871_v8 = vpop.permute.xlu0 %2870  ;;  %6075 = vmatpush1.bf16.msra.mxu1 %v6074_v5  ;;  %v2950_v5 = vld [vmem:[#allocation7 + $0x100] sm:$0xff] }
 0x6ca   :  { %v2875_v14 = vsel %vm837_vm8, %v2869_v61, %v2871_v8  ;;  %v2873_v15 = vpop.permute.xlu1 %2872  ;;  %v6062_v37 = vpack.c.bf16 %v2882_v3, %v7864_v63  ;;  %v3189_v3 = vld [vmem:[#allocation8 + $0x80] sm:$0xff] }
 0x6cb   :  { %v2883_v16 = vmul.f32 %v2879_v0, %v2875_v14  ;;  %v2874_v17 = vsel %vm837_vm8, %v2871_v8, %v2873_v15  ;;  %v2877_v20 = vsel %vm837_vm8, %v2873_v15, %v2867_v55  ;;  %v2952_v0 = vld [vmem:[#allocation7 + $0x110] sm:$0xff]  ;;  %v2953_v8 = vld [vmem:[#allocation7 + $0x118] sm:$0xff]  ;;  %v3190_v14 = vld [vmem:[#allocation8 + $0x88] sm:$0xff] }
 0x6cc   :  { %v2884_v21 = vmul.f32 %v2880_v9, %v2874_v17  ;;  %v2885_v24 = vmul.f32 %v2881_v12, %v2877_v20  ;;  %v3173_v15 = vld [vmem:[#allocation8] sm:$0xff] }
 0x6cd   :  { %v2891_v25 = vpop.permute.xlu0 %2890  ;;  %v6060_v36 = vpack.c.bf16 %v2883_v16, %v7866_v10  ;;  %v2926_v10 = vld [vmem:[#allocation7 + $0xe0] sm:$0xff] }
 0x6ce   :  { %v6078_v28 = vpack.c.bf16 %v2884_v21, %v7872_v11  ;;  %v2893_v29 = vpop.permute.xlu1 %2892  ;;  %v6076_v30 = vpack.c.bf16 %v2885_v24, %v7874_v1  ;;  %v2903_v11 = vld [vmem:[#allocation7 + $0xc8] sm:$0xff]  ;;  %v3221_v24 = vld [vmem:[#allocation8 + $0x180] sm:$0xff] }
 0x6cf   :  { %6061 = vmatprep.subr.bf16.mxu0 %v6060_v36  ;;  %v2900_v57 = vsel %vm962_vm14, %v2891_v25, %v2893_v29  ;;  %v3174_v21 = vld [vmem:[#allocation8 + $0x8] sm:$0xff] }
 0x6d0   :  { %6063 = vmatpush1.bf16.msra.mxu0 %v6062_v37  ;;  %6077 = vmatprep.subr.bf16.mxu1 %v6076_v30  ;;  %v2906_v32 = vmul.f32 %v2902_v56, %v2900_v57  ;;  %v3205_v30 = vld [vmem:[#allocation8 + $0x100] sm:$0xff]  ;;  %v8014_v56 = vpack.c.bf16 %v3174_v21, %v3173_v15  ;;  %v3214_v21 = vld [vmem:[#allocation8 + $0x148] sm:$0xff] }
 0x6d1   :  { %v2895_v31 = vpop.permute.xlu0 %2894  ;;  %6079 = vmatpush1.bf16.msra.mxu1 %v6078_v28  ;;  %v3181_v15 = vld [vmem:[#allocation8 + $0x40] sm:$0xff] }
 0x6d2   :  { %v2897_v19 = vpop.permute.xlu1 %2896  ;;  %v2899_v1 = vsel %vm962_vm14, %v2893_v29, %v2895_v31  ;;  %v2962_v29 = vld [vmem:[%s8329_s17] sm:$0xff] }
 0x6d3   :  { %v2898_v22 = vsel %vm962_vm14, %v2895_v31, %v2897_v19  ;;  %v2901_v23 = vsel %vm962_vm14, %v2897_v19, %v2891_v25  ;;  %v2907_v44 = vmul.f32 %v2903_v11, %v2899_v1  ;;  %v3222_v25 = vld [vmem:[#allocation8 + $0x188] sm:$0xff]  ;;  %v8011_v19 = vpack.c.bf16 %v3190_v14, %v3189_v3  ;;  %v3175_v1 = vld [vmem:[#allocation8 + $0x10] sm:$0xff] }
 0x6d4   :  { %v2908_v48 = vmul.f32 %v2904_v58, %v2898_v22  ;;  %v2909_v49 = vmul.f32 %v2905_v13, %v2901_v23  ;;  %v3206_v31 = vld [vmem:[#allocation8 + $0x108] sm:$0xff]  ;;  %v8016_v57 = vpack.c.bf16 %v3222_v25, %v3221_v24  ;;  %v3176_v58 = vld [vmem:[#allocation8 + $0x18] sm:$0xff]  ;;  %v3193_v23 = vld [vmem:[#allocation8 + $0xa0] sm:$0xff] }
 0x6d5   :  { %v2915_v33 = vpop.permute.xlu0 %2914  ;;  %v8019_v11 = vpack.c.bf16 %v3206_v31, %v3205_v30  ;;  %v3208_v22 = vld [vmem:[#allocation8 + $0x118] sm:$0xff]  ;;  %v3199_v24 = vld [vmem:[#allocation8 + $0xd0] sm:$0xff] }
 0x6d6   :  { %v2917_v38 = vpop.permute.xlu1 %2916  ;;  %v3200_v25 = vld [vmem:[#allocation8 + $0xd8] sm:$0xff]  ;;  %v3183_v31 = vld [vmem:[#allocation8 + $0x50] sm:$0xff] }
 0x6d7   :  { %v2924_v63 = vsel %vm987_vm13, %v2915_v33, %v2917_v38  ;;  %v8075_v30 = vpack.c.bf16 %v3200_v25, %v3199_v24 }
 0x6d8   :  { %v2930_v34 = vmul.f32 %v2926_v10, %v2924_v63  ;;  %v3223_v10 = vld [vmem:[#allocation8 + $0x190] sm:$0xff]  ;;  %v3224_v63 = vld [vmem:[#allocation8 + $0x198] sm:$0xff] }
 0x6d9   :  { %v2919_v26 = vpop.permute.xlu0 %2918 }
 0x6da   :  { %v2923_v35 = vsel %vm987_vm13, %v2917_v38, %v2919_v26  ;;  %v2921_v43 = vpop.permute.xlu1 %2920  ;;  %v6066_v54 = vpack.c.bf16 %v2930_v34, %v2906_v32  ;;  %v3192_v38 = vld [vmem:[#allocation8 + $0x98] sm:$0xff]  ;;  %v3226_v32 = vld [vmem:[#allocation8 + $0x1a8] sm:$0xff]  ;;  %v8031_v34 = vpack.c.bf16 %v3176_v58, %v3175_v1  ;;  %v3233_v58 = vld [vmem:[#allocation8 + $0x1e0] sm:$0xff] }
 0x6db   :  { %v2931_v45 = vmul.f32 %v2927_v59, %v2923_v35  ;;  %v2922_v46 = vsel %vm987_vm13, %v2919_v26, %v2921_v43  ;;  %v2925_v47 = vsel %vm987_vm13, %v2921_v43, %v2915_v33  ;;  %v3191_v33 = vld [vmem:[#allocation8 + $0x90] sm:$0xff]  ;;  %v3194_v26 = vld [vmem:[#allocation8 + $0xa8] sm:$0xff] }
 0x6dc   :  { %v2932_v50 = vmul.f32 %v2928_v27, %v2922_v46  ;;  %v2933_v51 = vmul.f32 %v2929_v18, %v2925_v47  ;;  %v3207_v59 = vld [vmem:[#allocation8 + $0x110] sm:$0xff]  ;;  %v8023_v13 = vpack.c.bf16 %v3192_v38, %v3191_v33  ;;  %v8027_v27 = vpack.c.bf16 %v3224_v63, %v3223_v10  ;;  %v3225_v18 = vld [vmem:[#allocation8 + $0x1a0] sm:$0xff]  ;;  %v3184_v33 = vld [vmem:[#allocation8 + $0x58] sm:$0xff] }
 0x6dd   :  { %v2939_v52 = vpop.permute.xlu0 %2938  ;;  %v6064_v53 = vpack.c.bf16 %v2931_v45, %v2907_v44  ;;  %v8035_v35 = vpack.c.bf16 %v3208_v22, %v3207_v59  ;;  %v8037_v43 = vpack.c.bf16 %v3194_v26, %v3193_v23  ;;  %v3177_v44 = vld [vmem:[#allocation8 + $0x20] sm:$0xff]  ;;  %v3178_v45 = vld [vmem:[#allocation8 + $0x28] sm:$0xff]  ;;  %v8041_v47 = vpack.c.bf16 %v3226_v32, %v3225_v18  ;;  %v3215_v38 = vld [vmem:[#allocation8 + $0x150] sm:$0xff] }
 0x6de   :  { %v6082_v55 = vpack.c.bf16 %v2932_v50, %v2908_v48  ;;  %v2941_v60 = vpop.permute.xlu1 %2940  ;;  %v6080_v61 = vpack.c.bf16 %v2933_v51, %v2909_v49  ;;  %v3209_v46 = vld [vmem:[#allocation8 + $0x120] sm:$0xff]  ;;  %v3210_v48 = vld [vmem:[#allocation8 + $0x128] sm:$0xff]  ;;  %v3195_v49 = vld [vmem:[#allocation8 + $0xb0] sm:$0xff]  ;;  %v8081_v22 = vpack.c.bf16 %v3184_v33, %v3183_v31 }
 0x6df   :  { %6065 = vmatprep.subr.bf16.mxu0 %v6064_v53  ;;  %v2948_v6 = vsel %vm1012_vm3, %v2939_v52, %v2941_v60  ;;  %v3196_v50 = vld [vmem:[#allocation8 + $0xb8] sm:$0xff]  ;;  %v3227_v51 = vld [vmem:[#allocation8 + $0x1b0] sm:$0xff]  ;;  %v8045_v53 = vpack.c.bf16 %v3178_v45, %v3177_v44  ;;  %v3201_v63 = vld [vmem:[#allocation8 + $0xe0] sm:$0xff] }
 0x6e0   :  { %6067 = vmatpush1.bf16.msra.mxu0 %v6066_v54  ;;  %6081 = vmatprep.subr.bf16.mxu1 %v6080_v61  ;;  %v2954_v36 = vmul.f32 %v2950_v5, %v2948_v6  ;;  %v8049_v54 = vpack.c.bf16 %v3210_v48, %v3209_v46  ;;  %v3180_v61 = vld [vmem:[#allocation8 + $0x38] sm:$0xff]  ;;  %v3202_v1 = vld [vmem:[#allocation8 + $0xe8] sm:$0xff]  ;;  %v3185_v18 = vld [vmem:[#allocation8 + $0x60] sm:$0xff] }
 0x6e1   :  { %v2943_v2 = vpop.permute.xlu0 %2942  ;;  %6083 = vmatpush1.bf16.msra.mxu1 %v6082_v55  ;;  %v8051_v55 = vpack.c.bf16 %v3196_v50, %v3195_v49  ;;  %v3212_v6 = vld [vmem:[#allocation8 + $0x138] sm:$0xff]  ;;  %v3234_v59 = vld [vmem:[#allocation8 + $0x1e8] sm:$0xff]  ;;  %v8087_v26 = vpack.c.bf16 %v3202_v1, %v3201_v63  ;;  %v3217_v45 = vld [vmem:[#allocation8 + $0x160] sm:$0xff] }
 0x6e2   :  { %v2947_v9 = vsel %vm1012_vm3, %v2941_v60, %v2943_v2  ;;  %v2945_v12 = vpop.permute.xlu1 %2944  ;;  %v3179_v60 = vld [vmem:[#allocation8 + $0x30] sm:$0xff]  ;;  %v3216_v10 = vld [vmem:[#allocation8 + $0x158] sm:$0xff]  ;;  %v3186_v32 = vld [vmem:[#allocation8 + $0x68] sm:$0xff]  ;;  %v8090_v44 = vpack.c.bf16 %v3234_v59, %v3233_v58 }
 0x6e3   :  { %v2955_v16 = vmul.f32 %v2951_v4, %v2947_v9  ;;  %v2946_v17 = vsel %vm1012_vm3, %v2943_v2, %v2945_v12  ;;  %v2949_v20 = vsel %vm1012_vm3, %v2945_v12, %v2939_v52  ;;  %v3228_v52 = vld [vmem:[#allocation8 + $0x1b8] sm:$0xff]  ;;  %v3211_v4 = vld [vmem:[#allocation8 + $0x130] sm:$0xff]  ;;  %v3197_v2 = vld [vmem:[#allocation8 + $0xc0] sm:$0xff]  ;;  %v8057_v12 = vpack.c.bf16 %v3180_v61, %v3179_v60 }
 0x6e4   :  { %v2956_v37 = vmul.f32 %v2952_v0, %v2946_v17  ;;  %v2957_v28 = vmul.f32 %v2953_v8, %v2949_v20  ;;  %v8054_v5 = vpack.c.bf16 %v3228_v52, %v3227_v51  ;;  %v3198_v0 = vld [vmem:[#allocation8 + $0xc8] sm:$0xff]  ;;  %v3229_v8 = vld [vmem:[#allocation8 + $0x1c0] sm:$0xff]  ;;  %v8061_v3 = vpack.c.bf16 %v3212_v6, %v3211_v4  ;;  %v3203_v50 = vld [vmem:[#allocation8 + $0xf0] sm:$0xff] }
 0x6e5   :  { %3035 = vmatprep.subr.mxu0 %v2955_v16  ;;  %v3230_v9 = vld [vmem:[#allocation8 + $0x1c8] sm:$0xff]  ;;  %v8063_v14 = vpack.c.bf16 %v3198_v0, %v3197_v2  ;;  %v3213_v17 = vld [vmem:[#allocation8 + $0x140] sm:$0xff]  ;;  %v8085_v23 = vpack.c.bf16 %v3216_v10, %v3215_v38  ;;  %v8093_v48 = vpack.c.bf16 %v3186_v32, %v3185_v18  ;;  %v3204_v51 = vld [vmem:[#allocation8 + $0xf8] sm:$0xff] }
 0x6e6   :  { %3036 = vmatpush1.msra.mxu0 %v2954_v36  ;;  %3112 = vmatprep.subr.mxu1 %v2957_v28  ;;  %v3182_v16 = vld [vmem:[#allocation8 + $0x48] sm:$0xff]  ;;  %v8066_v20 = vpack.c.bf16 %v3230_v9, %v3229_v8  ;;  %v3231_v36 = vld [vmem:[#allocation8 + $0x1d0] sm:$0xff]  ;;  %v8102_v52 = vpack.c.bf16 %v3204_v51, %v3203_v50  ;;  %v3188_v61 = vld [vmem:[#allocation8 + $0x78] sm:$0xff] }
 0x6e7   :  { %5097 = vmatmul.mubr.msk.f32.vlgmr.msra.gmra.mrb[12].mxu0 %vm3012_vm0, %v2962_v29  ;;  %3113 = vmatpush1.msra.mxu1 %v2956_v37  ;;  %v3232_v37 = vld [vmem:[#allocation8 + $0x1d8] sm:$0xff]  ;;  %v8069_v28 = vpack.c.bf16 %v3182_v16, %v3181_v15  ;;  %v3218_v46 = vld [vmem:[#allocation8 + $0x168] sm:$0xff]  ;;  %v3187_v60 = vld [vmem:[#allocation8 + $0x70] sm:$0xff] }
 0x6e8   :  { %5099 = vmatmul.mubr.msk.f32.vlgmr.msra.gmra.mrb[12].mxu1 %vm3012_vm0, %v2962_v29  ;;  %3089 = vmatprep.mubr.f32.mxu0 %v6760_v62  ;;  %v8073_v29 = vpack.c.bf16 %v3214_v21, %v3213_v17  ;;  %v8097_v49 = vpack.c.bf16 %v3218_v46, %v3217_v45  ;;  %v3235_v4 = vld [vmem:[#allocation8 + $0x1f0] sm:$0xff]  ;;  %v8104_v6 = vpack.c.bf16 %v3188_v61, %v3187_v60  ;;  %v3236_v2 = vld [vmem:[#allocation8 + $0x1f8] sm:$0xff]  ;;  %v3387_v16 = vld [vmem:[#allocation10] sm:$0xff] }
 0x6e9   :  { %3166 = vmatprep.mubr.f32.mxu1 %v6760_v62  ;;  %6085 = vmatprep.subr.bf16.mxu0 %v8011_v19  ;;  %v3219_v0 = vld [vmem:[#allocation8 + $0x170] sm:$0xff]  ;;  %v3220_v8 = vld [vmem:[#allocation8 + $0x178] sm:$0xff]  ;;  %v8107_v9 = vpack.c.bf16 %v3236_v2, %v3235_v4  ;;  %v3388_v17 = vld [vmem:[#allocation10 + $0x8] sm:$0xff] }
 0x6ea   :  { %6087 = vmatpush3.bf16.msra.mxu0 %v8014_v56  ;;  %6117 = vmatprep.subr.bf16.mxu1 %v8016_v57  ;;  %v8109_v15 = vpack.c.bf16 %v3220_v8, %v3219_v0  ;;  %v6148_v21 = vpack.c.bf16 %v3388_v17, %v3387_v16  ;;  %v3391_v45 = vld [vmem:[#allocation10 + $0x20] sm:$0xff]  ;;  %v3392_v46 = vld [vmem:[#allocation10 + $0x28] sm:$0xff]  ;;  %v3393_v16 = vld [vmem:[#allocation10 + $0x30] sm:$0xff] }
 0x6eb   :  { %5098 = vmatmul.mubr.msk.f32.gmra.mrb[14].mxu0 %vm3012_vm0, %v2963_v7  ;;  %6119 = vmatpush3.bf16.msra.mxu1 %v8019_v11  ;;  %v6156_v0 = vpack.c.bf16 %v3392_v46, %v3391_v45  ;;  %v3394_v17 = vld [vmem:[#allocation10 + $0x38] sm:$0xff] }
 0x6ec   :  { %5100 = vmatmul.mubr.msk.f32.gmra.mrb[14].mxu1 %vm3012_vm0, %v2963_v7  ;;  %6089 = vmatprep.subr.bf16.mxu0 %v8023_v13  ;;  %v8078_v7 = vpack.c.bf16 %v3232_v37, %v3231_v36  ;;  %v3389_v36 = vld [vmem:[#allocation10 + $0x10] sm:$0xff]  ;;  %v3390_v37 = vld [vmem:[#allocation10 + $0x18] sm:$0xff] }
 0x6ed   :  { %6121 = vmatprep.subr.bf16.mxu1 %v8027_v27  ;;  %v6152_v58 = vpack.c.bf16 %v3390_v37, %v3389_v36  ;;  %v3396_v36 = vld [vmem:[#allocation10 + $0x48] sm:$0xff]  ;;  %v3397_v37 = vld [vmem:[#allocation10 + $0x50] sm:$0xff] }
 0x6ee   :  { %6091 = vmatpush3.bf16.msra.mxu0 %v8031_v34 }
 0x6ef   :  { %6123 = vmatpush3.bf16.msra.mxu1 %v8035_v35  ;;  %6093 = vmatprep.subr.bf16.mxu0 %v8037_v43 }
 0x6f0   :  { %6125 = vmatprep.subr.bf16.mxu1 %v8041_v47 }
 0x6f2   :  { %6095 = vmatpush3.bf16.msra.mxu0 %v8045_v53  ;;  %v3005_v24 = vpop.permute.xlu0 %3004 }
 0x6f3   :  { %6127 = vmatpush3.bf16.msra.mxu1 %v8049_v54  ;;  %6097 = vmatprep.subr.bf16.mxu0 %v8051_v55  ;;  %v3010_v59 = vpop.permute.xlu1 %3009 }
 0x6f4   :  { %6129 = vmatprep.subr.bf16.mxu1 %v8054_v5 }
 0x6f6   :  { %6099 = vmatpush3.bf16.msra.mxu0 %v8057_v12 }
 0x6f7   :  { %6131 = vmatpush3.bf16.msra.mxu1 %v8061_v3  ;;  %6101 = vmatprep.subr.bf16.mxu0 %v8063_v14 }
 0x6f8   :  { %6133 = vmatprep.subr.bf16.mxu1 %v8066_v20 }
 0x6fa   :  { %6103 = vmatpush3.bf16.msra.mxu0 %v8069_v28 }
 0x6fb   :  { %6135 = vmatpush3.bf16.msra.mxu1 %v8073_v29  ;;  %6105 = vmatprep.subr.bf16.mxu0 %v8075_v30 }
 0x6fc   :  { %6137 = vmatprep.subr.bf16.mxu1 %v8078_v7 }
 0x6fe   :  { %6107 = vmatpush3.bf16.msra.mxu0 %v8081_v22 }
 0x6ff   :  { %6139 = vmatpush3.bf16.msra.mxu1 %v8085_v23  ;;  %6109 = vmatprep.subr.bf16.mxu0 %v8087_v26 }
 0x700   :  { %6141 = vmatprep.subr.bf16.mxu1 %v8090_v44 }
 0x702   :  { %6111 = vmatpush3.bf16.msra.mxu0 %v8093_v48 }
 0x703   :  { %6143 = vmatpush3.bf16.msra.mxu1 %v8097_v49  ;;  %6113 = vmatprep.subr.bf16.mxu0 %v8102_v52 }
 0x704   :  { %6145 = vmatprep.subr.bf16.mxu1 %v8107_v9 }
 0x706   :  { %6115 = vmatpush3.bf16.msra.mxu0 %v8104_v6 }
 0x707   :  { %6147 = vmatpush3.bf16.msra.mxu1 %v8109_v15  ;;  %6149 = vmatprep.subr.bf16.mxu0 %v6148_v21 }
 0x708   :  { %6181 = vmatprep.subr.bf16.mxu1 %v6148_v21 }
 0x7ba   :  { %v3085_v25 = vpop.f32.mrb[12].mxu0 }
 0x7bb   :  { %v3087_v31 = vpop.f32.mrb[13].mxu0  ;;  %v3162_v33 = vpop.f32.mrb[12].mxu1  ;;  %v3086_v63 = vadd.f32 %v3085_v25, %v3005_v24  ;;  %v3395_v25 = vld [vmem:[#allocation10 + $0x40] sm:$0xff] }
 0x7bc   :  { %v3088_v38 = vadd.f32 %v3087_v31, %v3005_v24  ;;  %v3164_v10 = vpop.f32.mrb[13].mxu1  ;;  %v3163_v18 = vadd.f32 %v3162_v33, %v3005_v24  ;;  %v3398_v31 = vld [vmem:[#allocation10 + $0x58] sm:$0xff] }
 0x7bd   :  { %v3165_v1 = vadd.f32 %v3164_v10, %v3005_v24  ;;  %v6160_v24 = vpack.c.bf16 %v3394_v17, %v3393_v16  ;;  %v6168_v33 = vpack.c.bf16 %v3398_v31, %v3397_v37  ;;  %v3400_v10 = vld [vmem:[#allocation10 + $0x68] sm:$0xff] }
 0x7be   :  { %v3091_v32 = vpop.f32.mrb[14].mxu0  ;;  %3301 = vmatprep.mubr.f32.mxu0 %v3088_v38  ;;  %v3399_v38 = vld [vmem:[#allocation10 + $0x60] sm:$0xff] }
 0x7bf   :  { %v3093_v50 = vpop.f32.mrb[15].mxu0  ;;  %v3168_v51 = vpop.f32.mrb[14].mxu1  ;;  %3302 = vmatmul.mubr.f32.vlgmr.msra.gmra.mrb[16].mxu0 %v3086_v63  ;;  %3376 = vmatprep.mubr.f32.mxu1 %v3165_v1  ;;  %v3092_v4 = vadd.f32 %v3091_v32, %v3010_v59  ;;  %v6172_v63 = vpack.c.bf16 %v3400_v10, %v3399_v38  ;;  %v3401_v1 = vld [vmem:[#allocation10 + $0x70] sm:$0xff] }
 0x7c0   :  { %v3094_v60 = vadd.f32 %v3093_v50, %v3010_v59  ;;  %v3170_v61 = vpop.f32.mrb[15].mxu1  ;;  %3377 = vmatmul.mubr.f32.vlgmr.msra.gmra.mrb[16].mxu1 %v3163_v18  ;;  %6151 = vmatpush3.bf16.msra.mxu0 %v6148_v21  ;;  %v3169_v8 = vadd.f32 %v3168_v51, %v3010_v59 }
 0x7c1   :  { %v3171_v2 = vadd.f32 %v3170_v61, %v3010_v59  ;;  %6183 = vmatpush3.bf16.msra.mxu1 %v6148_v21  ;;  %6153 = vmatprep.subr.bf16.mxu0 %v6152_v58  ;;  %v6164_v21 = vpack.c.bf16 %v3396_v36, %v3395_v25  ;;  %v3555_v36 = vld [vmem:[%s8330_s21] sm:$0xff] }
 0x7c2   :  { %3306 = vmatprep.mubr.f32.mxu0 %v3094_v60  ;;  %6185 = vmatprep.subr.bf16.mxu1 %v6152_v58 }
 0x7c3   :  { %3307 = vmatmul.mubr.f32.gmra.mrb[18].mxu0 %v3092_v4  ;;  %3381 = vmatprep.mubr.f32.mxu1 %v3171_v2 }
 0x7c4   :  { %3382 = vmatmul.mubr.f32.gmra.mrb[18].mxu1 %v3169_v8  ;;  %6155 = vmatpush3.bf16.msra.mxu0 %v6152_v58 }
 0x7c5   :  { %6187 = vmatpush3.bf16.msra.mxu1 %v6152_v58  ;;  %6157 = vmatprep.subr.bf16.mxu0 %v6156_v0  ;;  %v3402_v58 = vld [vmem:[#allocation10 + $0x78] sm:$0xff] }
 0x7c6   :  { %6189 = vmatprep.subr.bf16.mxu1 %v6156_v0  ;;  %v6176_v59 = vpack.c.bf16 %v3402_v58, %v3401_v1  ;;  %v3754_v1 = vld [vmem:[%s8331_s29] sm:$0x3] }
 0x7c8   :  { %6159 = vmatpush3.bf16.msra.mxu0 %v6156_v0 }
 0x7c9   :  { %6191 = vmatpush3.bf16.msra.mxu1 %v6156_v0  ;;  %6161 = vmatprep.subr.bf16.mxu0 %v6160_v24 }
 0x7ca   :  { %6193 = vmatprep.subr.bf16.mxu1 %v6160_v24 }
 0x7cc   :  { %6163 = vmatpush3.bf16.msra.mxu0 %v6160_v24 }
 0x7cd   :  { %6195 = vmatpush3.bf16.msra.mxu1 %v6160_v24  ;;  %6165 = vmatprep.subr.bf16.mxu0 %v6164_v21 }
 0x7ce   :  { %6197 = vmatprep.subr.bf16.mxu1 %v6164_v21 }
 0x7d0   :  { %6167 = vmatpush3.bf16.msra.mxu0 %v6164_v21 }
 0x7d1   :  { %6199 = vmatpush3.bf16.msra.mxu1 %v6164_v21  ;;  %6169 = vmatprep.subr.bf16.mxu0 %v6168_v33 }
 0x7d2   :  { %6201 = vmatprep.subr.bf16.mxu1 %v6168_v33 }
 0x7d4   :  { %6171 = vmatpush3.bf16.msra.mxu0 %v6168_v33 }
 0x7d5   :  { %6203 = vmatpush3.bf16.msra.mxu1 %v6168_v33  ;;  %6173 = vmatprep.subr.bf16.mxu0 %v6172_v63 }
 0x7d6   :  { %6205 = vmatprep.subr.bf16.mxu1 %v6172_v63 }
 0x7d8   :  { %6175 = vmatpush3.bf16.msra.mxu0 %v6172_v63 }
 0x7d9   :  { %6207 = vmatpush3.bf16.msra.mxu1 %v6172_v63  ;;  %6177 = vmatprep.subr.bf16.mxu0 %v6176_v59  ;;  %v3556_v63 = vld [vmem:[%s8330_s21 + $0x8] sm:$0xff] }
 0x7da   :  { %6209 = vmatprep.subr.bf16.mxu1 %v6176_v59 }
 0x7dc   :  { %6179 = vmatpush3.bf16.msra.mxu0 %v6176_v59 }
 0x7dd   :  { %6211 = vmatpush3.bf16.msra.mxu1 %v6176_v59 }
 0x892   :  { %v5302_v18 = vpop.f32.mrb[16].mxu0 }
 0x893   :  { %v5303_v32 = vpop.f32.mrb[17].mxu0  ;;  %v5340_v45 = vpop.f32.mrb[16].mxu1 }
 0x894   :  { %v5304_v46 = vadd.f32 %v5303_v32, %v5302_v18  ;;  %v5341_v50 = vpop.f32.mrb[17].mxu1 }
 0x895   :  { %v5342_v51 = vadd.f32 %v5341_v50, %v5340_v45 }
 0x896   :  { %v5305_v60 = vpop.f32.mrb[18].mxu0 }
 0x897   :  { %v8114_v61 = vadd.f32 %v5342_v51, %v5304_v46  ;;  %v5306_v4 = vpop.f32.mrb[19].mxu0  ;;  %v5343_v2 = vpop.f32.mrb[18].mxu1 }
 0x898   :  { %v5307_v0 = vadd.f32 %v5306_v4, %v5305_v60  ;;  %v5344_v8 = vpop.f32.mrb[19].mxu1 }
 0x899   :  { %v5345_v16 = vadd.f32 %v5344_v8, %v5343_v2  ;;  %5564 = vmatprep.mubr.f32.mxu0 %v8114_v61  ;;  %v3478_v17 = vmul.f32 %v8114_v61, %v8114_v61  ;;  %v3729_v8 = vpop.permute.xlu0 %3728 }
 0x89b   :  { %v8119_v24 = vadd.f32 %v5345_v16, %v5307_v0  ;;  %5599 = vmatprep.mubr.f32.mxu1 %v3478_v17  ;;  %v3734_v17 = vpop.permute.xlu1 %3733 }
 0x89d   :  { %v3479_v25 = vmul.f32 %v8119_v24, %v8119_v24  ;;  %5565 = vmatmul.mubr.f32.vlgmr.msra.gmra.mrb[20].mxu0 %v8119_v24 }
 0x89e   :  { %5606 = vmatprep.mubr.msk.f32.mxu0 %vm3557_vm1, %v3555_v36 }
 0x89f   :  { %5600 = vmatmul.mubr.f32.vlgmr.msra.gmra.mrb[20].mxu1 %v3479_v25 }
 0x8a0   :  { %5613 = vmatprep.mubr.msk.f32.mxu1 %vm3557_vm1, %v3555_v36 }
 0x970   :  { %v5566_v21 = vpop.f32.mrb[20].mxu0 }
 0x971   :  { %v3469_v37 = vpop.f32.mrb[21].mxu0 }
 0x972   :  { %v6212_v31 = vpack.c.bf16 %v5566_v21, %v3469_v37  ;;  %v5601_v33 = vpop.f32.mrb[20].mxu1 }
 0x973   :  { %v3546_v38 = vpop.f32.mrb[21].mxu1 }
 0x974   :  { %v6216_v10 = vpack.c.bf16 %v5601_v33, %v3546_v38  ;;  %6213 = vmatprep.subr.bf16.mxu0 %v6212_v31  ;;  %v3750_v33 = vpop.permute.xlu1 %3749 }
 0x975   :  { %6215 = vmatpush3.bf16.msra.mxu0 %v6212_v31  ;;  %v3745_v31 = vpop.permute.xlu0 %3744 }
 0x976   :  { %6217 = vmatprep.subr.bf16.mxu1 %v6216_v10  ;;  %5616 = vmatprep.subr.msk.mxu0 %vm2458_vm9, %v3754_v1 }
 0x977   :  { %6219 = vmatpush3.bf16.msra.mxu1 %v6216_v10 }
 0x978   :  { %5607 = vmatmul.mubr.msk.f32.vlgmr.msra.gmra.mrb[22].mxu0 %vm3557_vm1, %v3556_v63  ;;  %5621 = vmatprep.subr.msk.mxu1 %vm2458_vm9, %v3754_v1 }
 0x979   :  { %5617 = vmatpush3.msk.msra.mxu0 %vm2458_vm9, %v3754_v1 }
 0x97a   :  { %5614 = vmatmul.mubr.msk.f32.vlgmr.msra.gmra.mrb[22].mxu1 %vm3557_vm1, %v3556_v63 }
 0x97b   :  { %5622 = vmatpush3.msk.msra.mxu1 %vm2458_vm9, %v3754_v1 }
 0x97c   :  { %6248 = vmatprep.subr.bf16.mxu1 %v8011_v19 }
 0xa4b   :  { %v5608_v58 = vpop.f32.mrb[22].mxu0 }
 0xa4c   :  { %v3715_v59 = vmul.f32 %v5608_v58, %v5608_v58  ;;  %v3630_v18 = vpop.f32.mrb[23].mxu0 }
 0xa4d   :  { %v3714_v32 = vmul.f32 %v3630_v18, %v3630_v18  ;;  %v5615_v45 = vpop.f32.mrb[22].mxu1 }
 0xa4e   :  { %v3717_v46 = vsub.f32 %v5615_v45, %v3715_v59  ;;  %v3705_v50 = vpop.f32.mrb[23].mxu1  ;;  %v4433_v59 = vld [vmem:[#allocation13 + $0x48] sm:$0xff] }
 0xa4f   :  { %v3716_v51 = vsub.f32 %v3705_v50, %v3714_v32  ;;  %v3930_v50 = vld [vmem:[#allocation11] sm:$0xff] }
 0xa50   :  { %v3719_v60 = vmax.f32 %v3717_v46, 0.0  ;;  %v3931_v46 = vld [vmem:[#allocation11 + $0x8] sm:$0xff] }
 0xa51   :  { %v3718_v4 = vmax.f32 %v3716_v51, 0.0 }
 0xa52   :  { %v3721_v2 = vadd.f32 1e-05, %v3719_v60 }
 0xa53   :  { %v3720_v0 = vadd.f32 1e-05, %v3718_v4 }
 0xa54   :  { %6497 = vrsqrt.f32 %v3721_v2 }
 0xa55   :  { %6499 = vrsqrt.f32 %v3720_v0  ;;  %v3941_v0 = vld [vmem:[#allocation11 + $0x18] sm:$0xff] }
 0xa5e   :  { %v6498_v16 = vpop.eup %6497 }
 0xa5f   :  { %v6500_v25 = vpop.eup %6499  ;;  %v3737_v36 = vmul.f32 %v6498_v16, %v3734_v17 }
 0xa60   :  { %v3736_v19 = vmul.f32 %v6500_v25, %v3729_v8  ;;  %v3940_v8 = vld [vmem:[#allocation11 + $0x10] sm:$0xff] }
 0xa61   :  { %v3741_v21 = vmul.f32 %v5608_v58, %v3737_v36  ;;  %v4432_v58 = vld [vmem:[#allocation13 + $0x40] sm:$0xff] }
 0xa62   :  { %5618 = vmatprep.mubr.msk.f32.mxu0 %vm2454_vm10, %v3736_v19  ;;  %v3740_v37 = vmul.f32 %v3736_v19, %v3630_v18  ;;  %v8234_v45 = vpack.c.bf16 %v4433_v59, %v4432_v58 }
 0xa63   :  { %5619 = vmatmul.mubr.msk.f32.vlgmr.msra.gmra.mrb[24].mxu0 %vm2454_vm10, %v3737_v36  ;;  %v3753_v10 = vsub.f32 %v3750_v33, %v3741_v21  ;;  %v3951_v21 = vld [vmem:[#allocation11 + $0x28] sm:$0xff] }
 0xa64   :  { %v3752_v38 = vsub.f32 %v3745_v31, %v3740_v37  ;;  %v3950_v37 = vld [vmem:[#allocation11 + $0x20] sm:$0xff] }
 0xa66   :  { %5623 = vmatprep.mubr.msk.f32.mxu1 %vm2454_vm10, %v3752_v38 }
 0xa67   :  { %5624 = vmatmul.mubr.msk.f32.vlgmr.msra.gmra.mrb[24].mxu1 %vm2454_vm10, %v3753_v10 }
 0xa68   :  { %6250 = vmatpush3.bf16.msra.mxu1 %v8014_v56  ;;  %4251 = vmatprep.mubr.f32.mxu1 %v7784_v39 }
 0xa69   :  { %6252 = vmatprep.subr.bf16.mxu1 %v8023_v13 }
 0xa6c   :  { %6254 = vmatpush3.bf16.msra.mxu1 %v8031_v34 }
 0xa6d   :  { %6256 = vmatprep.subr.bf16.mxu1 %v8037_v43 }
 0xa70   :  { %6258 = vmatpush3.bf16.msra.mxu1 %v8045_v53 }
 0xa71   :  { %6260 = vmatprep.subr.bf16.mxu1 %v8051_v55 }
 0xa74   :  { %6262 = vmatpush3.bf16.msra.mxu1 %v8057_v12  ;;  %v4030_v12 = vld [vmem:[%s8334_s15] sm:$0xff] }
 0xa75   :  { %6264 = vmatprep.subr.bf16.mxu1 %v8063_v14  ;;  %v4031_v14 = vld [vmem:[%s8334_s15 + $0x8] sm:$0xff] }
 0xa78   :  { %6266 = vmatpush3.bf16.msra.mxu1 %v8069_v28 }
 0xa79   :  { %6268 = vmatprep.subr.bf16.mxu1 %v8075_v30  ;;  %v4774_v30 = vld [vmem:[%s8336_s2] sm:$0xff] }
 0xa7c   :  { %6270 = vmatpush3.bf16.msra.mxu1 %v8081_v22  ;;  %v4424_v22 = vld [vmem:[#allocation13] sm:$0xff] }
 0xa7d   :  { %6272 = vmatprep.subr.bf16.mxu1 %v8087_v26  ;;  %v4426_v26 = vld [vmem:[#allocation13 + $0x10] sm:$0xff] }
 0xa80   :  { %6274 = vmatpush3.bf16.msra.mxu1 %v8093_v48  ;;  %v4427_v48 = vld [vmem:[#allocation13 + $0x18] sm:$0xff] }
 0xa81   :  { %6276 = vmatprep.subr.bf16.mxu1 %v8102_v52  ;;  %v4428_v52 = vld [vmem:[#allocation13 + $0x20] sm:$0xff] }
 0xa84   :  { %6278 = vmatpush3.bf16.msra.mxu1 %v8104_v6  ;;  %v4429_v6 = vld [vmem:[#allocation13 + $0x28] sm:$0xff] }
 0xa85   :  { %6280 = vmatprep.subr.bf16.mxu1 %v8016_v57 }
 0xa87   :  { %4252 = vmatmul.mubr.f32.vlgmr.msra.gmra.mrb[26].mxu1 %v7788_v41  ;;  %v6763_v41 = vmov 0.0|0.0  }
 0xa88   :  { %6282 = vmatpush3.bf16.msra.mxu1 %v8019_v11  ;;  %4321 = vmatprep.mubr.f32.mxu1 %v7786_v40 }
 0xa89   :  { %6284 = vmatprep.subr.bf16.mxu1 %v8027_v27  ;;  %6220 = vmatprep.subr.bf16.mxu0 %v6763_v41 }
 0xa8c   :  { %6286 = vmatpush3.bf16.msra.mxu1 %v8035_v35 }
 0xa8d   :  { %6288 = vmatprep.subr.bf16.mxu1 %v8041_v47  ;;  %v4009_v47 = vld [vmem:[%s8332_s20 + $0x8] sm:$0xff] }
 0xa8e   :  { %5111 = vmatprep.mubr.msk.f32.mxu0 %vm3557_vm1, %v4009_v47 }
 0xa90   :  { %6290 = vmatpush3.bf16.msra.mxu1 %v8049_v54 }
 0xa91   :  { %6292 = vmatprep.subr.bf16.mxu1 %v8054_v5  ;;  %v4329_v5 = vld [vmem:[%s8333_s11] sm:$0xff] }
 0xa94   :  { %6294 = vmatpush3.bf16.msra.mxu1 %v8061_v3  ;;  %v4330_v3 = vld [vmem:[%s8333_s11 + $0x8] sm:$0xff] }
 0xa95   :  { %6296 = vmatprep.subr.bf16.mxu1 %v8066_v20 }
 0xa98   :  { %6298 = vmatpush3.bf16.msra.mxu1 %v8073_v29  ;;  %v4775_v29 = vld [vmem:[%s8336_s2 + $0x8] sm:$0xff] }
 0xa99   :  { %6300 = vmatprep.subr.bf16.mxu1 %v8078_v7  ;;  %v4963_v7 = vld [vmem:[%s8337_s7] sm:$0xf] }
 0xa9c   :  { %6302 = vmatpush3.bf16.msra.mxu1 %v8085_v23  ;;  %v4425_v23 = vld [vmem:[#allocation13 + $0x8] sm:$0xff] }
 0xa9d   :  { %6304 = vmatprep.subr.bf16.mxu1 %v8090_v44  ;;  %v8217_v44 = vpack.c.bf16 %v4425_v23, %v4424_v22 }
 0xaa0   :  { %6306 = vmatpush3.bf16.msra.mxu1 %v8097_v49  ;;  %v8220_v49 = vpack.c.bf16 %v4427_v48, %v4426_v26  ;;  %v3993_v26 = vld [vmem:[#allocation11 + $0x78] sm:$0xff]  ;;  %v3992_v48 = vld [vmem:[#allocation11 + $0x70] sm:$0xff] }
 0xaa1   :  { %6308 = vmatprep.subr.bf16.mxu1 %v8107_v9  ;;  %v8224_v9 = vpack.c.bf16 %v4429_v6, %v4428_v52 }
 0xaa4   :  { %6310 = vmatpush3.bf16.msra.mxu1 %v8109_v15  ;;  %v4430_v15 = vld [vmem:[#allocation13 + $0x30] sm:$0xff] }
 0xaa5   :  { %6344 = vmatprep.subr.bf16.mxu1 %v8217_v44 }
 0xaa7   :  { %4322 = vmatmul.mubr.f32.vlgmr.msra.gmra.mrb[28].mxu1 %v7790_v42 }
 0xaa8   :  { %6346 = vmatpush3.bf16.msra.mxu1 %v8217_v44 }
 0xaa9   :  { %6348 = vmatprep.subr.bf16.mxu1 %v8220_v49 }
 0xaac   :  { %6350 = vmatpush3.bf16.msra.mxu1 %v8220_v49 }
 0xaad   :  { %6352 = vmatprep.subr.bf16.mxu1 %v8224_v9 }
 0xab0   :  { %6354 = vmatpush3.bf16.msra.mxu1 %v8224_v9 }
 0xb36   :  { %v5620_v39 = vpop.f32.mrb[24].mxu0 }
 0xb37   :  { %v3830_v40 = vpop.f32.mrb[25].mxu0  ;;  %v3921_v56 = vmul.f32 %v5620_v39, %v8119_v24 }
 0xb38   :  { %v3920_v57 = vmul.f32 %v3830_v40, %v8114_v61  ;;  %v4431_v61 = vld [vmem:[#allocation13 + $0x38] sm:$0xff]  ;;  %v3961_v40 = vld [vmem:[#allocation11 + $0x38] sm:$0xff] }
 0xb39   :  { %v8228_v63 = vpack.c.bf16 %v4431_v61, %v4430_v15 }
 0xb3a   :  { %v5625_v11 = vpop.f32.mrb[24].mxu1 }
 0xb3b   :  { %v3923_v13 = vadd.f32 %v5625_v11, %v3921_v56  ;;  %v3911_v27 = vpop.f32.mrb[25].mxu1  ;;  %6356 = vmatprep.subr.bf16.mxu1 %v8228_v63  ;;  %v3960_v56 = vld [vmem:[#allocation11 + $0x30] sm:$0xff] }
 0xb3c   :  { %v3922_v34 = vadd.f32 %v3920_v57, %v3911_v27  ;;  %6358 = vmatpush3.bf16.msra.mxu1 %v8228_v63 }
 0xb3d   :  { %v8178_v35 = vmax.f32 %v3923_v13, 0.0  ;;  %6360 = vmatprep.subr.bf16.mxu1 %v8234_v45 }
 0xb3e   :  { %v8180_v43 = vmax.f32 %v3922_v34, 0.0 }
 0xb3f   :  { %3928 = vrot.lane.b32.xlu1 %v8178_v35, %s6764_s24 }
 0xb40   :  { %3926 = vrot.lane.b32.xlu0 %v8180_v43, %s6764_s24  ;;  %v6233_v42 = vpack.c.bf16 %v8178_v35, %v8180_v43  ;;  %6362 = vmatpush3.bf16.msra.mxu1 %v8234_v45 }
 0xb43   :  { %3938 = vrot.lane.b32.xlu1 %v8178_v35, %s6704_s27 }
 0xb44   :  { %3936 = vrot.lane.b32.xlu0 %v8180_v43, %s6704_s27  ;;  %s6766_s27 = smov 121  }
 0xb47   :  { %3948 = vrot.lane.b32.xlu1 %v8178_v35, %s6765_s12 }
 0xb48   :  { %3946 = vrot.lane.b32.xlu0 %v8180_v43, %s6765_s12 }
 0xb4b   :  { %3958 = vrot.lane.b32.xlu1 %v8178_v35, %s6734_s6 }
 0xb4c   :  { %3956 = vrot.lane.b32.xlu0 %v8180_v43, %s6734_s6  ;;  %s8335_s6 = sld [smem:[#allocation25_spill]] }
 0xb4f   :  { %3970 = vrot.lane.b32.xlu1 %v8178_v35, %s6735_s18 }
 0xb50   :  { %3968 = vrot.lane.b32.xlu0 %v8180_v43, %s6735_s18  ;;  %s6768_s18 = smov 119  }
 0xb52   :  { %v4761_v20 = vld [vmem:[%s8335_s6 + $0x8] sm:$0xff]  ;;  %v4760_v28 = vld [vmem:[%s8335_s6] sm:$0xff] }
 0xb53   :  { %3980 = vrot.lane.b32.xlu1 %v8178_v35, %s6766_s27 }
 0xb54   :  { %3978 = vrot.lane.b32.xlu0 %v8180_v43, %s6766_s27 }
 0xb57   :  { %3990 = vrot.lane.b32.xlu1 %v8178_v35, %s6767_s28 }
 0xb58   :  { %3988 = vrot.lane.b32.xlu0 %v8180_v43, %s6767_s28 }
 0xb5a   :  { %v5428_v53 = vpop.f32.mrb[26].mxu1 }
 0xb5b   :  { %v5429_v54 = vpop.f32.mrb[27].mxu1  ;;  %4000 = vrot.lane.b32.xlu1 %v8178_v35, %s6768_s18 }
 0xb5c   :  { %v5430_v55 = vadd.f32 %v5429_v54, %v5428_v53  ;;  %3998 = vrot.lane.b32.xlu0 %v8180_v43, %s6768_s18  ;;  %v3973_v54 = vld [vmem:[#allocation11 + $0x58] sm:$0xff]  ;;  %v4002_v43 = vld [vmem:[#allocation11 + $0x80] sm:$0xff] }
 0xb5f   :  { %4333 = vperm.xlu1 %6493, %v4329_v5  }
 0xb60   :  { %4034 = vperm.xlu0 %6492, %v4030_v12  }
 0xb63   :  { %4338 = vperm.xlu1 %6493, %v4330_v3  }
 0xb64   :  { %4039 = vperm.xlu0 %6492, %v4031_v14  }
 0xb67   :  { %4769 = vperm.xlu1 %6493, %v4761_v20   ;;  %v3983_v20 = vld [vmem:[#allocation11 + $0x68] sm:$0xff] }
 0xb68   :  { %4764 = vperm.xlu0 %6492, %v4760_v28   ;;  %v3982_v28 = vld [vmem:[#allocation11 + $0x60] sm:$0xff] }
 0xb6b   :  { %4785 = vperm.xlu1 %6493, %v4775_v29  }
 0xb6c   :  { %4780 = vperm.xlu0 %6492, %v4774_v30  }
 0xb70   :  { %4966 = vperm.xlu0 %6492, %v4963_v7  }
 0xb7a   :  { %v5463_v24 = vpop.f32.mrb[28].mxu1 }
 0xb7b   :  { %v5464_v1 = vpop.f32.mrb[29].mxu1 }
 0xb7c   :  { %v5465_v18 = vadd.f32 %v5464_v1, %v5463_v24  ;;  %v4003_v24 = vld [vmem:[#allocation11 + $0x88] sm:$0xff] }
 0xb7e   :  { %v8232_v32 = vadd.f32 %v5465_v18, %v5430_v55  ;;  %v3972_v55 = vld [vmem:[#allocation11 + $0x50] sm:$0xff] }
 0xbb1   :  { %v3929_v51 = vpop.permute.xlu1 %3928 }
 0xbb2   :  { %v3933_v60 = vmul.f32 %v3931_v46, %v3929_v51  ;;  %v3927_v4 = vpop.permute.xlu0 %3926  ;;  %v4008_v46 = vld [vmem:[%s8332_s20] sm:$0xff]  ;;  %v4010_v51 = vld [vmem:[%s8332_s20 + $0x10] sm:$0xff] }
 0xbb3   :  { %v3932_v2 = vmul.f32 %v3930_v50, %v3927_v4  ;;  %v4011_v50 = vld [vmem:[%s8332_s20 + $0x18] sm:$0xff]  ;;  %v4328_v4 = vld [vmem:[%s8338_s16 + $0x8] sm:$0xff] }
 0xbb5   :  { %v6221_v16 = vpack.c.bf16 %v3933_v60, %v3932_v2  ;;  %v3939_v17 = vpop.permute.xlu1 %3938  ;;  %v4327_v60 = vld [vmem:[%s8338_s16] sm:$0xff]  ;;  %v4435_v2 = vld [vmem:[#allocation13 + $0x58] sm:$0xff] }
 0xbb6   :  { %v3943_v25 = vmul.f32 %v3941_v0, %v3939_v17  ;;  %v3937_v36 = vpop.permute.xlu0 %3936 }
 0xbb7   :  { %v3942_v19 = vmul.f32 %v3940_v8, %v3937_v36  ;;  %6222 = vmatpush1.bf16.msra.mxu0 %v6221_v16 }
 0xbb8   :  { %6223 = vmatprep.subr.bf16.mxu0 %v6763_v41 }
 0xbb9   :  { %v6224_v31 = vpack.c.bf16 %v3943_v25, %v3942_v19  ;;  %v3949_v33 = vpop.permute.xlu1 %3948 }
 0xbba   :  { %v3953_v38 = vmul.f32 %v3951_v21, %v3949_v33  ;;  %v3947_v10 = vpop.permute.xlu0 %3946 }
 0xbbb   :  { %v3952_v39 = vmul.f32 %v3950_v37, %v3947_v10  ;;  %6225 = vmatpush1.bf16.msra.mxu0 %v6224_v31 }
 0xbbc   :  { %6226 = vmatprep.subr.bf16.mxu0 %v6763_v41 }
 0xbbd   :  { %v6227_v57 = vpack.c.bf16 %v3953_v38, %v3952_v39  ;;  %v3959_v11 = vpop.permute.xlu1 %3958 }
 0xbbe   :  { %v3963_v13 = vmul.f32 %v3961_v40, %v3959_v11  ;;  %v3957_v27 = vpop.permute.xlu0 %3956 }
 0xbbf   :  { %v3962_v34 = vmul.f32 %v3960_v56, %v3957_v27  ;;  %6228 = vmatpush1.bf16.msra.mxu0 %v6227_v57 }
 0xbc0   :  { %6229 = vmatprep.subr.bf16.mxu0 %v6763_v41 }
 0xbc1   :  { %v6230_v47 = vpack.c.bf16 %v3963_v13, %v3962_v34  ;;  %v3971_v53 = vpop.permute.xlu1 %3970  ;;  %v4592_v34 = vld [vmem:[%s6912_s19] sm:$0xff] }
 0xbc2   :  { %v3969_v5 = vpop.permute.xlu0 %3968  ;;  %v3975_v12 = vmul.f32 %v3973_v54, %v3971_v53 }
 0xbc3   :  { %6231 = vmatpush1.bf16.msra.mxu0 %v6230_v47  ;;  %v3974_v3 = vmul.f32 %v3972_v55, %v3969_v5 }
 0xbc4   :  { %6232 = vmatprep.subr.bf16.mxu0 %v6763_v41 }
 0xbc5   :  { %v3981_v14 = vpop.permute.xlu1 %3980  ;;  %v6236_v30 = vpack.c.bf16 %v3975_v12, %v3974_v3  ;;  %v4593_v3 = vld [vmem:[%s6912_s19 + $0x8] sm:$0xff] }
 0xbc6   :  { %v3979_v29 = vpop.permute.xlu0 %3978  ;;  %v3985_v7 = vmul.f32 %v3983_v20, %v3981_v14  ;;  %v4790_v14 = vld [vmem:[%s6922_s14] sm:$0x3]  ;;  %s8339_s14 = sld [smem:[#allocation27_spill]] }
 0xbc7   :  { %6234 = vmatpush1.bf16.msra.mxu0 %v6233_v42  ;;  %v3984_v22 = vmul.f32 %v3982_v28, %v3979_v29 }
 0xbc8   :  { %6235 = vmatprep.subr.bf16.mxu0 %v6763_v41 }
 0xbc9   :  { %v3991_v23 = vpop.permute.xlu1 %3990  ;;  %v6239_v6 = vpack.c.bf16 %v3985_v7, %v3984_v22 }
 0xbca   :  { %v3989_v52 = vpop.permute.xlu0 %3988  ;;  %v3995_v15 = vmul.f32 %v3993_v26, %v3991_v23 }
 0xbcb   :  { %6237 = vmatpush1.bf16.msra.mxu0 %v6236_v30  ;;  %v3994_v61 = vmul.f32 %v3992_v48, %v3989_v52 }
 0xbcc   :  { %6238 = vmatprep.subr.bf16.mxu0 %v6763_v41 }
 0xbcd   :  { %v4001_v35 = vpop.permute.xlu1 %4000  ;;  %v6242_v1 = vpack.c.bf16 %v3995_v15, %v3994_v61 }
 0xbce   :  { %v3999_v42 = vpop.permute.xlu0 %3998  ;;  %v4005_v58 = vmul.f32 %v4003_v24, %v4001_v35 }
 0xbcf   :  { %6240 = vmatpush1.bf16.msra.mxu0 %v6239_v6  ;;  %v4004_v59 = vmul.f32 %v4002_v43, %v3999_v42 }
 0xbd0   :  { %6241 = vmatprep.subr.bf16.mxu0 %v6763_v41 }
 0xbd1   :  { %v6245_v18 = vpack.c.bf16 %v4005_v58, %v4004_v59 }
 0xbd3   :  { %6243 = vmatpush1.bf16.msra.mxu0 %v6242_v1 }
 0xbd4   :  { %6244 = vmatprep.subr.bf16.mxu0 %v6763_v41 }
 0xbd7   :  { %6246 = vmatpush1.bf16.msra.mxu0 %v6245_v18 }
 0xbd8   :  { %5626 = vmatprep.subr.mxu0 %v8232_v32 }
 0xbda   :  { %4113 = vmatmul.mubr.f32.vlgmr.msra.gmra.mrb[26].mxu0 %v4008_v46 }
 0xbdb   :  { %5627 = vmatpush3.msra.mxu0 %v8232_v32  ;;  %5112 = vmatprep.mubr.msk.f32.mxu0 %vm3557_vm1, %v4011_v50  ;;  %v4434_v32 = vld [vmem:[#allocation13 + $0x50] sm:$0xff] }
 0xbdc   :  { %6312 = vmatprep.subr.bf16.mxu0 %v8217_v44  ;;  %v6331_v0 = vpack.c.bf16 %v4435_v2, %v4434_v32 }
 0xbde   :  { %4118 = vmatmul.mubr.f32.gmra.mrb[28].mxu0 %v4010_v51  ;;  %6364 = vmatprep.subr.bf16.mxu1 %v6331_v0  ;;  %v4334_v17 = vpop.permute.xlu1 %4333 }
 0xbdf   :  { %5628 = vmatprep.mubr.msk.f32.mxu0 %vm1635_vm4, %v4327_v60  ;;  %6366 = vmatpush3.bf16.msra.mxu1 %v6331_v0  ;;  %v4035_v36 = vpop.permute.xlu0 %4034 }
 0xbe2   :  { %5629 = vmatmul.mubr.msk.f32.vlgmr.msra.gmra.mrb[30].mxu0 %vm1635_vm4, %v4328_v4  ;;  %v4339_v37 = vpop.permute.xlu1 %4338 }
 0xbe3   :  { %6314 = vmatpush3.bf16.msra.mxu0 %v8217_v44  ;;  %v4436_v44 = vld [vmem:[#allocation13 + $0x60] sm:$0xff]  ;;  %v4040_v31 = vpop.permute.xlu0 %4039 }
 0xbe4   :  { %6316 = vmatprep.subr.bf16.mxu0 %v8220_v49 }
 0xbe6   :  { %v4770_v35 = vpop.permute.xlu1 %4769 }
 0xbe7   :  { %6318 = vmatpush3.bf16.msra.mxu0 %v8220_v49  ;;  %v4437_v49 = vld [vmem:[#allocation13 + $0x68] sm:$0xff]  ;;  %v4765_v61 = vpop.permute.xlu0 %4764 }
 0xbe8   :  { %6320 = vmatprep.subr.bf16.mxu0 %v8224_v9  ;;  %v6335_v8 = vpack.c.bf16 %v4437_v49, %v4436_v44 }
 0xbea   :  { %6368 = vmatprep.subr.bf16.mxu1 %v6335_v8  ;;  %v4786_v46 = vpop.permute.xlu1 %4785 }
 0xbeb   :  { %6322 = vmatpush3.bf16.msra.mxu0 %v8224_v9  ;;  %6370 = vmatpush3.bf16.msra.mxu1 %v6335_v8  ;;  %v4438_v9 = vld [vmem:[#allocation13 + $0x70] sm:$0xff]  ;;  %v4781_v18 = vpop.permute.xlu0 %4780 }
 0xbec   :  { %6324 = vmatprep.subr.bf16.mxu0 %v8228_v63 }
 0xbef   :  { %6326 = vmatpush3.bf16.msra.mxu0 %v8228_v63  ;;  %v4439_v63 = vld [vmem:[#allocation13 + $0x78] sm:$0xff] }
 0xbf0   :  { %6328 = vmatprep.subr.bf16.mxu0 %v8234_v45  ;;  %v6339_v16 = vpack.c.bf16 %v4439_v63, %v4438_v9 }
 0xbf2   :  { %6372 = vmatprep.subr.bf16.mxu1 %v6339_v16 }
 0xbf3   :  { %6330 = vmatpush3.bf16.msra.mxu0 %v8234_v45  ;;  %6374 = vmatpush3.bf16.msra.mxu1 %v6339_v16 }
 0xbf4   :  { %6332 = vmatprep.subr.bf16.mxu0 %v6331_v0 }
 0xbf7   :  { %6334 = vmatpush3.bf16.msra.mxu0 %v6331_v0 }
 0xbf8   :  { %6336 = vmatprep.subr.bf16.mxu0 %v6335_v8 }
 0xbfb   :  { %6338 = vmatpush3.bf16.msra.mxu0 %v6335_v8 }
 0xbfc   :  { %6340 = vmatprep.subr.bf16.mxu0 %v6339_v16 }
 0xbff   :  { %6342 = vmatpush3.bf16.msra.mxu0 %v6339_v16  ;;  %v4962_v16 = vld [vmem:[%s8339_s14] sm:$0xf] }
 0xcad   :  { %v4114_v45 = vpop.f32.mrb[26].mxu0 }
 0xcae   :  { %v4116_v25 = vpop.f32.mrb[27].mxu0  ;;  %v4115_v40 = vadd.f32 %v4114_v45, %v4035_v36  ;;  %v4967_v45 = vpop.permute.xlu0 %4966 }
 0xcb1   :  { %v4119_v19 = vpop.f32.mrb[28].mxu0 }
 0xcb2   :  { %v4121_v21 = vpop.f32.mrb[29].mxu0  ;;  %v4120_v38 = vadd.f32 %v4119_v19, %v4040_v31 }
 0xcb5   :  { %v5630_v33 = vpop.f32.mrb[30].mxu0 }
 0xcb6   :  { %v4419_v10 = vadd.f32 %v5630_v33, %v4339_v37  ;;  %v4413_v39 = vpop.f32.mrb[31].mxu0 }
 0xcb7   :  { %v4414_v56 = vadd.f32 %v4413_v39, %v4334_v17 }
 0xcb8   :  { %v8270_v57 = vadd.f32 %v4419_v10, %v4120_v38 }
 0xcb9   :  { %v8272_v11 = vadd.f32 %v4414_v56, %v4115_v40 }
 0xcba   :  { %v4516_v27 = vmul.f32 %v8270_v57, %v8270_v57 }
 0xcbb   :  { %5663 = vmatprep.mubr.f32.mxu0 %v8272_v11  ;;  %v4515_v13 = vmul.f32 %v8272_v11, %v8272_v11 }
 0xcbc   :  { %5664 = vmatmul.mubr.f32.vlgmr.msra.gmra.mrb[32].mxu0 %v8270_v57 }
 0xcbd   :  { %5698 = vmatprep.mubr.f32.mxu1 %v4515_v13  ;;  %5705 = vmatprep.mubr.msk.f32.mxu0 %vm3557_vm1, %v4592_v34 }
 0xcbe   :  { %5699 = vmatmul.mubr.f32.vlgmr.msra.gmra.mrb[30].mxu1 %v4516_v27 }
 0xd8f   :  { %v5665_v47 = vpop.f32.mrb[32].mxu0 }
 0xd90   :  { %v4506_v53 = vpop.f32.mrb[33].mxu0 }
 0xd91   :  { %v6375_v54 = vpack.c.bf16 %v5665_v47, %v4506_v53  ;;  %v5700_v55 = vpop.f32.mrb[30].mxu1 }
 0xd92   :  { %v4583_v5 = vpop.f32.mrb[31].mxu1 }
 0xd93   :  { %v6379_v12 = vpack.c.bf16 %v5700_v55, %v4583_v5  ;;  %6376 = vmatprep.subr.bf16.mxu0 %v6375_v54 }
 0xd94   :  { %6378 = vmatpush3.bf16.msra.mxu0 %v6375_v54 }
 0xd95   :  { %6380 = vmatprep.subr.bf16.mxu0 %v6379_v12 }
 0xd97   :  { %5706 = vmatmul.mubr.msk.f32.vlgmr.msra.gmra.mrb[34].mxu0 %vm3557_vm1, %v4593_v3 }
 0xd98   :  { %6382 = vmatpush3.bf16.msra.mxu0 %v6379_v12  ;;  %5712 = vmatprep.mubr.msk.f32.mxu0 %vm3557_vm1, %v4592_v34 }
 0xd99   :  { %5715 = vmatprep.subr.msk.mxu0 %vm2458_vm9, %v4790_v14 }
 0xd9b   :  { %5713 = vmatmul.mubr.msk.f32.vlgmr.msra.gmra.mrb[36].mxu0 %vm3557_vm1, %v4593_v3 }
 0xd9c   :  { %5716 = vmatpush3.msk.msra.mxu0 %vm2458_vm9, %v4790_v14 }
 0xd9d   :  { %5720 = vmatprep.subr.msk.mxu0 %vm2458_vm9, %v4790_v14 }
 0xe6a   :  { %v5707_v20 = vpop.f32.mrb[34].mxu0 }
 0xe6b   :  { %v4666_v28 = vpop.f32.mrb[35].mxu0  ;;  %v4751_v29 = vmul.f32 %v5707_v20, %v5707_v20 }
 0xe6c   :  { %v4750_v30 = vmul.f32 %v4666_v28, %v4666_v28 }
 0xe6e   :  { %v5714_v7 = vpop.f32.mrb[36].mxu0 }
 0xe6f   :  { %v4753_v22 = vsub.f32 %v5714_v7, %v4751_v29  ;;  %v4741_v23 = vpop.f32.mrb[37].mxu0 }
 0xe70   :  { %v4752_v26 = vsub.f32 %v4741_v23, %v4750_v30 }
 0xe71   :  { %v4755_v48 = vmax.f32 %v4753_v22, 0.0 }
 0xe72   :  { %v4754_v52 = vmax.f32 %v4752_v26, 0.0 }
 0xe73   :  { %v4757_v6 = vadd.f32 1e-05, %v4755_v48 }
 0xe74   :  { %v4756_v15 = vadd.f32 1e-05, %v4754_v52 }
 0xe75   :  { %6501 = vrsqrt.f32 %v4757_v6 }
 0xe76   :  { %6503 = vrsqrt.f32 %v4756_v15 }
 0xe7f   :  { %v6502_v24 = vpop.eup %6501 }
 0xe80   :  { %v6504_v43 = vpop.eup %6503  ;;  %v4773_v42 = vmul.f32 %v6502_v24, %v4770_v35 }
 0xe81   :  { %v4772_v1 = vmul.f32 %v6504_v43, %v4765_v61 }
 0xe82   :  { %v4777_v58 = vmul.f32 %v5707_v20, %v4773_v42 }
 0xe83   :  { %5717 = vmatprep.mubr.msk.f32.mxu0 %vm2454_vm10, %v4772_v1  ;;  %v4776_v59 = vmul.f32 %v4772_v1, %v4666_v28 }
 0xe84   :  { %5718 = vmatmul.mubr.msk.f32.vlgmr.msra.gmra.mrb[38].mxu0 %vm2454_vm10, %v4773_v42  ;;  %v4789_v51 = vsub.f32 %v4786_v46, %v4777_v58 }
 0xe85   :  { %5721 = vmatpush3.msk.msra.mxu0 %vm2458_vm9, %v4790_v14  ;;  %v4788_v50 = vsub.f32 %v4781_v18, %v4776_v59 }
 0xe86   :  { %6383 = vmatprep.subr.bf16.mxu0 %v6763_v41 }
 0xe87   :  { %5722 = vmatprep.mubr.msk.f32.mxu0 %vm2454_vm10, %v4788_v50 }
 0xe88   :  { %5723 = vmatmul.mubr.msk.f32.vlgmr.msra.gmra.mrb[40].mxu0 %vm2454_vm10, %v4789_v51 }
 0xe89   :  { %5729 = vmatprep.mubr.msk.f32.mxu0 %vm6761_vm6, %v6760_v62 }
 0xf57   :  { %v5719_v60 = vpop.f32.mrb[38].mxu0 }
 0xf58   :  { %v4866_v4 = vpop.f32.mrb[39].mxu0  ;;  %v4957_v32 = vmul.f32 %v5719_v60, %v8270_v57 }
 0xf59   :  { %v4956_v2 = vmul.f32 %v4866_v4, %v8272_v11 }
 0xf5b   :  { %v5724_v0 = vpop.f32.mrb[40].mxu0 }
 0xf5c   :  { %v4959_v44 = vadd.f32 %v5724_v0, %v4957_v32  ;;  %v4947_v49 = vpop.f32.mrb[41].mxu0 }
 0xf5d   :  { %v4958_v8 = vadd.f32 %v4956_v2, %v4947_v49 }
 0xf5e   :  { %v4961_v41 = vmax.f32 %v4959_v44, 0.0 }
 0xf5f   :  { %v4960_v9 = vmax.f32 %v4958_v8, 0.0 }
 0xf61   :  { %v6384_v63 = vpack.c.bf16 %v4961_v41, %v4960_v9 }
 0xf63   :  { %6385 = vmatpush3.bf16.msra.mxu0 %v6384_v63 }
 0xf66   :  { %5730 = vmatmul.mubr.msk.f32.vlgmr.msra.gmra.mrb[42].mxu0 %vm3557_vm1, %v4962_v16 }
0x1039   :  { %v5038_v62 = vpop.f32.mrb[42].mxu0 }
0x103a   :  { %v5039_v17 = vadd.f32 %v5038_v62, %v4967_v45  ;;  %v5731_v25 = vpop.f32.mrb[43].mxu0 }
0x103c   :  { %5042 = vst [vmem:[%s6927_s3] sm:$0xf] %v5039_v17 }
0x103d   :  { %5047 = vsyncpa [#allocation4], 1 }
0x103e   :  { %5048 = vsyncpa [#allocation6], 1 }
0x103f   :  { %5049 = vsyncpa [#allocation9], 1 }
0x1040   :  { %5050 = vsyncpa [#allocation12], 1 }

</bundles_post_ra>
